<compile_context>
chip_gen: v6e
topology: v6e:2x2x1
jax: 0.10.0
libtpu: 0.0.40
codegen_flags: <defaults>
</compile_context>

<pallas_src>
import jax
import jax.numpy as jnp
from jax.experimental import pallas as pl
from jax.experimental.pallas import tpu as pltpu

LANES = 128
OUT_ROWS = 8  # sublane-aligned rows per image in the GAP output block


def _round_up(v, m):
    return (v + m - 1) // m * m


# ----------------------------------------------------------------------------
# Fused kernel: conv1+bn1+relu -> conv2+bn2+relu -> global average pool
# (one grid step == one image)
# ----------------------------------------------------------------------------
def _make_fused_kernel(*, QP, HALO, WP, HW, C1P, C2P):
    inv_hw = 1.0 / float(HW)

    def kernel(a1_ref, w1_ref, s1_ref, w2_ref, s2_ref, mask_ref,
               out_ref, h1_ref, acc_ref):
        mask = mask_ref[...]                                   # (QP, 128) f32

        # ---- conv1 (+ folded BN scale): ONE bf16 MXU matmul, then shift+ReLU
        h1 = jnp.dot(a1_ref[...], w1_ref[...],
                     preferred_element_type=jnp.float32)       # (QP, C1P)
        h1 = jnp.maximum(h1 + s1_ref[...], 0.0) * mask         # zero the border

        # ---- stash h1 into a halo-padded VMEM scratch (never touches HBM)
        zero_halo = jnp.zeros((HALO, C1P), jnp.float32)
        h1_ref[pl.ds(0, HALO), :] = zero_halo
        h1_ref[pl.ds(HALO + QP, HALO), :] = zero_halo
        h1_ref[pl.ds(HALO, QP), :] = h1                        # aligned offset

        # ---- conv2 (+ folded BN scale): 9 shifted-slice bf16 matmuls,
        #      accumulated in an f32 VMEM scratch.
        for k in range(9):
            dy, dx = divmod(k, 3)
            off = HALO + (dy - 1) * WP + (dx - 1)
            lhs = h1_ref[pl.ds(off, QP), :].astype(jnp.bfloat16)
            part = jnp.dot(lhs, w2_ref[k],
                           preferred_element_type=jnp.float32)  # (QP, C2P)
            if k == 0:
                acc_ref[...] = part
            else:
                acc_ref[...] += part

        # ---- BN shift + ReLU + border mask + global average pool (fused)
        h2 = jnp.maximum(acc_ref[...] + s2_ref[...], 0.0) * mask
        gap = jnp.sum(h2, axis=0, keepdims=True) * inv_hw       # (1, C2P)
        out_ref[...] = jnp.zeros_like(out_ref)
        out_ref[pl.ds(0, 1), :] = gap

    return kernel


# ----------------------------------------------------------------------------
# Wrapper (pure glue on tiny tensors: layout, BN folding, padding)
# ----------------------------------------------------------------------------
def net_forward(x_nchw, params, eps=1e-5):
    """Net.forward: backbone minus last (Linear) child.
    Input NCHW -> output NCHW (N, C2, 1, 1)."""
    n, cin, h, w = x_nchw.shape
    c1 = params["w1"].shape[-1]
    c2 = params["w2"].shape[-1]

    hp, wp = h + 2, w + 2                  # padded ('same') spatial grid
    q = hp * wp                            # rows per image in padded domain
    qp = _round_up(q, 8)                   # sublane-aligned rows per image
    halo = _round_up(wp + 1, 8)            # halo rows for conv2 shifted slices
    h1_rows = qp + 2 * halo
    k1 = 9 * cin
    k1p = _round_up(k1, LANES)             # contraction dim padded to 128
    c1p = _round_up(c1, LANES)
    c2p = _round_up(c2, LANES)
    assert c1p == LANES and c2p == LANES, "this kernel assumes <=128 channels"

    x = jnp.transpose(x_nchw, (0, 2, 3, 1)).astype(jnp.float32)   # NHWC

    # conv1 im2col over the padded output grid (tiny; lane-dense, bf16).
    xp2 = jnp.pad(x, ((0, 0), (2, 2), (2, 2), (0, 0)))
    slabs = [xp2[:, dy:dy + hp, dx:dx + wp, :]
             for dy in range(3) for dx in range(3)]
    patches = jnp.stack(slabs, axis=3)                 # (N, HP, WP, 9, Cin)
    a1 = patches.reshape(n, q, k1)
    a1 = jnp.pad(a1, ((0, 0), (0, qp - q), (0, k1p - k1)))
    a1 = a1.reshape(n * qp, k1p).astype(jnp.bfloat16)

    # Fold BN scale into the conv weights; shift stays a (1, C) row.
    scale1 = params["g1"] / jnp.sqrt(params["v1"] + eps)
    shift1 = (params["b1"] - params["m1"]) * scale1 + params["be1"]
    w1m = (params["w1"] * scale1[None, None, None, :]).reshape(k1, c1)
    w1m = jnp.pad(w1m, ((0, k1p - k1), (0, c1p - c1))).astype(jnp.bfloat16)
    s1 = jnp.pad(shift1, (0, c1p - c1)).reshape(1, c1p).astype(jnp.float32)

    scale2 = params["g2"] / jnp.sqrt(params["v2"] + eps)
    shift2 = (params["b2"] - params["m2"]) * scale2 + params["be2"]
    w2m = (params["w2"] * scale2[None, None, None, :]).reshape(9, c1, c2)
    w2m = jnp.pad(w2m, ((0, 0), (0, c1p - c1), (0, c2p - c2)))
    w2m = w2m.astype(jnp.bfloat16)
    s2 = jnp.pad(shift2, (0, c2p - c2)).reshape(1, c2p).astype(jnp.float32)

    # Interior mask over the padded grid (zeros the 'same'-conv border rows).
    yq = jnp.arange(hp).reshape(hp, 1)
    xq = jnp.arange(wp).reshape(1, wp)
    interior = (yq >= 1) & (yq <= h) & (xq >= 1) & (xq <= w)
    mask = interior.astype(jnp.float32).reshape(q, 1)
    mask = jnp.pad(mask, ((0, qp - q), (0, 0)))
    mask = jnp.broadcast_to(mask, (qp, LANES))

    kernel = _make_fused_kernel(QP=qp, HALO=halo, WP=wp, HW=h * w,
                                C1P=c1p, C2P=c2p)

    out = pl.pallas_call(
        kernel,
        out_shape=jax.ShapeDtypeStruct((n * OUT_ROWS, c2p), jnp.float32),
        grid_spec=pltpu.PrefetchScalarGridSpec(
            num_scalar_prefetch=0,
            grid=(n,),                                          # one image/step
            in_specs=[
                pl.BlockSpec((qp, k1p), lambda i: (i, 0)),        # a1 (im2col)
                pl.BlockSpec((k1p, c1p), lambda i: (0, 0)),       # w1 folded
                pl.BlockSpec((1, c1p), lambda i: (0, 0)),         # shift1
                pl.BlockSpec((9, c1p, c2p), lambda i: (0, 0, 0)),  # w2 folded
                pl.BlockSpec((1, c2p), lambda i: (0, 0)),         # shift2
                pl.BlockSpec((qp, LANES), lambda i: (0, 0)),      # border mask
            ],
            out_specs=pl.BlockSpec((OUT_ROWS, c2p), lambda i: (i, 0)),
            scratch_shapes=[
                pltpu.VMEM((h1_rows, c1p), jnp.float32),   # halo-padded h1
                pltpu.VMEM((qp, c2p), jnp.float32),        # conv2 accumulator
            ],
        ),
        compiler_params=pltpu.CompilerParams(
            dimension_semantics=("parallel",)),             # v7x: 2 TensorCores
    )(a1, w1m, s1, w2m, s2, mask)

    feat = out.reshape(n, OUT_ROWS, c2p)[:, 0, :c2]          # (N, C2)
    # Last backbone child (Linear) is intentionally dropped, per Net.__init__.
    return feat.reshape(n, c2, 1, 1)                          # NCHW (N,C2,1,1)


# ----------------------------------------------------------------------------
# Deterministic synthetic parameters (no checkpoint load)
# ----------------------------------------------------------------------------
def init_params(key, cin=4, c1=32, c2=64):
    ks = jax.random.split(key, 6)
    return {
        "w1": jax.random.normal(ks[0], (3, 3, cin, c1), jnp.float32) * 0.1,
        "b1": jax.random.normal(ks[1], (c1,), jnp.float32) * 0.01,
        "g1": jnp.ones((c1,), jnp.float32),
        "be1": jnp.zeros((c1,), jnp.float32),
        "m1": jnp.zeros((c1,), jnp.float32),
        "v1": jnp.ones((c1,), jnp.float32),
        "w2": jax.random.normal(ks[2], (3, 3, c1, c2), jnp.float32) * 0.05,
        "b2": jax.random.normal(ks[3], (c2,), jnp.float32) * 0.01,
        "g2": jnp.ones((c2,), jnp.float32) * 1.1,
        "be2": jnp.ones((c2,), jnp.float32) * 0.05,
        "m2": jnp.zeros((c2,), jnp.float32),
        "v2": jnp.ones((c2,), jnp.float32),
    }


# ----------------------------------------------------------------------------
# Pure-JAX f32 reference (for a loose bf16-tolerance correctness check)
# ----------------------------------------------------------------------------
def reference_forward(x, params, eps=1e-5):
    def conv_bn_relu(y, wgt, b, g, be, m, v):
        wo = jnp.transpose(wgt, (3, 2, 0, 1))                 # HWIO -> OIHW
        y = jax.lax.conv_general_dilated(
            y, wo, window_strides=(1, 1), padding="SAME",
            dimension_numbers=("NCHW", "OIHW", "NCHW"),
            precision=jax.lax.Precision.HIGHEST)
        y = y + b[None, :, None, None]
        scale = g / jnp.sqrt(v + eps)
        y = (y - m[None, :, None, None]) * scale[None, :, None, None] \
            + be[None, :, None, None]
        return jnp.maximum(y, 0.0)

    y = conv_bn_relu(x, params["w1"], params["b1"], params["g1"],
                     params["be1"], params["m1"], params["v1"])
    y = conv_bn_relu(y, params["w2"], params["b2"], params["g2"],
                     params["be2"], params["m2"], params["v2"])
    return jnp.mean(y, axis=(2, 3), keepdims=True)            # (N, C2, 1, 1)


if __name__ == "__main__":
    key = jax.random.PRNGKey(0)
    kx, kp = jax.random.split(key)

    # Small shapes consistent with the forward: NCHW input (2, 4, 16, 16).
    x = jax.random.normal(kx, (2, 4, 16, 16), jnp.float32)
    params = init_params(kp)

    out = jax.jit(net_forward)(x, params)
    out = jax.block_until_ready(out)

    assert out.shape == (2, 64, 1, 1), out.shape
    assert bool(jnp.all(jnp.isfinite(out)))

    ref = reference_forward(x, params)
    max_err = float(jnp.max(jnp.abs(out - ref)))
    assert max_err < 5e-2, f"max abs error vs f32 reference: {max_err}"

    print("KERNEL_OK")
</pallas_src>

<mosaic_0001>
module attributes {stable_mosaic.version = 11 : i64} {
  func.func @kernel(%arg0: i32, %arg1: memref<328x128xbf16, #tpu.memory_space<vmem>>, %arg2: memref<128x128xbf16, #tpu.memory_space<vmem>>, %arg3: memref<1x128xf32, #tpu.memory_space<vmem>>, %arg4: memref<9x128x128xbf16, #tpu.memory_space<vmem>>, %arg5: memref<1x128xf32, #tpu.memory_space<vmem>>, %arg6: memref<328x128xf32, #tpu.memory_space<vmem>>, %arg7: memref<8x128xf32, #tpu.memory_space<vmem>>, %arg8: memref<376x128xf32, #tpu.memory_space<vmem>>, %arg9: memref<328x128xf32, #tpu.memory_space<vmem>>) attributes {dimension_semantics = [#tpu.dimension_semantics<parallel>], iteration_bounds = array<i64: 2>, scalar_prefetch = 0 : i64, scratch_operands = 2 : i64, tpu.core_type = #tpu.core_type<tc>, window_params = [{transform_indices = @transform_0, window_bounds = array<i64: 328, 128>}, {pipeline_mode = #tpu.pipeline_mode<synchronous>, transform_indices = @transform_1, window_bounds = array<i64: 128, 128>}, {pipeline_mode = #tpu.pipeline_mode<synchronous>, transform_indices = @transform_2, window_bounds = array<i64: 1, 128>}, {pipeline_mode = #tpu.pipeline_mode<synchronous>, transform_indices = @transform_3, window_bounds = array<i64: 9, 128, 128>}, {pipeline_mode = #tpu.pipeline_mode<synchronous>, transform_indices = @transform_4, window_bounds = array<i64: 1, 128>}, {pipeline_mode = #tpu.pipeline_mode<synchronous>, transform_indices = @transform_5, window_bounds = array<i64: 328, 128>}, {transform_indices = @transform_6, window_bounds = array<i64: 8, 128>}]} {
    %c0 = arith.constant 0 : index
    %c0_0 = arith.constant 0 : index
    %0 = vector.load %arg6[%c0, %c0_0] : memref<328x128xf32, #tpu.memory_space<vmem>>, vector<328x128xf32>
    %c0_1 = arith.constant 0 : index
    %c0_2 = arith.constant 0 : index
    %1 = vector.load %arg1[%c0_1, %c0_2] : memref<328x128xbf16, #tpu.memory_space<vmem>>, vector<328x128xbf16>
    %c0_3 = arith.constant 0 : index
    %c0_4 = arith.constant 0 : index
    %2 = vector.load %arg2[%c0_3, %c0_4] : memref<128x128xbf16, #tpu.memory_space<vmem>>, vector<128x128xbf16>
    %cst = arith.constant dense<0.000000e+00> : vector<328x128xf32>
    %3 = tpu.matmul %1, %2, %cst {dimension_numbers = #tpu.dot_dimension_numbers<[1], [0], [0], [1], [0, 0, 1, 1], [], []>} : vector<328x128xbf16>, vector<128x128xbf16>, vector<328x128xf32> -> vector<328x128xf32>
    %c0_5 = arith.constant 0 : index
    %c0_6 = arith.constant 0 : index
    %4 = vector.load %arg3[%c0_5, %c0_6] : memref<1x128xf32, #tpu.memory_space<vmem>>, vector<1x128xf32>
    %5 = vector.broadcast %4 : vector<1x128xf32> to vector<328x128xf32>
    %6 = arith.addf %3, %5 : vector<328x128xf32>
    %cst_7 = arith.constant 0.000000e+00 : f32
    %7 = vector.broadcast %cst_7 : f32 to vector<328x128xf32>
    %8 = arith.maximumf %6, %7 : vector<328x128xf32>
    %9 = arith.mulf %8, %0 : vector<328x128xf32>
    %cst_8 = arith.constant 0.000000e+00 : f32
    %10 = vector.broadcast %cst_8 : f32 to vector<24x128xf32>
    %c0_9 = arith.constant 0 : index
    %c0_10 = arith.constant 0 : index
    %11 = vector.load %arg8[%c0_9, %c0_10] : memref<376x128xf32, #tpu.memory_space<vmem>>, vector<24x128xf32>
    tpu.vector_store %arg8[%c0_9, %c0_10], %10 {strides = array<i32>} : memref<376x128xf32, #tpu.memory_space<vmem>>, vector<24x128xf32>,
    %c352 = arith.constant 352 : index
    %c0_11 = arith.constant 0 : index
    %12 = vector.load %arg8[%c352, %c0_11] : memref<376x128xf32, #tpu.memory_space<vmem>>, vector<24x128xf32>
    tpu.vector_store %arg8[%c352, %c0_11], %10 {strides = array<i32>} : memref<376x128xf32, #tpu.memory_space<vmem>>, vector<24x128xf32>,
    %c24 = arith.constant 24 : index
    %c0_12 = arith.constant 0 : index
    %13 = vector.load %arg8[%c24, %c0_12] : memref<376x128xf32, #tpu.memory_space<vmem>>, vector<328x128xf32>
    tpu.vector_store %arg8[%c24, %c0_12], %9 {strides = array<i32>} : memref<376x128xf32, #tpu.memory_space<vmem>>, vector<328x128xf32>,
    %c5 = arith.constant 5 : index
    %c0_13 = arith.constant 0 : index
    %14 = vector.load %arg8[%c5, %c0_13] : memref<376x128xf32, #tpu.memory_space<vmem>>, vector<328x128xf32>
    %15 = arith.truncf %14 : vector<328x128xf32> to vector<328x128xbf16>
    %c0_14 = arith.constant 0 : index
    %c0_15 = arith.constant 0 : index
    %c0_16 = arith.constant 0 : index
    %16 = vector.load %arg4[%c0_14, %c0_15, %c0_16] : memref<9x128x128xbf16, #tpu.memory_space<vmem>>, vector<1x128x128xbf16>
    %17 = vector.shape_cast %16 : vector<1x128x128xbf16> to vector<128x128xbf16>
    %cst_17 = arith.constant dense<0.000000e+00> : vector<328x128xf32>
    %18 = tpu.matmul %15, %17, %cst_17 {dimension_numbers = #tpu.dot_dimension_numbers<[1], [0], [0], [1], [0, 0, 1, 1], [], []>} : vector<328x128xbf16>, vector<128x128xbf16>, vector<328x128xf32> -> vector<328x128xf32>
    %c0_18 = arith.constant 0 : index
    %c0_19 = arith.constant 0 : index
    %19 = vector.load %arg9[%c0_18, %c0_19] : memref<328x128xf32, #tpu.memory_space<vmem>>, vector<328x128xf32>
    tpu.vector_store %arg9[%c0_18, %c0_19], %18 {strides = array<i32>} : memref<328x128xf32, #tpu.memory_space<vmem>>, vector<328x128xf32>,
    %c6 = arith.constant 6 : index
    %c0_20 = arith.constant 0 : index
    %20 = vector.load %arg8[%c6, %c0_20] : memref<376x128xf32, #tpu.memory_space<vmem>>, vector<328x128xf32>
    %21 = arith.truncf %20 : vector<328x128xf32> to vector<328x128xbf16>
    %c1 = arith.constant 1 : index
    %c0_21 = arith.constant 0 : index
    %c0_22 = arith.constant 0 : index
    %22 = vector.load %arg4[%c1, %c0_21, %c0_22] : memref<9x128x128xbf16, #tpu.memory_space<vmem>>, vector<1x128x128xbf16>
    %23 = vector.shape_cast %22 : vector<1x128x128xbf16> to vector<128x128xbf16>
    %cst_23 = arith.constant dense<0.000000e+00> : vector<328x128xf32>
    %24 = tpu.matmul %21, %23, %cst_23 {dimension_numbers = #tpu.dot_dimension_numbers<[1], [0], [0], [1], [0, 0, 1, 1], [], []>} : vector<328x128xbf16>, vector<128x128xbf16>, vector<328x128xf32> -> vector<328x128xf32>
    %c0_24 = arith.constant 0 : index
    %c0_25 = arith.constant 0 : index
    %25 = vector.load %arg9[%c0_24, %c0_25] : memref<328x128xf32, #tpu.memory_space<vmem>>, vector<328x128xf32>
    %26 = arith.addf %25, %24 : vector<328x128xf32>
    %c0_26 = arith.constant 0 : index
    %c0_27 = arith.constant 0 : index
    %27 = vector.load %arg9[%c0_26, %c0_27] : memref<328x128xf32, #tpu.memory_space<vmem>>, vector<328x128xf32>
    tpu.vector_store %arg9[%c0_26, %c0_27], %26 {strides = array<i32>} : memref<328x128xf32, #tpu.memory_space<vmem>>, vector<328x128xf32>,
    %c7 = arith.constant 7 : index
    %c0_28 = arith.constant 0 : index
    %28 = vector.load %arg8[%c7, %c0_28] : memref<376x128xf32, #tpu.memory_space<vmem>>, vector<328x128xf32>
    %29 = arith.truncf %28 : vector<328x128xf32> to vector<328x128xbf16>
    %c2 = arith.constant 2 : index
    %c0_29 = arith.constant 0 : index
    %c0_30 = arith.constant 0 : index
    %30 = vector.load %arg4[%c2, %c0_29, %c0_30] : memref<9x128x128xbf16, #tpu.memory_space<vmem>>, vector<1x128x128xbf16>
    %31 = vector.shape_cast %30 : vector<1x128x128xbf16> to vector<128x128xbf16>
    %cst_31 = arith.constant dense<0.000000e+00> : vector<328x128xf32>
    %32 = tpu.matmul %29, %31, %cst_31 {dimension_numbers = #tpu.dot_dimension_numbers<[1], [0], [0], [1], [0, 0, 1, 1], [], []>} : vector<328x128xbf16>, vector<128x128xbf16>, vector<328x128xf32> -> vector<328x128xf32>
    %c0_32 = arith.constant 0 : index
    %c0_33 = arith.constant 0 : index
    %33 = vector.load %arg9[%c0_32, %c0_33] : memref<328x128xf32, #tpu.memory_space<vmem>>, vector<328x128xf32>
    %34 = arith.addf %33, %32 : vector<328x128xf32>
    %c0_34 = arith.constant 0 : index
    %c0_35 = arith.constant 0 : index
    %35 = vector.load %arg9[%c0_34, %c0_35] : memref<328x128xf32, #tpu.memory_space<vmem>>, vector<328x128xf32>
    tpu.vector_store %arg9[%c0_34, %c0_35], %34 {strides = array<i32>} : memref<328x128xf32, #tpu.memory_space<vmem>>, vector<328x128xf32>,
    %c23 = arith.constant 23 : index
    %c0_36 = arith.constant 0 : index
    %36 = vector.load %arg8[%c23, %c0_36] : memref<376x128xf32, #tpu.memory_space<vmem>>, vector<328x128xf32>
    %37 = arith.truncf %36 : vector<328x128xf32> to vector<328x128xbf16>
    %c3 = arith.constant 3 : index
    %c0_37 = arith.constant 0 : index
    %c0_38 = arith.constant 0 : index
    %38 = vector.load %arg4[%c3, %c0_37, %c0_38] : memref<9x128x128xbf16, #tpu.memory_space<vmem>>, vector<1x128x128xbf16>
    %39 = vector.shape_cast %38 : vector<1x128x128xbf16> to vector<128x128xbf16>
    %cst_39 = arith.constant dense<0.000000e+00> : vector<328x128xf32>
    %40 = tpu.matmul %37, %39, %cst_39 {dimension_numbers = #tpu.dot_dimension_numbers<[1], [0], [0], [1], [0, 0, 1, 1], [], []>} : vector<328x128xbf16>, vector<128x128xbf16>, vector<328x128xf32> -> vector<328x128xf32>
    %c0_40 = arith.constant 0 : index
    %c0_41 = arith.constant 0 : index
    %41 = vector.load %arg9[%c0_40, %c0_41] : memref<328x128xf32, #tpu.memory_space<vmem>>, vector<328x128xf32>
    %42 = arith.addf %41, %40 : vector<328x128xf32>
    %c0_42 = arith.constant 0 : index
    %c0_43 = arith.constant 0 : index
    %43 = vector.load %arg9[%c0_42, %c0_43] : memref<328x128xf32, #tpu.memory_space<vmem>>, vector<328x128xf32>
    tpu.vector_store %arg9[%c0_42, %c0_43], %42 {strides = array<i32>} : memref<328x128xf32, #tpu.memory_space<vmem>>, vector<328x128xf32>,
    %c24_44 = arith.constant 24 : index
    %c0_45 = arith.constant 0 : index
    %44 = vector.load %arg8[%c24_44, %c0_45] : memref<376x128xf32, #tpu.memory_space<vmem>>, vector<328x128xf32>
    %45 = arith.truncf %44 : vector<328x128xf32> to vector<328x128xbf16>
    %c4 = arith.constant 4 : index
    %c0_46 = arith.constant 0 : index
    %c0_47 = arith.constant 0 : index
    %46 = vector.load %arg4[%c4, %c0_46, %c0_47] : memref<9x128x128xbf16, #tpu.memory_space<vmem>>, vector<1x128x128xbf16>
    %47 = vector.shape_cast %46 : vector<1x128x128xbf16> to vector<128x128xbf16>
    %cst_48 = arith.constant dense<0.000000e+00> : vector<328x128xf32>
    %48 = tpu.matmul %45, %47, %cst_48 {dimension_numbers = #tpu.dot_dimension_numbers<[1], [0], [0], [1], [0, 0, 1, 1], [], []>} : vector<328x128xbf16>, vector<128x128xbf16>, vector<328x128xf32> -> vector<328x128xf32>
    %c0_49 = arith.constant 0 : index
    %c0_50 = arith.constant 0 : index
    %49 = vector.load %arg9[%c0_49, %c0_50] : memref<328x128xf32, #tpu.memory_space<vmem>>, vector<328x128xf32>
    %50 = arith.addf %49, %48 : vector<328x128xf32>
    %c0_51 = arith.constant 0 : index
    %c0_52 = arith.constant 0 : index
    %51 = vector.load %arg9[%c0_51, %c0_52] : memref<328x128xf32, #tpu.memory_space<vmem>>, vector<328x128xf32>
    tpu.vector_store %arg9[%c0_51, %c0_52], %50 {strides = array<i32>} : memref<328x128xf32, #tpu.memory_space<vmem>>, vector<328x128xf32>,
    %c25 = arith.constant 25 : index
    %c0_53 = arith.constant 0 : index
    %52 = vector.load %arg8[%c25, %c0_53] : memref<376x128xf32, #tpu.memory_space<vmem>>, vector<328x128xf32>
    %53 = arith.truncf %52 : vector<328x128xf32> to vector<328x128xbf16>
    %c5_54 = arith.constant 5 : index
    %c0_55 = arith.constant 0 : index
    %c0_56 = arith.constant 0 : index
    %54 = vector.load %arg4[%c5_54, %c0_55, %c0_56] : memref<9x128x128xbf16, #tpu.memory_space<vmem>>, vector<1x128x128xbf16>
    %55 = vector.shape_cast %54 : vector<1x128x128xbf16> to vector<128x128xbf16>
    %cst_57 = arith.constant dense<0.000000e+00> : vector<328x128xf32>
    %56 = tpu.matmul %53, %55, %cst_57 {dimension_numbers = #tpu.dot_dimension_numbers<[1], [0], [0], [1], [0, 0, 1, 1], [], []>} : vector<328x128xbf16>, vector<128x128xbf16>, vector<328x128xf32> -> vector<328x128xf32>
    %c0_58 = arith.constant 0 : index
    %c0_59 = arith.constant 0 : index
    %57 = vector.load %arg9[%c0_58, %c0_59] : memref<328x128xf32, #tpu.memory_space<vmem>>, vector<328x128xf32>
    %58 = arith.addf %57, %56 : vector<328x128xf32>
    %c0_60 = arith.constant 0 : index
    %c0_61 = arith.constant 0 : index
    %59 = vector.load %arg9[%c0_60, %c0_61] : memref<328x128xf32, #tpu.memory_space<vmem>>, vector<328x128xf32>
    tpu.vector_store %arg9[%c0_60, %c0_61], %58 {strides = array<i32>} : memref<328x128xf32, #tpu.memory_space<vmem>>, vector<328x128xf32>,
    %c41 = arith.constant 41 : index
    %c0_62 = arith.constant 0 : index
    %60 = vector.load %arg8[%c41, %c0_62] : memref<376x128xf32, #tpu.memory_space<vmem>>, vector<328x128xf32>
    %61 = arith.truncf %60 : vector<328x128xf32> to vector<328x128xbf16>
    %c6_63 = arith.constant 6 : index
    %c0_64 = arith.constant 0 : index
    %c0_65 = arith.constant 0 : index
    %62 = vector.load %arg4[%c6_63, %c0_64, %c0_65] : memref<9x128x128xbf16, #tpu.memory_space<vmem>>, vector<1x128x128xbf16>
    %63 = vector.shape_cast %62 : vector<1x128x128xbf16> to vector<128x128xbf16>
    %cst_66 = arith.constant dense<0.000000e+00> : vector<328x128xf32>
    %64 = tpu.matmul %61, %63, %cst_66 {dimension_numbers = #tpu.dot_dimension_numbers<[1], [0], [0], [1], [0, 0, 1, 1], [], []>} : vector<328x128xbf16>, vector<128x128xbf16>, vector<328x128xf32> -> vector<328x128xf32>
    %c0_67 = arith.constant 0 : index
    %c0_68 = arith.constant 0 : index
    %65 = vector.load %arg9[%c0_67, %c0_68] : memref<328x128xf32, #tpu.memory_space<vmem>>, vector<328x128xf32>
    %66 = arith.addf %65, %64 : vector<328x128xf32>
    %c0_69 = arith.constant 0 : index
    %c0_70 = arith.constant 0 : index
    %67 = vector.load %arg9[%c0_69, %c0_70] : memref<328x128xf32, #tpu.memory_space<vmem>>, vector<328x128xf32>
    tpu.vector_store %arg9[%c0_69, %c0_70], %66 {strides = array<i32>} : memref<328x128xf32, #tpu.memory_space<vmem>>, vector<328x128xf32>,
    %c42 = arith.constant 42 : index
    %c0_71 = arith.constant 0 : index
    %68 = vector.load %arg8[%c42, %c0_71] : memref<376x128xf32, #tpu.memory_space<vmem>>, vector<328x128xf32>
    %69 = arith.truncf %68 : vector<328x128xf32> to vector<328x128xbf16>
    %c7_72 = arith.constant 7 : index
    %c0_73 = arith.constant 0 : index
    %c0_74 = arith.constant 0 : index
    %70 = vector.load %arg4[%c7_72, %c0_73, %c0_74] : memref<9x128x128xbf16, #tpu.memory_space<vmem>>, vector<1x128x128xbf16>
    %71 = vector.shape_cast %70 : vector<1x128x128xbf16> to vector<128x128xbf16>
    %cst_75 = arith.constant dense<0.000000e+00> : vector<328x128xf32>
    %72 = tpu.matmul %69, %71, %cst_75 {dimension_numbers = #tpu.dot_dimension_numbers<[1], [0], [0], [1], [0, 0, 1, 1], [], []>} : vector<328x128xbf16>, vector<128x128xbf16>, vector<328x128xf32> -> vector<328x128xf32>
    %c0_76 = arith.constant 0 : index
    %c0_77 = arith.constant 0 : index
    %73 = vector.load %arg9[%c0_76, %c0_77] : memref<328x128xf32, #tpu.memory_space<vmem>>, vector<328x128xf32>
    %74 = arith.addf %73, %72 : vector<328x128xf32>
    %c0_78 = arith.constant 0 : index
    %c0_79 = arith.constant 0 : index
    %75 = vector.load %arg9[%c0_78, %c0_79] : memref<328x128xf32, #tpu.memory_space<vmem>>, vector<328x128xf32>
    tpu.vector_store %arg9[%c0_78, %c0_79], %74 {strides = array<i32>} : memref<328x128xf32, #tpu.memory_space<vmem>>, vector<328x128xf32>,
    %c43 = arith.constant 43 : index
    %c0_80 = arith.constant 0 : index
    %76 = vector.load %arg8[%c43, %c0_80] : memref<376x128xf32, #tpu.memory_space<vmem>>, vector<328x128xf32>
    %77 = arith.truncf %76 : vector<328x128xf32> to vector<328x128xbf16>
    %c8 = arith.constant 8 : index
    %c0_81 = arith.constant 0 : index
    %c0_82 = arith.constant 0 : index
    %78 = vector.load %arg4[%c8, %c0_81, %c0_82] : memref<9x128x128xbf16, #tpu.memory_space<vmem>>, vector<1x128x128xbf16>
    %79 = vector.shape_cast %78 : vector<1x128x128xbf16> to vector<128x128xbf16>
    %cst_83 = arith.constant dense<0.000000e+00> : vector<328x128xf32>
    %80 = tpu.matmul %77, %79, %cst_83 {dimension_numbers = #tpu.dot_dimension_numbers<[1], [0], [0], [1], [0, 0, 1, 1], [], []>} : vector<328x128xbf16>, vector<128x128xbf16>, vector<328x128xf32> -> vector<328x128xf32>
    %c0_84 = arith.constant 0 : index
    %c0_85 = arith.constant 0 : index
    %81 = vector.load %arg9[%c0_84, %c0_85] : memref<328x128xf32, #tpu.memory_space<vmem>>, vector<328x128xf32>
    %82 = arith.addf %81, %80 : vector<328x128xf32>
    %c0_86 = arith.constant 0 : index
    %c0_87 = arith.constant 0 : index
    %83 = vector.load %arg9[%c0_86, %c0_87] : memref<328x128xf32, #tpu.memory_space<vmem>>, vector<328x128xf32>
    tpu.vector_store %arg9[%c0_86, %c0_87], %82 {strides = array<i32>} : memref<328x128xf32, #tpu.memory_space<vmem>>, vector<328x128xf32>,
    %c0_88 = arith.constant 0 : index
    %c0_89 = arith.constant 0 : index
    %84 = vector.load %arg9[%c0_88, %c0_89] : memref<328x128xf32, #tpu.memory_space<vmem>>, vector<328x128xf32>
    %c0_90 = arith.constant 0 : index
    %c0_91 = arith.constant 0 : index
    %85 = vector.load %arg5[%c0_90, %c0_91] : memref<1x128xf32, #tpu.memory_space<vmem>>, vector<1x128xf32>
    %86 = vector.broadcast %85 : vector<1x128xf32> to vector<328x128xf32>
    %87 = arith.addf %84, %86 : vector<328x128xf32>
    %cst_92 = arith.constant 0.000000e+00 : f32
    %88 = vector.broadcast %cst_92 : f32 to vector<328x128xf32>
    %89 = arith.maximumf %87, %88 : vector<328x128xf32>
    %90 = arith.mulf %89, %0 : vector<328x128xf32>
    %cst_93 = arith.constant dense<0.000000e+00> : vector<128xf32>
    %91 = vector.multi_reduction <add>, %90, %cst_93 [0] : vector<328x128xf32> to vector<128xf32>
    %92 = vector.shape_cast %91 : vector<128xf32> to vector<1x128xf32>
    %cst_94 = arith.constant 3.906250e-03 : f32
    %93 = vector.broadcast %cst_94 : f32 to vector<1x128xf32>
    %94 = arith.mulf %92, %93 : vector<1x128xf32>
    %cst_95 = arith.constant 0.000000e+00 : f32
    %95 = vector.broadcast %cst_95 : f32 to vector<8x128xf32>
    %c0_96 = arith.constant 0 : index
    %c0_97 = arith.constant 0 : index
    %96 = vector.load %arg7[%c0_96, %c0_97] : memref<8x128xf32, #tpu.memory_space<vmem>>, vector<8x128xf32>
    tpu.vector_store %arg7[%c0_96, %c0_97], %95 {strides = array<i32>} : memref<8x128xf32, #tpu.memory_space<vmem>>, vector<8x128xf32>,
    %c0_98 = arith.constant 0 : index
    %c0_99 = arith.constant 0 : index
    %97 = vector.load %arg7[%c0_98, %c0_99] : memref<8x128xf32, #tpu.memory_space<vmem>>, vector<1x128xf32>
    tpu.vector_store %arg7[%c0_98, %c0_99], %94 {strides = array<i32>} : memref<8x128xf32, #tpu.memory_space<vmem>>, vector<1x128xf32>,
    return
  }
  func.func @transform_0(%arg0: i32) -> (i32, i32) {
    %c0_i32 = arith.constant 0 : i32
    %c0_i32_0 = arith.constant 0 : i32
    return %arg0, %c0_i32 : i32, i32
  }
  func.func @transform_1(%arg0: i32) -> (i32, i32) {
    %c0_i32 = arith.constant 0 : i32
    %c0_i32_0 = arith.constant 0 : i32
    %c0_i32_1 = arith.constant 0 : i32
    return %c0_i32, %c0_i32_0 : i32, i32
  }
  func.func @transform_2(%arg0: i32) -> (i32, i32) {
    %c0_i32 = arith.constant 0 : i32
    %c0_i32_0 = arith.constant 0 : i32
    %c0_i32_1 = arith.constant 0 : i32
    return %c0_i32, %c0_i32_0 : i32, i32
  }
  func.func @transform_3(%arg0: i32) -> (i32, i32, i32) {
    %c0_i32 = arith.constant 0 : i32
    %c0_i32_0 = arith.constant 0 : i32
    %c0_i32_1 = arith.constant 0 : i32
    %c0_i32_2 = arith.constant 0 : i32
    return %c0_i32, %c0_i32_0, %c0_i32_1 : i32, i32, i32
  }
  func.func @transform_4(%arg0: i32) -> (i32, i32) {
    %c0_i32 = arith.constant 0 : i32
    %c0_i32_0 = arith.constant 0 : i32
    %c0_i32_1 = arith.constant 0 : i32
    return %c0_i32, %c0_i32_0 : i32, i32
  }
  func.func @transform_5(%arg0: i32) -> (i32, i32) {
    %c0_i32 = arith.constant 0 : i32
    %c0_i32_0 = arith.constant 0 : i32
    %c0_i32_1 = arith.constant 0 : i32
    return %c0_i32, %c0_i32_0 : i32, i32
  }
  func.func @transform_6(%arg0: i32) -> (i32, i32) {
    %c0_i32 = arith.constant 0 : i32
    %c0_i32_0 = arith.constant 0 : i32
    return %arg0, %c0_i32 : i32, i32
  }
}

</mosaic_0001>

<bundles_post_ra>
// kernel: net_forward.1
= control target key start
LH: loop header
LB: loop body
LE: loop exit
PB: predicated region body
PF: predicated region fallthrough
CT: control target
= control target key end

     0   :  { %s6831_s21 = smov 0   ;;  %s8551_s0 = inlined_call_operand.vmem [shape: bf16[656,128], index: 0, kind: input, shape index: {}]   ;;  %s8552_s1 = inlined_call_operand.vmem [shape: bf16[128,128], index: 1, kind: input, shape index: {}]   ;;  %s8553_s2 = inlined_call_operand.vmem [shape: f32[1,128], index: 2, kind: input, shape index: {}]   ;;  %s8554_s3 = inlined_call_operand.vmem [shape: bf16[9,128,128], index: 3, kind: input, shape index: {}]   ;;  %s8555_s4 = inlined_call_operand.vmem [shape: f32[1,128], index: 4, kind: input, shape index: {}]   ;;  %s8556_s5 = inlined_call_operand.vmem [shape: f32[328,128], index: 5, kind: input, shape index: {}]   ;;  %s8557_s6 = inlined_call_operand.vmem [shape: f32[16,128], index: 6, kind: output, shape index: {}]  }
   0x1 LB: > { %s6837_s22 = sadd.s32 4294967295, %s6792_s21   ;;  %p5103_p0 = scmp.ge.s32.totalorder %s6792_s21, 1  ;;  %s6792_s21 = sphi %s6831_s21, %s16_s21  }
   0x2   : > { %p213_p1 = scmp.lt.s32.totalorder %s6792_s21, 3 }
   0x4   : > { %p214_p2 = pnand %p5103_p0, %p213_p1 }
   0x6   : > { %217 = sbr.rel (%p214_p2) target bundleno = 1299 (0x513), region = 44 }
   0xb   : > { %v6639_v0 = vld [vmem:[%s8552_s1 + $0x38] sm:$0xff]   ;;  %v6794_v1 = vmov 0.0   ;;  %v6640_v2 = vld [vmem:[%s8552_s1 + $0x30] sm:$0xff]   ;;  %vm6795_vm0 = vmmov 0   ;;  %s242_s27 = smul.u32 41, %s6837_s22  ;;  %v6641_v3 = vld [vmem:[%s8552_s1 + $0x28] sm:$0xff]  }
   0xc   : > { %5629 = vmatprep.subr.bf16.mxu0 %v6794_v1  ;;  %812 = vst [vmem:[#allocation2] sm:$0xff] %v6794_v1  ;;  %813 = vst [vmem:[#allocation2 + $0x8] sm:$0xff] %v6794_v1  ;;  %5729 = vmatprep.subr.bf16.mxu1 %v6794_v1  ;;  %v6642_v4 = vld [vmem:[%s8552_s1 + $0x20] sm:$0xff]   ;;  %v6643_v5 = vld [vmem:[%s8552_s1 + $0x18] sm:$0xff]   ;;  %p248_p4 = scmp.lt.s32.totalorder %s6837_s22, 1 }
   0xd   : > { %814 = vst [vmem:[#allocation2 + $0x10] sm:$0xff] %v6794_v1  ;;  %815 = vst [vmem:[#allocation2 + $0x160] sm:$0xff] %v6794_v1  ;;  %5630 = vmatpush3.bf16.msra.mxu0 %v6639_v0  ;;  %5645 = vmatprep.mubr.msk.bf16.mxu0 %vm6795_vm0, %v6794_v1  ;;  %p243_p3 = scmp.lt.s32.totalorder %s242_s27, 81  ;;  %v6644_v6 = vld [vmem:[%s8552_s1 + $0x10] sm:$0xff]   ;;  %v6645_v7 = vld [vmem:[%s8552_s1 + $0x8] sm:$0xff]  }
   0xe   : > { %816 = vst [vmem:[#allocation2 + $0x168] sm:$0xff] %v6794_v1  ;;  %817 = vst [vmem:[#allocation2 + $0x170] sm:$0xff] %v6794_v1  ;;  %5631 = vmatprep.subr.bf16.mxu0 %v6794_v1  ;;  %5745 = vmatprep.mubr.msk.bf16.mxu1 %vm6795_vm0, %v6794_v1  ;;  %v6646_v8 = vld [vmem:[%s8552_s1] sm:$0xff]   ;;  %v6668_v14 = vld [vmem:[%s8554_s3 + $0x38] sm:$0xff]   ;;  %s8587_s22 = smov (!%p248_p4, %s6837_s22), 1 }
   0xf   : > { %s8585_s27 = smov (!%p243_p3, %s242_s27), 81  ;;  %v6669_v15 = vld [vmem:[%s8554_s3 + $0x78] sm:$0xff]   ;;  %5730 = vmatpush3.bf16.msra.mxu1 %v6668_v14  ;;  %v6670_v16 = vld [vmem:[%s8554_s3 + $0x30] sm:$0xff]   ;;  %v6672_v19 = vld [vmem:[%s8554_s3 + $0x28] sm:$0xff]   ;;  %s5105_s29 = sshll.u32 %s8587_s22, 3 }
  0x10   : > { %s5104_s30 = sshll.u32 %s8585_s27, 2  ;;  %v6671_v17 = vld [vmem:[%s8554_s3 + $0x70] sm:$0xff]   ;;  %5731 = vmatprep.subr.bf16.mxu1 %v6794_v1  ;;  %v6673_v20 = vld [vmem:[%s8554_s3 + $0x68] sm:$0xff]   ;;  %v6674_v21 = vld [vmem:[%s8554_s3 + $0x20] sm:$0xff]   ;;  %s8387_s8 = scalar_lea.vmem %s8557_s6, %s5105_s29 }
  0x11   : > { %5632 = vmatpush3.bf16.msra.mxu0 %v6640_v2  ;;  %s6868_s9 = scalar_lea.vmem %s8551_s0, %s5104_s30  ;;  %v6675_v22 = vld [vmem:[%s8554_s3 + $0x60] sm:$0xff]   ;;  %v6676_v24 = vld [vmem:[%s8554_s3 + $0x18] sm:$0xff]   ;;  %v6678_v26 = vld [vmem:[%s8554_s3 + $0x10] sm:$0xff]  }
  0x12   : > { %5633 = vmatprep.subr.bf16.mxu0 %v6794_v1  ;;  %v6647_v9 = vld [vmem:[%s6868_s9] sm:$0xff]   ;;  %v6648_v10 = vld [vmem:[%s6868_s9 + $0x8] sm:$0xff]   ;;  %v6649_v11 = vld [vmem:[%s6868_s9 + $0x10] sm:$0xff]  }
  0x13   : > { %v6650_v12 = vld [vmem:[%s6868_s9 + $0x18] sm:$0xff]   ;;  %v6651_v13 = vld [vmem:[%s6868_s9 + $0x20] sm:$0xff]   ;;  %v6652_v18 = vld [vmem:[%s6868_s9 + $0x28] sm:$0xff]   ;;  %5732 = vmatpush3.bf16.msra.mxu1 %v6670_v16 }
  0x14   : > { %5733 = vmatprep.subr.bf16.mxu1 %v6794_v1  ;;  %v6653_v23 = vld [vmem:[%s6868_s9 + $0x30] sm:$0xff]   ;;  %v6677_v25 = vld [vmem:[%s8554_s3 + $0x58] sm:$0xff]   ;;  %v6655_v29 = vld [vmem:[%s6868_s9 + $0x40] sm:$0xff]  }
  0x15   : > { %5634 = vmatpush3.bf16.msra.mxu0 %v6641_v3  ;;  %v6679_v27 = vld [vmem:[%s8554_s3 + $0x50] sm:$0xff]   ;;  %v6654_v28 = vld [vmem:[%s6868_s9 + $0x38] sm:$0xff]   ;;  %v6680_v30 = vld [vmem:[%s8554_s3 + $0x8] sm:$0xff]  }
  0x16   : > { %5635 = vmatprep.subr.bf16.mxu0 %v6794_v1  ;;  %v6681_v31 = vld [vmem:[%s8554_s3 + $0x48] sm:$0xff]   ;;  %v6682_v32 = vld [vmem:[%s8554_s3] sm:$0xff]   ;;  %v6657_v38 = vld [vmem:[%s6868_s9 + $0x50] sm:$0xff]  }
  0x17   : > { %5734 = vmatpush3.bf16.msra.mxu1 %v6672_v19  ;;  %v6656_v33 = vld [vmem:[%s6868_s9 + $0x48] sm:$0xff]   ;;  %v6683_v34 = vld [vmem:[%s8554_s3 + $0x40] sm:$0xff]   ;;  %v6684_v39 = vld [vmem:[%s8554_s3 + $0xb8] sm:$0xff]  }
  0x18   : > { %5735 = vmatprep.subr.bf16.mxu1 %v6794_v1  ;;  %v859_v35 = vld [vmem:[#allocation2 + $0x5] sm:$0xff]  ;;  %v860_v36 = vld [vmem:[#allocation2 + $0xd] sm:$0xff]  ;;  %v6658_v40 = vld [vmem:[%s6868_s9 + $0x58] sm:$0xff]  }
  0x19   : > { %5636 = vmatpush3.bf16.msra.mxu0 %v6642_v4  ;;  %v900_v37 = vpack.c.bf16 %v860_v36, %v859_v35  ;;  %v6659_v41 = vld [vmem:[%s6868_s9 + $0x60] sm:$0xff]   ;;  %v6660_v42 = vld [vmem:[%s6868_s9 + $0x68] sm:$0xff]   ;;  %v6685_v43 = vld [vmem:[%s8554_s3 + $0xb0] sm:$0xff]  }
  0x1a   : > { %5637 = vmatprep.subr.bf16.mxu0 %v6794_v1  ;;  %v6661_v44 = vld [vmem:[%s6868_s9 + $0x70] sm:$0xff]   ;;  %v6662_v45 = vld [vmem:[%s6868_s9 + $0x78] sm:$0xff]   ;;  %v6686_v46 = vld [vmem:[%s8554_s3 + $0xa8] sm:$0xff]  }
  0x1b   : > { %5736 = vmatpush3.bf16.msra.mxu1 %v6674_v21  ;;  %v6663_v47 = vld [vmem:[%s6868_s9 + $0x80] sm:$0xff]   ;;  %v6664_v48 = vld [vmem:[%s6868_s9 + $0x88] sm:$0xff]   ;;  %v6665_v49 = vld [vmem:[%s6868_s9 + $0x90] sm:$0xff]  }
  0x1c   : > { %5737 = vmatprep.subr.bf16.mxu1 %v6794_v1  ;;  %v6687_v50 = vld [vmem:[%s8554_s3 + $0xa0] sm:$0xff]   ;;  %v6666_v51 = vld [vmem:[%s6868_s9 + $0x98] sm:$0xff]   ;;  %v1227_v54 = vld [vmem:[#allocation2 + $0xe] sm:$0xff] }
  0x1d   : > { %5638 = vmatpush3.bf16.msra.mxu0 %v6643_v5  ;;  %v6667_v52 = vld [vmem:[%s6868_s9 + $0xa0] ss:$0 sps:$4 sm:$0xff]   ;;  %v1226_v53 = vld [vmem:[#allocation2 + $0x6] sm:$0xff]  ;;  %v6688_v56 = vld [vmem:[%s8554_s3 + $0x98] sm:$0xff]  }
  0x1e   : > { %5639 = vmatprep.subr.bf16.mxu0 %v6794_v1  ;;  %v1267_v55 = vpack.c.bf16 %v1227_v54, %v1226_v53  ;;  %v6689_v57 = vld [vmem:[%s8554_s3 + $0x90] sm:$0xff]   ;;  %v7048_v58 = vld [vmem:[%s8553_s2] ss:$0 sm:$0xff]  ;;  %v254_v4 = vld [vmem:[%s8556_s5 + $0x8] sm:$0xff] }
  0x1f   : > { %5738 = vmatpush3.bf16.msra.mxu1 %v6676_v24  ;;  %v253_v61 = vld [vmem:[%s8556_s5] sm:$0xff]  ;;  %v256_v16 = vld [vmem:[%s8556_s5 + $0x18] sm:$0xff]  ;;  %v6690_v19 = vld [vmem:[%s8554_s3 + $0x88] sm:$0xff]  }
  0x20   : > { %5739 = vmatprep.subr.bf16.mxu1 %v6794_v1  ;;  %v258_v36 = vld [vmem:[%s8556_s5 + $0x28] sm:$0xff] }
  0x21   : > { %5640 = vmatpush3.bf16.msra.mxu0 %v6644_v6  ;;  %v6693_v53 = vld [vmem:[%s8554_s3 + $0xe8] sm:$0xff]  }
  0x22   : > { %5641 = vmatprep.subr.bf16.mxu0 %v6794_v1 }
  0x23   : > { %5740 = vmatpush3.bf16.msra.mxu1 %v6678_v26 }
  0x24   : > { %5741 = vmatprep.subr.bf16.mxu1 %v6794_v1 }
  0x25   : > { %5642 = vmatpush3.bf16.msra.mxu0 %v6645_v7 }
  0x26   : > { %5643 = vmatprep.subr.bf16.mxu0 %v6794_v1 }
  0x27   : > { %5742 = vmatpush3.bf16.msra.mxu1 %v6680_v30 }
  0x28   : > { %5743 = vmatprep.subr.bf16.mxu1 %v6794_v1 }
  0x29   : > { %5644 = vmatpush3.bf16.msra.mxu0 %v6646_v8 }
  0x2a   : > { %5829 = vmatprep.subr.bf16.mxu0 %v6794_v1 }
  0x2b   : > { %5744 = vmatpush3.bf16.msra.mxu1 %v6682_v32 }
  0x2c   : > { %5646 = vmatmul.mubr.bf16.vlgmr.msra.gmra.mxu0 %v6647_v9  ;;  %5929 = vmatprep.subr.bf16.mxu1 %v6794_v1 }
  0x2d   : > { %5649 = vmatprep.mubr.msk.bf16.mxu0 %vm6795_vm0, %v6794_v1  ;;  %5830 = vmatpush3.bf16.msra.mxu0 %v6669_v15 }
  0x2e   : > { %5831 = vmatprep.subr.bf16.mxu0 %v6794_v1  ;;  %5746 = vmatmul.mubr.bf16.vlgmr.msra.gmra.mxu1 %v900_v37 }
  0x2f   : > { %5749 = vmatprep.mubr.msk.bf16.mxu1 %vm6795_vm0, %v6794_v1  ;;  %5930 = vmatpush3.bf16.msra.mxu1 %v6684_v39 }
  0x30   : > { %5931 = vmatprep.subr.bf16.mxu1 %v6794_v1 }
  0x31   : > { %5832 = vmatpush3.bf16.msra.mxu0 %v6671_v17 }
  0x32   : > { %5833 = vmatprep.subr.bf16.mxu0 %v6794_v1 }
  0x33   : > { %5932 = vmatpush3.bf16.msra.mxu1 %v6685_v43 }
  0x34   : > { %5650 = vmatmul.mubr.bf16.gmra.mxu0 %v6648_v10  ;;  %5933 = vmatprep.subr.bf16.mxu1 %v6794_v1  ;;  %v255_v10 = vld [vmem:[%s8556_s5 + $0x10] sm:$0xff] }
  0x35   : > { %5653 = vmatprep.mubr.msk.bf16.mxu0 %vm6795_vm0, %v6794_v1  ;;  %5834 = vmatpush3.bf16.msra.mxu0 %v6673_v20 }
  0x36   : > { %5835 = vmatprep.subr.bf16.mxu0 %v6794_v1 }
  0x37   : > { %5934 = vmatpush3.bf16.msra.mxu1 %v6686_v46 }
  0x38   : > { %5935 = vmatprep.subr.bf16.mxu1 %v6794_v1 }
  0x39   : > { %5836 = vmatpush3.bf16.msra.mxu0 %v6675_v22  ;;  %v257_v22 = vld [vmem:[%s8556_s5 + $0x20] sm:$0xff] }
  0x3a   : > { %5837 = vmatprep.subr.bf16.mxu0 %v6794_v1 }
  0x3b   : > { %5936 = vmatpush3.bf16.msra.mxu1 %v6687_v50 }
  0x3c   : > { %5654 = vmatmul.mubr.bf16.gmra.mxu0 %v6649_v11  ;;  %5937 = vmatprep.subr.bf16.mxu1 %v6794_v1 }
  0x3d   : > { %5657 = vmatprep.mubr.msk.bf16.mxu0 %vm6795_vm0, %v6794_v1  ;;  %5838 = vmatpush3.bf16.msra.mxu0 %v6677_v25 }
  0x3e   : > { %5839 = vmatprep.subr.bf16.mxu0 %v6794_v1 }
  0x3f   : > { %5938 = vmatpush3.bf16.msra.mxu1 %v6688_v56  ;;  %v260_v56 = vld [vmem:[%s8556_s5 + $0x38] sm:$0xff] }
  0x40   : > { %5939 = vmatprep.subr.bf16.mxu1 %v6794_v1 }
  0x41   : > { %5840 = vmatpush3.bf16.msra.mxu0 %v6679_v27 }
  0x42   : > { %5841 = vmatprep.subr.bf16.mxu0 %v6794_v1 }
  0x43   : > { %5940 = vmatpush3.bf16.msra.mxu1 %v6689_v57 }
  0x44   : > { %5658 = vmatmul.mubr.bf16.gmra.mxu0 %v6650_v12  ;;  %5941 = vmatprep.subr.bf16.mxu1 %v6794_v1 }
  0x45   : > { %5661 = vmatprep.mubr.msk.bf16.mxu0 %vm6795_vm0, %v6794_v1  ;;  %5842 = vmatpush3.bf16.msra.mxu0 %v6681_v31 }
  0x46   : > { %5843 = vmatprep.subr.bf16.mxu0 %v6794_v1 }
  0x47   : > { %5942 = vmatpush3.bf16.msra.mxu1 %v6690_v19 }
  0x48   : > { %5943 = vmatprep.subr.bf16.mxu1 %v6794_v1 }
  0x49   : > { %5844 = vmatpush3.bf16.msra.mxu0 %v6683_v34 }
  0x4a   : > { %6029 = vmatprep.subr.bf16.mxu0 %v6794_v1 }
  0x4c   : > { %5662 = vmatmul.mubr.bf16.gmra.mxu0 %v6651_v13 }
  0x4d   : > { %5665 = vmatprep.mubr.msk.bf16.mxu0 %vm6795_vm0, %v6794_v1 }
  0x54   : > { %5666 = vmatmul.mubr.bf16.gmra.mxu0 %v6652_v18 }
  0x55   : > { %5669 = vmatprep.mubr.msk.bf16.mxu0 %vm6795_vm0, %v6794_v1 }
  0x5c   : > { %5670 = vmatmul.mubr.bf16.gmra.mxu0 %v6653_v23 }
  0x5d   : > { %5673 = vmatprep.mubr.msk.bf16.mxu0 %vm6795_vm0, %v6794_v1 }
  0x64   : > { %5674 = vmatmul.mubr.bf16.gmra.mxu0 %v6654_v28 }
  0x65   : > { %5677 = vmatprep.mubr.msk.bf16.mxu0 %vm6795_vm0, %v6794_v1 }
  0x6c   : > { %5678 = vmatmul.mubr.bf16.gmra.mxu0 %v6655_v29 }
  0x6d   : > { %5681 = vmatprep.mubr.msk.bf16.mxu0 %vm6795_vm0, %v6794_v1 }
  0x74   : > { %5682 = vmatmul.mubr.bf16.gmra.mxu0 %v6656_v33  ;;  %v6691_v33 = vld [vmem:[%s8554_s3 + $0xf8] sm:$0xff]  }
  0x75   : > { %5685 = vmatprep.mubr.msk.bf16.mxu0 %vm6795_vm0, %v6794_v1 }
  0x7c   : > { %5686 = vmatmul.mubr.bf16.gmra.mxu0 %v6657_v38 }
  0x7d   : > { %5689 = vmatprep.mubr.msk.bf16.mxu0 %vm6795_vm0, %v6794_v1 }
  0x84   : > { %5690 = vmatmul.mubr.bf16.gmra.mxu0 %v6658_v40  ;;  %v6692_v40 = vld [vmem:[%s8554_s3 + $0xf0] sm:$0xff]  }
  0x85   : > { %5693 = vmatprep.mubr.msk.bf16.mxu0 %vm6795_vm0, %v6794_v1 }
  0x8c   : > { %5694 = vmatmul.mubr.bf16.gmra.mxu0 %v6659_v41 }
  0x8d   : > { %5697 = vmatprep.mubr.msk.bf16.mxu0 %vm6795_vm0, %v6794_v1 }
  0x94   : > { %5698 = vmatmul.mubr.bf16.gmra.mxu0 %v6660_v42  ;;  %v259_v42 = vld [vmem:[%s8556_s5 + $0x30] sm:$0xff] }
  0x95   : > { %5701 = vmatprep.mubr.msk.bf16.mxu0 %vm6795_vm0, %v6794_v1 }
  0x9c   : > { %5702 = vmatmul.mubr.bf16.gmra.mxu0 %v6661_v44 }
  0x9d   : > { %5705 = vmatprep.mubr.msk.bf16.mxu0 %vm6795_vm0, %v6794_v1 }
  0xa4   : > { %5706 = vmatmul.mubr.bf16.gmra.mxu0 %v6662_v45 }
  0xa5   : > { %5709 = vmatprep.mubr.msk.bf16.mxu0 %vm6795_vm0, %v6794_v1 }
  0xac   : > { %5710 = vmatmul.mubr.bf16.gmra.mxu0 %v6663_v47 }
  0xad   : > { %5713 = vmatprep.mubr.msk.bf16.mxu0 %vm6795_vm0, %v6794_v1 }
  0xb4   : > { %5714 = vmatmul.mubr.bf16.gmra.mxu0 %v6664_v48 }
  0xb5   : > { %5717 = vmatprep.mubr.msk.bf16.mxu0 %vm6795_vm0, %v6794_v1 }
  0xbc   : > { %5718 = vmatmul.mubr.bf16.gmra.mxu0 %v6665_v49 }
  0xbd   : > { %5721 = vmatprep.mubr.msk.bf16.mxu0 %vm6795_vm0, %v6794_v1 }
  0xc4   : > { %5722 = vmatmul.mubr.bf16.gmra.mxu0 %v6666_v51 }
  0xc5   : > { %5725 = vmatprep.mubr.msk.bf16.mxu0 %vm6795_vm0, %v6794_v1 }
  0xcc   : > { %5726 = vmatmul.mubr.bf16.gmra.mxu0 %v6667_v52 }
  0xcd   : > { %5845 = vmatprep.mubr.msk.bf16.mxu0 %vm6795_vm0, %v6794_v1 }
  0xd4   : > { %5846 = vmatmul.mubr.bf16.vlgmr.msra.gmra.mxu0 %v1267_v55 }
  0xd5   : > { %5849 = vmatprep.mubr.msk.bf16.mxu0 %vm6795_vm0, %v6794_v1  ;;  %6030 = vmatpush3.bf16.msra.mxu0 %v6691_v33  ;;  %v6698_v33 = vld [vmem:[%s8554_s3 + $0xc8] sm:$0xff]  }
  0xd6   : > { %6031 = vmatprep.subr.bf16.mxu0 %v6794_v1 }
  0xd9   : > { %6032 = vmatpush3.bf16.msra.mxu0 %v6692_v40 }
  0xda   : > { %6033 = vmatprep.subr.bf16.mxu0 %v6794_v1 }
  0xdd   : > { %6034 = vmatpush3.bf16.msra.mxu0 %v6693_v53 }
  0xde   : > { %6035 = vmatprep.subr.bf16.mxu0 %v6794_v1 }
  0xec   : > { %v564_v59 = vpop.f32.mrf.mxu0 }
  0xed   : > { %v565_v60 = vadd.f32 %v7048_v58, %v564_v59 }
  0xee   : > { %v5647_v62 = vpop.f32.mrf.mxu0 }
  0xef   : > { %v730_v63 = vmax.f32 %v565_v60, 0.0 }
  0xf0   : > { %v567_v0 = vpop.f32.mrf.mxu0 }
  0xf1   : > { %v771_v2 = vmul.f32 %v730_v63, %v253_v61  ;;  %v568_v3 = vadd.f32 %v7048_v58, %v567_v0  ;;  %v6695_v61 = vld [vmem:[%s8554_s3 + $0xe0] sm:$0xff]  }
  0xf2   : > { %v5648_v5 = vpop.f32.mrf.mxu0  ;;  %v261_v63 = vld [vmem:[%s8556_s5 + $0x40] sm:$0xff]  ;;  %6036 = vmatpush3.bf16.msra.mxu0 %v6695_v61 }
  0xf3   : > { %818 = vst [vmem:[#allocation2 + $0x18] sm:$0xff] %v771_v2  ;;  %v731_v6 = vmax.f32 %v568_v3, 0.0  ;;  %6037 = vmatprep.subr.bf16.mxu0 %v6794_v1 }
  0xf4   : > { %v572_v7 = vpop.f32.mrf.mxu0 }
  0xf5   : > { %v772_v8 = vmul.f32 %v731_v6, %v254_v4  ;;  %v573_v9 = vadd.f32 %v7048_v58, %v572_v7 }
  0xf6   : > { %v5651_v11 = vpop.f32.mrf.mxu0 }
  0xf7   : > { %819 = vst [vmem:[#allocation2 + $0x20] sm:$0xff] %v772_v8  ;;  %v732_v12 = vmax.f32 %v573_v9, 0.0  ;;  %v6696_v11 = vld [vmem:[%s8554_s3 + $0xd8] sm:$0xff]  }
  0xf8   : > { %v575_v13 = vpop.f32.mrf.mxu0  ;;  %6038 = vmatpush3.bf16.msra.mxu0 %v6696_v11 }
  0xf9   : > { %v773_v14 = vmul.f32 %v732_v12, %v255_v10  ;;  %v576_v15 = vadd.f32 %v7048_v58, %v575_v13  ;;  %6039 = vmatprep.subr.bf16.mxu0 %v6794_v1 }
  0xfa   : > { %v5652_v17 = vpop.f32.mrf.mxu0  ;;  %v861_v24 = vld [vmem:[#allocation2 + $0x15] sm:$0xff] }
  0xfb   : > { %820 = vst [vmem:[#allocation2 + $0x28] sm:$0xff] %v773_v14  ;;  %v733_v18 = vmax.f32 %v576_v15, 0.0  ;;  %v1228_v27 = vld [vmem:[#allocation2 + $0x16] sm:$0xff]  ;;  %v262_v14 = vld [vmem:[%s8556_s5 + $0x48] sm:$0xff]  ;;  %v6694_v17 = vld [vmem:[%s8554_s3 + $0x80] sm:$0xff]  }
  0xfc   : > { %v580_v20 = vpop.f32.mrf.mxu0  ;;  %5944 = vmatpush3.bf16.msra.mxu1 %v6694_v17 }
  0xfd   : > { %v774_v21 = vmul.f32 %v733_v18, %v256_v16  ;;  %v581_v23 = vadd.f32 %v7048_v58, %v580_v20  ;;  %v6697_v18 = vld [vmem:[%s8554_s3 + $0xd0] sm:$0xff]   ;;  %6129 = vmatprep.subr.bf16.mxu1 %v6794_v1 }
  0xfe   : > { %v5655_v25 = vpop.f32.mrf.mxu0  ;;  %v862_v26 = vld [vmem:[#allocation2 + $0x1d] sm:$0xff]  ;;  %6040 = vmatpush3.bf16.msra.mxu0 %v6697_v18 }
  0xff   : > { %v1229_v28 = vld [vmem:[#allocation2 + $0x1e] sm:$0xff]  ;;  %821 = vst [vmem:[#allocation2 + $0x30] sm:$0xff] %v774_v21  ;;  %v734_v29 = vmax.f32 %v581_v23, 0.0  ;;  %v901_v30 = vpack.c.bf16 %v862_v26, %v861_v24  ;;  %v263_v21 = vld [vmem:[%s8556_s5 + $0x50] sm:$0xff] }
 0x100   : > { %v1268_v31 = vpack.c.bf16 %v1229_v28, %v1228_v27  ;;  %v583_v32 = vpop.f32.mrf.mxu0 }
 0x101   : > { %v775_v34 = vmul.f32 %v734_v29, %v257_v22  ;;  %v584_v35 = vadd.f32 %v7048_v58, %v583_v32  ;;  %5750 = vmatmul.mubr.bf16.gmra.mxu1 %v901_v30  ;;  %v7138_v32 = vld [vmem:[#allocation2] sm:$0xff] }
 0x102   : > { %5850 = vmatmul.mubr.bf16.gmra.mxu0 %v1268_v31  ;;  %v5656_v37 = vpop.f32.mrf.mxu0  ;;  %5753 = vmatprep.mubr.msk.bf16.mxu1 %vm6795_vm0, %v6794_v1  ;;  %v863_v44 = vld [vmem:[#allocation2 + $0x25] sm:$0xff] }
 0x103   : > { %5853 = vmatprep.mubr.msk.bf16.mxu0 %vm6795_vm0, %v6794_v1  ;;  %822 = vst [vmem:[#allocation2 + $0x38] sm:$0xff] %v775_v34  ;;  %v735_v38 = vmax.f32 %v584_v35, 0.0  ;;  %v1230_v47 = vld [vmem:[#allocation2 + $0x26] sm:$0xff]  ;;  %6041 = vmatprep.subr.bf16.mxu0 %v7138_v32 }
 0x104   : > { %v588_v39 = vpop.f32.mrf.mxu0  ;;  %6042 = vmatpush3.bf16.msra.mxu0 %v6698_v33 }
 0x105   : > { %v776_v41 = vmul.f32 %v735_v38, %v258_v36  ;;  %v589_v43 = vadd.f32 %v7048_v58, %v588_v39  ;;  %v6699_v38 = vld [vmem:[%s8554_s3 + $0xc0] sm:$0xff]   ;;  %6043 = vmatprep.subr.bf16.mxu0 %v7138_v32 }
 0x106   : > { %v5659_v45 = vpop.f32.mrf.mxu0  ;;  %v864_v46 = vld [vmem:[#allocation2 + $0x2d] sm:$0xff] }
 0x107   : > { %v1231_v48 = vld [vmem:[#allocation2 + $0x2e] sm:$0xff]  ;;  %823 = vst [vmem:[#allocation2 + $0x40] sm:$0xff] %v776_v41  ;;  %v736_v49 = vmax.f32 %v589_v43, 0.0  ;;  %v902_v50 = vpack.c.bf16 %v864_v46, %v863_v44  ;;  %v265_v41 = vld [vmem:[%s8556_s5 + $0x60] sm:$0xff] }
 0x108   : > { %v1269_v51 = vpack.c.bf16 %v1231_v48, %v1230_v47  ;;  %v591_v52 = vpop.f32.mrf.mxu0  ;;  %6044 = vmatpush3.bf16.msra.mxu0 %v6699_v38 }
 0x109   : > { %v777_v54 = vmul.f32 %v736_v49, %v259_v42  ;;  %v592_v55 = vadd.f32 %v7048_v58, %v591_v52  ;;  %5754 = vmatmul.mubr.bf16.gmra.mxu1 %v902_v50  ;;  %6229 = vmatprep.subr.bf16.mxu0 %v7138_v32 }
 0x10a   : > { %5854 = vmatmul.mubr.bf16.gmra.mxu0 %v1269_v51  ;;  %v5660_v57 = vpop.f32.mrf.mxu0  ;;  %5757 = vmatprep.mubr.msk.bf16.mxu1 %vm6795_vm0, %v6794_v1  ;;  %v865_v2 = vld [vmem:[#allocation2 + $0x35] sm:$0xff] }
 0x10b   : > { %5857 = vmatprep.mubr.msk.bf16.mxu0 %vm6795_vm0, %v6794_v1  ;;  %824 = vst [vmem:[#allocation2 + $0x48] sm:$0xff] %v777_v54  ;;  %v737_v59 = vmax.f32 %v592_v55, 0.0  ;;  %v1232_v5 = vld [vmem:[#allocation2 + $0x36] sm:$0xff]  ;;  %v266_v54 = vld [vmem:[%s8556_s5 + $0x68] sm:$0xff] }
 0x10c   : > { %v596_v60 = vpop.f32.mrf.mxu0 }
 0x10d   : > { %v778_v62 = vmul.f32 %v737_v59, %v260_v56  ;;  %v597_v0 = vadd.f32 %v7048_v58, %v596_v60  ;;  %v267_v60 = vld [vmem:[%s8556_s5 + $0x70] sm:$0xff] }
 0x10e   : > { %v5663_v3 = vpop.f32.mrf.mxu0  ;;  %v866_v4 = vld [vmem:[#allocation2 + $0x3d] sm:$0xff] }
 0x10f   : > { %v1233_v6 = vld [vmem:[#allocation2 + $0x3e] sm:$0xff]  ;;  %825 = vst [vmem:[#allocation2 + $0x50] sm:$0xff] %v778_v62  ;;  %v738_v7 = vmax.f32 %v597_v0, 0.0  ;;  %v903_v8 = vpack.c.bf16 %v866_v4, %v865_v2 }
 0x110   : > { %v1270_v9 = vpack.c.bf16 %v1233_v6, %v1232_v5  ;;  %v599_v10 = vpop.f32.mrf.mxu0 }
 0x111   : > { %v779_v12 = vmul.f32 %v738_v7, %v261_v63  ;;  %v600_v13 = vadd.f32 %v7048_v58, %v599_v10  ;;  %5758 = vmatmul.mubr.bf16.gmra.mxu1 %v903_v8  ;;  %v268_v10 = vld [vmem:[%s8556_s5 + $0x78] sm:$0xff] }
 0x112   : > { %5858 = vmatmul.mubr.bf16.gmra.mxu0 %v1270_v9  ;;  %v5664_v15 = vpop.f32.mrf.mxu0  ;;  %5761 = vmatprep.mubr.msk.bf16.mxu1 %vm6795_vm0, %v6794_v1  ;;  %v867_v23 = vld [vmem:[#allocation2 + $0x45] sm:$0xff] }
 0x113   : > { %5861 = vmatprep.mubr.msk.bf16.mxu0 %vm6795_vm0, %v6794_v1  ;;  %826 = vst [vmem:[#allocation2 + $0x58] sm:$0xff] %v779_v12  ;;  %v739_v16 = vmax.f32 %v600_v13, 0.0  ;;  %v1234_v26 = vld [vmem:[#allocation2 + $0x46] sm:$0xff]  ;;  %v264_v1 = vld [vmem:[%s8556_s5 + $0x58] sm:$0xff] }
 0x114   : > { %v604_v19 = vpop.f32.mrf.mxu0  ;;  %v269_v15 = vld [vmem:[%s8556_s5 + $0x80] sm:$0xff] }
 0x115   : > { %v780_v20 = vmul.f32 %v739_v16, %v262_v14  ;;  %v605_v22 = vadd.f32 %v7048_v58, %v604_v19 }
 0x116   : > { %v5667_v24 = vpop.f32.mrf.mxu0  ;;  %v868_v25 = vld [vmem:[#allocation2 + $0x4d] sm:$0xff] }
 0x117   : > { %v1235_v27 = vld [vmem:[#allocation2 + $0x4e] sm:$0xff]  ;;  %827 = vst [vmem:[#allocation2 + $0x60] sm:$0xff] %v780_v20  ;;  %v740_v28 = vmax.f32 %v605_v22, 0.0  ;;  %v904_v29 = vpack.c.bf16 %v868_v25, %v867_v23 }
 0x118   : > { %v1271_v30 = vpack.c.bf16 %v1235_v27, %v1234_v26  ;;  %v607_v31 = vpop.f32.mrf.mxu0 }
 0x119   : > { %v781_v34 = vmul.f32 %v740_v28, %v263_v21  ;;  %v608_v35 = vadd.f32 %v7048_v58, %v607_v31  ;;  %5762 = vmatmul.mubr.bf16.gmra.mxu1 %v904_v29  ;;  %v270_v28 = vld [vmem:[%s8556_s5 + $0x88] sm:$0xff]  ;;  %v7193_v31 = vpop.f32.mrf.mxu1 }
 0x11a   : > { %5862 = vmatmul.mubr.bf16.gmra.mxu0 %v1271_v30  ;;  %v5668_v36 = vpop.f32.mrf.mxu0  ;;  %5765 = vmatprep.mubr.msk.bf16.mxu1 %vm6795_vm0, %v7138_v32  ;;  %v869_v43 = vld [vmem:[#allocation2 + $0x55] sm:$0xff] }
 0x11b   : > { %5865 = vmatprep.mubr.msk.bf16.mxu0 %vm6795_vm0, %v7138_v32  ;;  %828 = vst [vmem:[#allocation2 + $0x68] sm:$0xff] %v781_v34  ;;  %v741_v37 = vmax.f32 %v608_v35, 0.0  ;;  %v1236_v46 = vld [vmem:[#allocation2 + $0x56] sm:$0xff] }
 0x11c   : > { %v612_v39 = vpop.f32.mrf.mxu0  ;;  %v271_v35 = vld [vmem:[%s8556_s5 + $0x90] sm:$0xff] }
 0x11d   : > { %v782_v40 = vmul.f32 %v741_v37, %v264_v1  ;;  %v613_v42 = vadd.f32 %v7048_v58, %v612_v39  ;;  %v5747_v37 = vpop.f32.mrf.mxu1 }
 0x11e   : > { %v5671_v44 = vpop.f32.mrf.mxu0  ;;  %v870_v45 = vld [vmem:[#allocation2 + $0x5d] sm:$0xff] }
 0x11f   : > { %v1237_v47 = vld [vmem:[#allocation2 + $0x5e] sm:$0xff]  ;;  %829 = vst [vmem:[#allocation2 + $0x70] sm:$0xff] %v782_v40  ;;  %v742_v48 = vmax.f32 %v613_v42, 0.0  ;;  %v905_v49 = vpack.c.bf16 %v870_v45, %v869_v43  ;;  %v7199_v45 = vpop.f32.mrf.mxu1 }
 0x120   : > { %v1272_v50 = vpack.c.bf16 %v1237_v47, %v1236_v46  ;;  %v615_v51 = vpop.f32.mrf.mxu0 }
 0x121   : > { %v783_v52 = vmul.f32 %v742_v48, %v265_v41  ;;  %v616_v53 = vadd.f32 %v7048_v58, %v615_v51  ;;  %5766 = vmatmul.mubr.bf16.gmra.mxu1 %v905_v49  ;;  %v5748_v49 = vpop.f32.mrf.mxu1 }
 0x122   : > { %5866 = vmatmul.mubr.bf16.gmra.mxu0 %v1272_v50  ;;  %v5672_v55 = vpop.f32.mrf.mxu0  ;;  %5769 = vmatprep.mubr.msk.bf16.mxu1 %vm6795_vm0, %v7138_v32  ;;  %v871_v62 = vld [vmem:[#allocation2 + $0x65] sm:$0xff]  ;;  %v272_v50 = vld [vmem:[%s8556_s5 + $0x98] sm:$0xff]  ;;  %v279_v49 = vld [vmem:[%s8556_s5 + $0xd0] sm:$0xff] }
 0x123   : > { %5869 = vmatprep.mubr.msk.bf16.mxu0 %vm6795_vm0, %v7138_v32  ;;  %830 = vst [vmem:[#allocation2 + $0x78] sm:$0xff] %v783_v52  ;;  %v743_v56 = vmax.f32 %v616_v53, 0.0  ;;  %v1238_v2 = vld [vmem:[#allocation2 + $0x66] sm:$0xff] }
 0x124   : > { %v620_v57 = vpop.f32.mrf.mxu0  ;;  %v273_v55 = vld [vmem:[%s8556_s5 + $0xa0] sm:$0xff] }
 0x125   : > { %v784_v59 = vmul.f32 %v743_v56, %v266_v54  ;;  %v621_v61 = vadd.f32 %v7048_v58, %v620_v57 }
 0x126   : > { %v5675_v63 = vpop.f32.mrf.mxu0  ;;  %v872_v0 = vld [vmem:[#allocation2 + $0x6d] sm:$0xff] }
 0x127   : > { %v1239_v3 = vld [vmem:[#allocation2 + $0x6e] sm:$0xff]  ;;  %831 = vst [vmem:[#allocation2 + $0x80] sm:$0xff] %v784_v59  ;;  %v744_v4 = vmax.f32 %v621_v61, 0.0  ;;  %v906_v5 = vpack.c.bf16 %v872_v0, %v871_v62 }
 0x128   : > { %v1273_v6 = vpack.c.bf16 %v1239_v3, %v1238_v2  ;;  %v623_v7 = vpop.f32.mrf.mxu0 }
 0x129   : > { %v785_v8 = vmul.f32 %v744_v4, %v267_v60  ;;  %v624_v9 = vadd.f32 %v7048_v58, %v623_v7  ;;  %5770 = vmatmul.mubr.bf16.gmra.mxu1 %v906_v5 }
 0x12a   : > { %5870 = vmatmul.mubr.bf16.gmra.mxu0 %v1273_v6  ;;  %v5676_v11 = vpop.f32.mrf.mxu0  ;;  %5773 = vmatprep.mubr.msk.bf16.mxu1 %vm6795_vm0, %v7138_v32  ;;  %v873_v17 = vld [vmem:[#allocation2 + $0x75] sm:$0xff]  ;;  %v274_v6 = vld [vmem:[%s8556_s5 + $0xa8] sm:$0xff] }
 0x12b   : > { %5873 = vmatprep.mubr.msk.bf16.mxu0 %vm6795_vm0, %v7138_v32  ;;  %832 = vst [vmem:[#allocation2 + $0x88] sm:$0xff] %v785_v8  ;;  %v745_v12 = vmax.f32 %v624_v9, 0.0  ;;  %v1240_v20 = vld [vmem:[#allocation2 + $0x76] sm:$0xff] }
 0x12c   : > { %v628_v13 = vpop.f32.mrf.mxu0  ;;  %v275_v11 = vld [vmem:[%s8556_s5 + $0xb0] sm:$0xff] }
 0x12d   : > { %v786_v14 = vmul.f32 %v745_v12, %v268_v10  ;;  %v629_v16 = vadd.f32 %v7048_v58, %v628_v13 }
 0x12e   : > { %v5679_v18 = vpop.f32.mrf.mxu0  ;;  %v874_v19 = vld [vmem:[#allocation2 + $0x7d] sm:$0xff] }
 0x12f   : > { %v1241_v21 = vld [vmem:[#allocation2 + $0x7e] sm:$0xff]  ;;  %833 = vst [vmem:[#allocation2 + $0x90] sm:$0xff] %v786_v14  ;;  %v746_v22 = vmax.f32 %v629_v16, 0.0  ;;  %v907_v23 = vpack.c.bf16 %v874_v19, %v873_v17 }
 0x130   : > { %v1274_v24 = vpack.c.bf16 %v1241_v21, %v1240_v20  ;;  %v631_v25 = vpop.f32.mrf.mxu0 }
 0x131   : > { %v787_v26 = vmul.f32 %v746_v22, %v269_v15  ;;  %v632_v27 = vadd.f32 %v7048_v58, %v631_v25  ;;  %5774 = vmatmul.mubr.bf16.gmra.mxu1 %v907_v23 }
 0x132   : > { %5874 = vmatmul.mubr.bf16.gmra.mxu0 %v1274_v24  ;;  %v5680_v29 = vpop.f32.mrf.mxu0  ;;  %5777 = vmatprep.mubr.msk.bf16.mxu1 %vm6795_vm0, %v7138_v32  ;;  %v875_v36 = vld [vmem:[#allocation2 + $0x85] sm:$0xff]  ;;  %v276_v24 = vld [vmem:[%s8556_s5 + $0xb8] sm:$0xff] }
 0x133   : > { %5877 = vmatprep.mubr.msk.bf16.mxu0 %vm6795_vm0, %v7138_v32  ;;  %834 = vst [vmem:[#allocation2 + $0x98] sm:$0xff] %v787_v26  ;;  %v747_v30 = vmax.f32 %v632_v27, 0.0  ;;  %v1242_v40 = vld [vmem:[#allocation2 + $0x86] sm:$0xff] }
 0x134   : > { %v636_v33 = vpop.f32.mrf.mxu0  ;;  %v277_v29 = vld [vmem:[%s8556_s5 + $0xc0] sm:$0xff] }
 0x135   : > { %v788_v34 = vmul.f32 %v747_v30, %v270_v28  ;;  %v637_v1 = vadd.f32 %v7048_v58, %v636_v33 }
 0x136   : > { %v5683_v38 = vpop.f32.mrf.mxu0  ;;  %v876_v39 = vld [vmem:[#allocation2 + $0x8d] sm:$0xff] }
 0x137   : > { %v1243_v41 = vld [vmem:[#allocation2 + $0x8e] sm:$0xff]  ;;  %835 = vst [vmem:[#allocation2 + $0xa0] sm:$0xff] %v788_v34  ;;  %v748_v42 = vmax.f32 %v637_v1, 0.0  ;;  %v908_v43 = vpack.c.bf16 %v876_v39, %v875_v36 }
 0x138   : > { %v1275_v44 = vpack.c.bf16 %v1243_v41, %v1242_v40  ;;  %v639_v46 = vpop.f32.mrf.mxu0 }
 0x139   : > { %v789_v47 = vmul.f32 %v748_v42, %v271_v35  ;;  %v640_v48 = vadd.f32 %v7048_v58, %v639_v46  ;;  %5778 = vmatmul.mubr.bf16.gmra.mxu1 %v908_v43  ;;  %v278_v43 = vld [vmem:[%s8556_s5 + $0xc8] sm:$0xff] }
 0x13a   : > { %5878 = vmatmul.mubr.bf16.gmra.mxu0 %v1275_v44  ;;  %v5684_v51 = vpop.f32.mrf.mxu0  ;;  %5781 = vmatprep.mubr.msk.bf16.mxu1 %vm6795_vm0, %v7138_v32  ;;  %v877_v57 = vld [vmem:[#allocation2 + $0x95] sm:$0xff] }
 0x13b   : > { %5881 = vmatprep.mubr.msk.bf16.mxu0 %vm6795_vm0, %v7138_v32  ;;  %836 = vst [vmem:[#allocation2 + $0xa8] sm:$0xff] %v789_v47  ;;  %v749_v52 = vmax.f32 %v640_v48, 0.0  ;;  %v1244_v61 = vld [vmem:[#allocation2 + $0x96] sm:$0xff] }
 0x13c   : > { %v644_v53 = vpop.f32.mrf.mxu0 }
 0x13d   : > { %v790_v54 = vmul.f32 %v749_v52, %v272_v50  ;;  %v645_v56 = vadd.f32 %v7048_v58, %v644_v53 }
 0x13e   : > { %v5687_v59 = vpop.f32.mrf.mxu0  ;;  %v878_v60 = vld [vmem:[#allocation2 + $0x9d] sm:$0xff] }
 0x13f   : > { %v1245_v62 = vld [vmem:[#allocation2 + $0x9e] sm:$0xff]  ;;  %837 = vst [vmem:[#allocation2 + $0xb0] sm:$0xff] %v790_v54  ;;  %v750_v63 = vmax.f32 %v645_v56, 0.0  ;;  %v909_v0 = vpack.c.bf16 %v878_v60, %v877_v57 }
 0x140   : > { %v1276_v2 = vpack.c.bf16 %v1245_v62, %v1244_v61  ;;  %v647_v3 = vpop.f32.mrf.mxu0 }
 0x141   : > { %v791_v4 = vmul.f32 %v750_v63, %v273_v55  ;;  %v648_v5 = vadd.f32 %v7048_v58, %v647_v3  ;;  %5782 = vmatmul.mubr.bf16.gmra.mxu1 %v909_v0  ;;  %v280_v63 = vld [vmem:[%s8556_s5 + $0xd8] sm:$0xff] }
 0x142   : > { %5882 = vmatmul.mubr.bf16.gmra.mxu0 %v1276_v2  ;;  %v5688_v7 = vpop.f32.mrf.mxu0  ;;  %5785 = vmatprep.mubr.msk.bf16.mxu1 %vm6795_vm0, %v7138_v32  ;;  %v879_v13 = vld [vmem:[#allocation2 + $0xa5] sm:$0xff] }
 0x143   : > { %5885 = vmatprep.mubr.msk.bf16.mxu0 %vm6795_vm0, %v7138_v32  ;;  %838 = vst [vmem:[#allocation2 + $0xb8] sm:$0xff] %v791_v4  ;;  %v751_v8 = vmax.f32 %v648_v5, 0.0  ;;  %v1246_v16 = vld [vmem:[#allocation2 + $0xa6] sm:$0xff] }
 0x144   : > { %v652_v9 = vpop.f32.mrf.mxu0  ;;  %v281_v5 = vld [vmem:[%s8556_s5 + $0xe0] sm:$0xff] }
 0x145   : > { %v792_v10 = vmul.f32 %v751_v8, %v274_v6  ;;  %v653_v12 = vadd.f32 %v7048_v58, %v652_v9 }
 0x146   : > { %v5691_v14 = vpop.f32.mrf.mxu0  ;;  %v880_v15 = vld [vmem:[#allocation2 + $0xad] sm:$0xff] }
 0x147   : > { %v1247_v17 = vld [vmem:[#allocation2 + $0xae] sm:$0xff]  ;;  %839 = vst [vmem:[#allocation2 + $0xc0] sm:$0xff] %v792_v10  ;;  %v752_v18 = vmax.f32 %v653_v12, 0.0  ;;  %v910_v19 = vpack.c.bf16 %v880_v15, %v879_v13 }
 0x148   : > { %v1277_v20 = vpack.c.bf16 %v1247_v17, %v1246_v16  ;;  %v655_v21 = vpop.f32.mrf.mxu0 }
 0x149   : > { %v793_v22 = vmul.f32 %v752_v18, %v275_v11  ;;  %v656_v23 = vadd.f32 %v7048_v58, %v655_v21  ;;  %5786 = vmatmul.mubr.bf16.gmra.mxu1 %v910_v19  ;;  %v282_v18 = vld [vmem:[%s8556_s5 + $0xe8] sm:$0xff] }
 0x14a   : > { %5886 = vmatmul.mubr.bf16.gmra.mxu0 %v1277_v20  ;;  %v5692_v25 = vpop.f32.mrf.mxu0  ;;  %5789 = vmatprep.mubr.msk.bf16.mxu1 %vm6795_vm0, %v7138_v32  ;;  %v881_v33 = vld [vmem:[#allocation2 + $0xb5] sm:$0xff] }
 0x14b   : > { %5889 = vmatprep.mubr.msk.bf16.mxu0 %vm6795_vm0, %v7138_v32  ;;  %840 = vst [vmem:[#allocation2 + $0xc8] sm:$0xff] %v793_v22  ;;  %v753_v26 = vmax.f32 %v656_v23, 0.0  ;;  %v1248_v1 = vld [vmem:[#allocation2 + $0xb6] sm:$0xff] }
 0x14c   : > { %v660_v27 = vpop.f32.mrf.mxu0  ;;  %v283_v23 = vld [vmem:[%s8556_s5 + $0xf0] sm:$0xff] }
 0x14d   : > { %v794_v28 = vmul.f32 %v753_v26, %v276_v24  ;;  %v661_v30 = vadd.f32 %v7048_v58, %v660_v27 }
 0x14e   : > { %v5695_v34 = vpop.f32.mrf.mxu0  ;;  %v882_v35 = vld [vmem:[#allocation2 + $0xbd] sm:$0xff] }
 0x14f   : > { %v1249_v36 = vld [vmem:[#allocation2 + $0xbe] sm:$0xff]  ;;  %841 = vst [vmem:[#allocation2 + $0xd0] sm:$0xff] %v794_v28  ;;  %v754_v37 = vmax.f32 %v661_v30, 0.0  ;;  %v911_v38 = vpack.c.bf16 %v882_v35, %v881_v33 }
 0x150   : > { %v1278_v39 = vpack.c.bf16 %v1249_v36, %v1248_v1  ;;  %v663_v40 = vpop.f32.mrf.mxu0 }
 0x151   : > { %v795_v41 = vmul.f32 %v754_v37, %v277_v29  ;;  %v664_v42 = vadd.f32 %v7048_v58, %v663_v40  ;;  %5790 = vmatmul.mubr.bf16.gmra.mxu1 %v911_v38  ;;  %v284_v37 = vld [vmem:[%s8556_s5 + $0xf8] sm:$0xff] }
 0x152   : > { %5890 = vmatmul.mubr.bf16.gmra.mxu0 %v1278_v39  ;;  %v5696_v44 = vpop.f32.mrf.mxu0  ;;  %5793 = vmatprep.mubr.msk.bf16.mxu1 %vm6795_vm0, %v7138_v32  ;;  %v883_v51 = vld [vmem:[#allocation2 + $0xc5] sm:$0xff] }
 0x153   : > { %5893 = vmatprep.mubr.msk.bf16.mxu0 %vm6795_vm0, %v7138_v32  ;;  %842 = vst [vmem:[#allocation2 + $0xd8] sm:$0xff] %v795_v41  ;;  %v755_v46 = vmax.f32 %v664_v42, 0.0  ;;  %v1250_v54 = vld [vmem:[#allocation2 + $0xc6] sm:$0xff] }
 0x154   : > { %v668_v47 = vpop.f32.mrf.mxu0  ;;  %v285_v42 = vld [vmem:[%s8556_s5 + $0x100] sm:$0xff] }
 0x155   : > { %v796_v48 = vmul.f32 %v755_v46, %v278_v43  ;;  %v669_v50 = vadd.f32 %v7048_v58, %v668_v47 }
 0x156   : > { %v5699_v52 = vpop.f32.mrf.mxu0  ;;  %v884_v53 = vld [vmem:[#allocation2 + $0xcd] sm:$0xff] }
 0x157   : > { %v1251_v55 = vld [vmem:[#allocation2 + $0xce] sm:$0xff]  ;;  %843 = vst [vmem:[#allocation2 + $0xe0] sm:$0xff] %v796_v48  ;;  %v756_v56 = vmax.f32 %v669_v50, 0.0  ;;  %v912_v57 = vpack.c.bf16 %v884_v53, %v883_v51 }
 0x158   : > { %v1279_v59 = vpack.c.bf16 %v1251_v55, %v1250_v54  ;;  %v671_v60 = vpop.f32.mrf.mxu0 }
 0x159   : > { %v797_v61 = vmul.f32 %v756_v56, %v279_v49  ;;  %v672_v62 = vadd.f32 %v7048_v58, %v671_v60  ;;  %5794 = vmatmul.mubr.bf16.gmra.mxu1 %v912_v57  ;;  %v286_v56 = vld [vmem:[%s8556_s5 + $0x108] sm:$0xff] }
 0x15a   : > { %5894 = vmatmul.mubr.bf16.gmra.mxu0 %v1279_v59  ;;  %v5700_v0 = vpop.f32.mrf.mxu0  ;;  %5797 = vmatprep.mubr.msk.bf16.mxu1 %vm6795_vm0, %v7138_v32  ;;  %v885_v7 = vld [vmem:[#allocation2 + $0xd5] sm:$0xff] }
 0x15b   : > { %5897 = vmatprep.mubr.msk.bf16.mxu0 %vm6795_vm0, %v7138_v32  ;;  %844 = vst [vmem:[#allocation2 + $0xe8] sm:$0xff] %v797_v61  ;;  %v757_v2 = vmax.f32 %v672_v62, 0.0  ;;  %v1252_v10 = vld [vmem:[#allocation2 + $0xd6] sm:$0xff] }
 0x15c   : > { %v676_v3 = vpop.f32.mrf.mxu0  ;;  %v287_v62 = vld [vmem:[%s8556_s5 + $0x110] sm:$0xff] }
 0x15d   : > { %v798_v4 = vmul.f32 %v757_v2, %v280_v63  ;;  %v677_v6 = vadd.f32 %v7048_v58, %v676_v3 }
 0x15e   : > { %v5703_v8 = vpop.f32.mrf.mxu0  ;;  %v886_v9 = vld [vmem:[#allocation2 + $0xdd] sm:$0xff] }
 0x15f   : > { %v1253_v11 = vld [vmem:[#allocation2 + $0xde] sm:$0xff]  ;;  %845 = vst [vmem:[#allocation2 + $0xf0] sm:$0xff] %v798_v4  ;;  %v758_v12 = vmax.f32 %v677_v6, 0.0  ;;  %v913_v13 = vpack.c.bf16 %v886_v9, %v885_v7 }
 0x160   : > { %v1280_v14 = vpack.c.bf16 %v1253_v11, %v1252_v10  ;;  %v679_v15 = vpop.f32.mrf.mxu0 }
 0x161   : > { %v799_v16 = vmul.f32 %v758_v12, %v281_v5  ;;  %v680_v17 = vadd.f32 %v7048_v58, %v679_v15  ;;  %5798 = vmatmul.mubr.bf16.gmra.mxu1 %v913_v13  ;;  %v288_v12 = vld [vmem:[%s8556_s5 + $0x118] sm:$0xff] }
 0x162   : > { %5898 = vmatmul.mubr.bf16.gmra.mxu0 %v1280_v14  ;;  %v5704_v19 = vpop.f32.mrf.mxu0  ;;  %5801 = vmatprep.mubr.msk.bf16.mxu1 %vm6795_vm0, %v7138_v32  ;;  %v887_v25 = vld [vmem:[#allocation2 + $0xe5] sm:$0xff] }
 0x163   : > { %5901 = vmatprep.mubr.msk.bf16.mxu0 %vm6795_vm0, %v7138_v32  ;;  %846 = vst [vmem:[#allocation2 + $0xf8] sm:$0xff] %v799_v16  ;;  %v759_v20 = vmax.f32 %v680_v17, 0.0  ;;  %v1254_v28 = vld [vmem:[#allocation2 + $0xe6] sm:$0xff] }
 0x164   : > { %v684_v21 = vpop.f32.mrf.mxu0  ;;  %v289_v17 = vld [vmem:[%s8556_s5 + $0x120] sm:$0xff] }
 0x165   : > { %v800_v22 = vmul.f32 %v759_v20, %v282_v18  ;;  %v685_v24 = vadd.f32 %v7048_v58, %v684_v21 }
 0x166   : > { %v5707_v26 = vpop.f32.mrf.mxu0  ;;  %v888_v27 = vld [vmem:[#allocation2 + $0xed] sm:$0xff] }
 0x167   : > { %v1255_v29 = vld [vmem:[#allocation2 + $0xee] sm:$0xff]  ;;  %847 = vst [vmem:[#allocation2 + $0x100] sm:$0xff] %v800_v22  ;;  %v760_v30 = vmax.f32 %v685_v24, 0.0  ;;  %v914_v33 = vpack.c.bf16 %v888_v27, %v887_v25 }
 0x168   : > { %v1281_v34 = vpack.c.bf16 %v1255_v29, %v1254_v28  ;;  %v687_v35 = vpop.f32.mrf.mxu0 }
 0x169   : > { %v801_v1 = vmul.f32 %v760_v30, %v283_v23  ;;  %v688_v36 = vadd.f32 %v7048_v58, %v687_v35  ;;  %5802 = vmatmul.mubr.bf16.gmra.mxu1 %v914_v33  ;;  %v290_v30 = vld [vmem:[%s8556_s5 + $0x128] sm:$0xff] }
 0x16a   : > { %5902 = vmatmul.mubr.bf16.gmra.mxu0 %v1281_v34  ;;  %v5708_v38 = vpop.f32.mrf.mxu0  ;;  %5805 = vmatprep.mubr.msk.bf16.mxu1 %vm6795_vm0, %v7138_v32  ;;  %v889_v44 = vld [vmem:[#allocation2 + $0xf5] sm:$0xff] }
 0x16b   : > { %5905 = vmatprep.mubr.msk.bf16.mxu0 %vm6795_vm0, %v7138_v32  ;;  %848 = vst [vmem:[#allocation2 + $0x108] sm:$0xff] %v801_v1  ;;  %v761_v39 = vmax.f32 %v688_v36, 0.0  ;;  %v1256_v48 = vld [vmem:[#allocation2 + $0xf6] sm:$0xff] }
 0x16c   : > { %v692_v40 = vpop.f32.mrf.mxu0  ;;  %v291_v36 = vld [vmem:[%s8556_s5 + $0x130] sm:$0xff] }
 0x16d   : > { %v802_v41 = vmul.f32 %v761_v39, %v284_v37  ;;  %v693_v43 = vadd.f32 %v7048_v58, %v692_v40 }
 0x16e   : > { %v5711_v46 = vpop.f32.mrf.mxu0  ;;  %v890_v47 = vld [vmem:[#allocation2 + $0xfd] sm:$0xff] }
 0x16f   : > { %v1257_v49 = vld [vmem:[#allocation2 + $0xfe] sm:$0xff]  ;;  %849 = vst [vmem:[#allocation2 + $0x110] sm:$0xff] %v802_v41  ;;  %v762_v50 = vmax.f32 %v693_v43, 0.0  ;;  %v915_v51 = vpack.c.bf16 %v890_v47, %v889_v44 }
 0x170   : > { %v1282_v52 = vpack.c.bf16 %v1257_v49, %v1256_v48  ;;  %v695_v53 = vpop.f32.mrf.mxu0 }
 0x171   : > { %v803_v54 = vmul.f32 %v762_v50, %v285_v42  ;;  %v696_v55 = vadd.f32 %v7048_v58, %v695_v53  ;;  %5806 = vmatmul.mubr.bf16.gmra.mxu1 %v915_v51  ;;  %v292_v50 = vld [vmem:[%s8556_s5 + $0x138] sm:$0xff] }
 0x172   : > { %5906 = vmatmul.mubr.bf16.gmra.mxu0 %v1282_v52  ;;  %v5712_v57 = vpop.f32.mrf.mxu0  ;;  %5809 = vmatprep.mubr.msk.bf16.mxu1 %vm6795_vm0, %v7138_v32  ;;  %v891_v0 = vld [vmem:[#allocation2 + $0x105] sm:$0xff] }
 0x173   : > { %5909 = vmatprep.mubr.msk.bf16.mxu0 %vm6795_vm0, %v7138_v32  ;;  %850 = vst [vmem:[#allocation2 + $0x118] sm:$0xff] %v803_v54  ;;  %v763_v59 = vmax.f32 %v696_v55, 0.0  ;;  %v1258_v4 = vld [vmem:[#allocation2 + $0x106] sm:$0xff] }
 0x174   : > { %v700_v60 = vpop.f32.mrf.mxu0  ;;  %v293_v55 = vld [vmem:[%s8556_s5 + $0x140] sm:$0xff] }
 0x175   : > { %v804_v61 = vmul.f32 %v763_v59, %v286_v56  ;;  %v701_v63 = vadd.f32 %v7048_v58, %v700_v60 }
 0x176   : > { %v5715_v2 = vpop.f32.mrf.mxu0  ;;  %v892_v3 = vld [vmem:[#allocation2 + $0x10d] sm:$0xff] }
 0x177   : > { %v1259_v5 = vld [vmem:[#allocation2 + $0x10e] sm:$0xff]  ;;  %851 = vst [vmem:[#allocation2 + $0x120] sm:$0xff] %v804_v61  ;;  %v764_v6 = vmax.f32 %v701_v63, 0.0  ;;  %v916_v7 = vpack.c.bf16 %v892_v3, %v891_v0 }
 0x178   : > { %v1283_v8 = vpack.c.bf16 %v1259_v5, %v1258_v4  ;;  %v703_v9 = vpop.f32.mrf.mxu0 }
 0x179   : > { %v805_v10 = vmul.f32 %v764_v6, %v287_v62  ;;  %v704_v11 = vadd.f32 %v7048_v58, %v703_v9  ;;  %5810 = vmatmul.mubr.bf16.gmra.mxu1 %v916_v7 }
 0x17a   : > { %5910 = vmatmul.mubr.bf16.gmra.mxu0 %v1283_v8  ;;  %v5716_v13 = vpop.f32.mrf.mxu0  ;;  %5813 = vmatprep.mubr.msk.bf16.mxu1 %vm6795_vm0, %v7138_v32  ;;  %v893_v19 = vld [vmem:[#allocation2 + $0x115] sm:$0xff] }
 0x17b   : > { %5913 = vmatprep.mubr.msk.bf16.mxu0 %vm6795_vm0, %v7138_v32  ;;  %852 = vst [vmem:[#allocation2 + $0x128] sm:$0xff] %v805_v10  ;;  %v765_v14 = vmax.f32 %v704_v11, 0.0  ;;  %v1260_v22 = vld [vmem:[#allocation2 + $0x116] sm:$0xff] }
 0x17c   : > { %v708_v15 = vpop.f32.mrf.mxu0  ;;  %v1677_v13 = vld [vmem:[#allocation2 + $0xf] sm:$0xff] }
 0x17d   : > { %v806_v16 = vmul.f32 %v765_v14, %v288_v12  ;;  %v709_v18 = vadd.f32 %v7048_v58, %v708_v15  ;;  %v1676_v12 = vld [vmem:[#allocation2 + $0x7] sm:$0xff]  ;;  %v2127_v15 = vld [vmem:[#allocation2 + $0x1f] sm:$0xff] }
 0x17e   : > { %v5719_v20 = vpop.f32.mrf.mxu0  ;;  %v894_v21 = vld [vmem:[#allocation2 + $0x11d] sm:$0xff] }
 0x17f   : > { %v1261_v23 = vld [vmem:[#allocation2 + $0x11e] sm:$0xff]  ;;  %853 = vst [vmem:[#allocation2 + $0x130] sm:$0xff] %v806_v16  ;;  %v766_v24 = vmax.f32 %v709_v18, 0.0  ;;  %v917_v25 = vpack.c.bf16 %v894_v21, %v893_v19  ;;  %v1717_v16 = vpack.c.bf16 %v1677_v13, %v1676_v12  ;;  %v6701_v20 = vld [vmem:[%s8554_s3 + $0x130] sm:$0xff]  }
 0x180   : > { %v1284_v26 = vpack.c.bf16 %v1261_v23, %v1260_v22  ;;  %v711_v27 = vpop.f32.mrf.mxu0  ;;  %v6700_v18 = vld [vmem:[%s8554_s3 + $0x138] sm:$0xff]   ;;  %v2129_v21 = vld [vmem:[#allocation2 + $0x2f] sm:$0xff]  ;;  %v2128_v22 = vld [vmem:[#allocation2 + $0x27] sm:$0xff] }
 0x181   : > { %v807_v28 = vmul.f32 %v766_v24, %v289_v17  ;;  %v712_v29 = vadd.f32 %v7048_v58, %v711_v27  ;;  %5814 = vmatmul.mubr.bf16.gmra.mxu1 %v917_v25  ;;  %v2126_v17 = vld [vmem:[#allocation2 + $0x17] sm:$0xff]  ;;  %v2168_v23 = vpack.c.bf16 %v2129_v21, %v2128_v22  ;;  %v6702_v24 = vld [vmem:[%s8554_s3 + $0x128] sm:$0xff]   ;;  %v2131_v27 = vld [vmem:[#allocation2 + $0x3f] sm:$0xff] }
 0x182   : > { %5914 = vmatmul.mubr.bf16.gmra.mxu0 %v1284_v26  ;;  %v5720_v33 = vpop.f32.mrf.mxu0  ;;  %5817 = vmatprep.mubr.msk.bf16.mxu1 %vm6795_vm0, %v7138_v32  ;;  %v895_v38 = vld [vmem:[#allocation2 + $0x125] sm:$0xff]  ;;  %v2167_v19 = vpack.c.bf16 %v2127_v15, %v2126_v17  ;;  %v6707_v25 = vld [vmem:[%s8554_s3 + $0x178] sm:$0xff]  }
 0x183   : > { %5917 = vmatprep.mubr.msk.bf16.mxu0 %vm6795_vm0, %v7138_v32  ;;  %854 = vst [vmem:[#allocation2 + $0x138] sm:$0xff] %v807_v28  ;;  %v767_v34 = vmax.f32 %v712_v29, 0.0  ;;  %v1262_v41 = vld [vmem:[#allocation2 + $0x126] sm:$0xff]  ;;  %v6708_v28 = vld [vmem:[%s8554_s3 + $0x170] sm:$0xff]   ;;  %v6704_v33 = vld [vmem:[%s8554_s3 + $0x118] sm:$0xff]  }
 0x184   : > { %v716_v35 = vpop.f32.mrf.mxu0  ;;  %v6703_v26 = vld [vmem:[%s8554_s3 + $0x120] sm:$0xff]   ;;  %v2130_v29 = vld [vmem:[#allocation2 + $0x37] sm:$0xff] }
 0x185   : > { %v808_v1 = vmul.f32 %v767_v34, %v290_v30  ;;  %v717_v37 = vadd.f32 %v7048_v58, %v716_v35  ;;  %v2169_v30 = vpack.c.bf16 %v2131_v27, %v2130_v29  ;;  %v6709_v34 = vld [vmem:[%s8554_s3 + $0x168] sm:$0xff]   ;;  %v6705_v35 = vld [vmem:[%s8554_s3 + $0x110] sm:$0xff]   ;;  %v7445_v17 = vld [vmem:[#allocation2] sm:$0xff] }
 0x186   : > { %v5723_v39 = vpop.f32.mrf.mxu0  ;;  %v896_v40 = vld [vmem:[#allocation2 + $0x12d] sm:$0xff] }
 0x187   : > { %v1263_v42 = vld [vmem:[#allocation2 + $0x12e] sm:$0xff]  ;;  %855 = vst [vmem:[#allocation2 + $0x140] sm:$0xff] %v808_v1  ;;  %v768_v43 = vmax.f32 %v717_v37, 0.0  ;;  %v918_v44 = vpack.c.bf16 %v896_v40, %v895_v38  ;;  %v6712_v40 = vld [vmem:[%s8554_s3 + $0x158] sm:$0xff]  }
 0x188   : > { %v1285_v46 = vpack.c.bf16 %v1263_v42, %v1262_v41  ;;  %v719_v47 = vpop.f32.mrf.mxu0  ;;  %v2133_v1 = vld [vmem:[#allocation2 + $0x4f] sm:$0xff]  ;;  %v2132_v37 = vld [vmem:[#allocation2 + $0x47] sm:$0xff]  ;;  %v2135_v42 = vld [vmem:[#allocation2 + $0x5f] sm:$0xff] }
 0x189   : > { %v809_v48 = vmul.f32 %v768_v43, %v291_v36  ;;  %v720_v49 = vadd.f32 %v7048_v58, %v719_v47  ;;  %5818 = vmatmul.mubr.bf16.gmra.mxu1 %v918_v44  ;;  %v6711_v36 = vld [vmem:[%s8554_s3 + $0x160] sm:$0xff]   ;;  %v2170_v38 = vpack.c.bf16 %v2133_v1, %v2132_v37  ;;  %v6706_v39 = vld [vmem:[%s8554_s3 + $0x108] sm:$0xff]   ;;  %v6713_v43 = vld [vmem:[%s8554_s3 + $0x150] sm:$0xff]  }
 0x18a   : > { %5918 = vmatmul.mubr.bf16.gmra.mxu0 %v1285_v46  ;;  %v5724_v51 = vpop.f32.mrf.mxu0  ;;  %5821 = vmatprep.mubr.msk.bf16.mxu1 %vm6795_vm0, %v7138_v32  ;;  %v897_v57 = vld [vmem:[#allocation2 + $0x135] sm:$0xff]  ;;  %v6710_v41 = vld [vmem:[%s8554_s3 + $0x100] sm:$0xff]  }
 0x18b   : > { %5921 = vmatprep.mubr.msk.bf16.mxu0 %vm6795_vm0, %v7138_v32  ;;  %856 = vst [vmem:[#allocation2 + $0x148] sm:$0xff] %v809_v48  ;;  %v769_v52 = vmax.f32 %v720_v49, 0.0  ;;  %v1264_v60 = vld [vmem:[#allocation2 + $0x136] sm:$0xff]  ;;  %v6714_v49 = vld [vmem:[%s8554_s3 + $0x148] sm:$0xff]  }
 0x18c   : > { %v724_v53 = vpop.f32.mrf.mxu0  ;;  %v2134_v44 = vld [vmem:[#allocation2 + $0x57] sm:$0xff] }
 0x18d   : > { %v810_v54 = vmul.f32 %v769_v52, %v292_v50  ;;  %v725_v56 = vadd.f32 %v7048_v58, %v724_v53  ;;  %v2171_v46 = vpack.c.bf16 %v2135_v42, %v2134_v44  ;;  %v2137_v53 = vld [vmem:[#allocation2 + $0x6f] sm:$0xff]  ;;  %v2142_v37 = vld [vmem:[#allocation2 + $0x97] sm:$0xff] }
 0x18e   : > { %v898_v59 = vld [vmem:[#allocation2 + $0x13d] sm:$0xff]  ;;  %v5727_v62 = vpop.f32.mrf.mxu0 }
 0x18f   : > { %v1265_v61 = vld [vmem:[#allocation2 + $0x13e] sm:$0xff]  ;;  %857 = vst [vmem:[#allocation2 + $0x150] sm:$0xff] %v810_v54  ;;  %v770_v63 = vmax.f32 %v725_v56, 0.0  ;;  %v919_v0 = vpack.c.bf16 %v898_v59, %v897_v57  ;;  %v2136_v59 = vld [vmem:[#allocation2 + $0x67] sm:$0xff] }
 0x190   : > { %v1286_v2 = vpack.c.bf16 %v1265_v61, %v1264_v60  ;;  %v727_v3 = vpop.f32.mrf.mxu0  ;;  %v6715_v56 = vld [vmem:[%s8554_s3 + $0x140] sm:$0xff]   ;;  %v2172_v62 = vpack.c.bf16 %v2137_v53, %v2136_v59 }
 0x191   : > { %v811_v4 = vmul.f32 %v770_v63, %v293_v55  ;;  %5822 = vmatmul.mubr.bf16.gmra.mxu1 %v919_v0 }
 0x192   : > { %5922 = vmatmul.mubr.bf16.gmra.mxu0 %v1286_v2  ;;  %5825 = vmatprep.mubr.msk.bf16.mxu1 %vm6795_vm0, %v7138_v32  ;;  %v5728_v58 = vpop.f32.mrf.mxu0  ;;  %v899_v5 = vld [vmem:[#allocation2 + $0x145] sm:$0xff] }
 0x193   : > { %5925 = vmatprep.mubr.msk.bf16.mxu0 %vm6795_vm0, %v7138_v32  ;;  %858 = vst [vmem:[#allocation2 + $0x158] sm:$0xff] %v811_v4  ;;  %v1266_v6 = vld [vmem:[#allocation2 + $0x146] sm:$0xff]  ;;  %v920_v9 = vpack.c.bf16 %v899_v5, %v899_v5 }
 0x194   : > { %v7337_v7 = vpop.f32.mrf.mxu0  ;;  %v1287_v10 = vpack.c.bf16 %v1266_v6, %v1266_v6  ;;  %v2139_v58 = vld [vmem:[#allocation2 + $0x7f] sm:$0xff] }
 0x196   : > { %v5847_v8 = vpop.f32.mrf.mxu0 }
 0x198   : > { %v7339_v11 = vpop.f32.mrf.mxu0 }
 0x199   : > { %5826 = vmatmul.mubr.bf16.gmra.mxu1 %v920_v9  ;;  %v2138_v9 = vld [vmem:[#allocation2 + $0x77] sm:$0xff] }
 0x19a   : > { %5926 = vmatmul.mubr.bf16.gmra.mxu0 %v1287_v10  ;;  %5945 = vmatprep.mubr.msk.bf16.mxu1 %vm6795_vm0, %v7138_v32  ;;  %v5848_v14 = vpop.f32.mrf.mxu0  ;;  %v2173_v13 = vpack.c.bf16 %v2139_v58, %v2138_v9  ;;  %v2146_v58 = vld [vmem:[#allocation2 + $0xb7] sm:$0xff] }
 0x19b   : > { %6045 = vmatprep.mubr.msk.bf16.mxu0 %vm6795_vm0, %v7138_v32 }
 0x1a1   : > { %5946 = vmatmul.mubr.bf16.vlgmr.msra.gmra.mxu1 %v1717_v16 }
 0x1a2   : > { %6046 = vmatmul.mubr.bf16.vlgmr.msra.gmra.mxu0 %v2167_v19  ;;  %6130 = vmatpush3.bf16.msra.mxu1 %v6700_v18 }
 0x1a3   : > { %5949 = vmatprep.mubr.msk.bf16.mxu1 %vm6795_vm0, %v7138_v32  ;;  %6049 = vmatprep.mubr.msk.bf16.mxu0 %vm6795_vm0, %v7138_v32 }
 0x1a4   : > { %6131 = vmatprep.subr.bf16.mxu1 %v7138_v32  ;;  %6230 = vmatpush3.bf16.msra.mxu0 %v6707_v25 }
 0x1a5   : > { %6231 = vmatprep.subr.bf16.mxu0 %v7138_v32 }
 0x1a6   : > { %6132 = vmatpush3.bf16.msra.mxu1 %v6701_v20  ;;  %v2141_v20 = vld [vmem:[#allocation2 + $0x8f] sm:$0xff] }
 0x1a7   : > { %6133 = vmatprep.subr.bf16.mxu1 %v7138_v32 }
 0x1a8   : > { %6232 = vmatpush3.bf16.msra.mxu0 %v6708_v28 }
 0x1a9   : > { %5950 = vmatmul.mubr.bf16.gmra.mxu1 %v2167_v19  ;;  %6233 = vmatprep.subr.bf16.mxu0 %v7138_v32 }
 0x1aa   : > { %6050 = vmatmul.mubr.bf16.gmra.mxu0 %v2168_v23  ;;  %5953 = vmatprep.mubr.msk.bf16.mxu1 %vm6795_vm0, %v7138_v32 }
 0x1ab   : > { %6053 = vmatprep.mubr.msk.bf16.mxu0 %vm6795_vm0, %v7138_v32  ;;  %6134 = vmatpush3.bf16.msra.mxu1 %v6702_v24  ;;  %v2140_v24 = vld [vmem:[#allocation2 + $0x87] sm:$0xff] }
 0x1ac   : > { %6135 = vmatprep.subr.bf16.mxu1 %v7138_v32  ;;  %6234 = vmatpush3.bf16.msra.mxu0 %v6709_v34  ;;  %v2174_v27 = vpack.c.bf16 %v2141_v20, %v2140_v24  ;;  %v2143_v34 = vld [vmem:[#allocation2 + $0x9f] sm:$0xff] }
 0x1ad   : > { %6235 = vmatprep.subr.bf16.mxu0 %v7138_v32 }
 0x1af   : > { %6136 = vmatpush3.bf16.msra.mxu1 %v6703_v26 }
 0x1b0   : > { %6137 = vmatprep.subr.bf16.mxu1 %v7138_v32  ;;  %6236 = vmatpush3.bf16.msra.mxu0 %v6711_v36 }
 0x1b1   : > { %5954 = vmatmul.mubr.bf16.gmra.mxu1 %v2168_v23  ;;  %6237 = vmatprep.subr.bf16.mxu0 %v7138_v32 }
 0x1b2   : > { %6054 = vmatmul.mubr.bf16.gmra.mxu0 %v2169_v30  ;;  %5957 = vmatprep.mubr.msk.bf16.mxu1 %vm6795_vm0, %v7138_v32 }
 0x1b3   : > { %6057 = vmatprep.mubr.msk.bf16.mxu0 %vm6795_vm0, %v7138_v32  ;;  %6138 = vmatpush3.bf16.msra.mxu1 %v6704_v33 }
 0x1b4   : > { %6139 = vmatprep.subr.bf16.mxu1 %v7138_v32  ;;  %6238 = vmatpush3.bf16.msra.mxu0 %v6712_v40  ;;  %v2175_v40 = vpack.c.bf16 %v2143_v34, %v2142_v37  ;;  %v2151_v34 = vld [vmem:[#allocation2 + $0xdf] sm:$0xff] }
 0x1b5   : > { %6239 = vmatprep.subr.bf16.mxu0 %v7138_v32 }
 0x1b7   : > { %6140 = vmatpush3.bf16.msra.mxu1 %v6705_v35 }
 0x1b8   : > { %6141 = vmatprep.subr.bf16.mxu1 %v7138_v32  ;;  %6240 = vmatpush3.bf16.msra.mxu0 %v6713_v43 }
 0x1b9   : > { %5958 = vmatmul.mubr.bf16.gmra.mxu1 %v2169_v30  ;;  %6241 = vmatprep.subr.bf16.mxu0 %v7138_v32 }
 0x1ba   : > { %6058 = vmatmul.mubr.bf16.gmra.mxu0 %v2170_v38  ;;  %5961 = vmatprep.mubr.msk.bf16.mxu1 %vm6795_vm0, %v7138_v32 }
 0x1bb   : > { %6061 = vmatprep.mubr.msk.bf16.mxu0 %vm6795_vm0, %v7138_v32  ;;  %6142 = vmatpush3.bf16.msra.mxu1 %v6706_v39 }
 0x1bc   : > { %6143 = vmatprep.subr.bf16.mxu1 %v7138_v32  ;;  %6242 = vmatpush3.bf16.msra.mxu0 %v6714_v49 }
 0x1bd   : > { %6243 = vmatprep.subr.bf16.mxu0 %v7138_v32 }
 0x1bf   : > { %6144 = vmatpush3.bf16.msra.mxu1 %v6710_v41 }
 0x1c0   : > { %6329 = vmatprep.subr.bf16.mxu1 %v7138_v32  ;;  %6244 = vmatpush3.bf16.msra.mxu0 %v6715_v56 }
 0x1c1   : > { %v1027_v47 = vpop.f32.mrf.mxu1  ;;  %5962 = vmatmul.mubr.bf16.gmra.mxu1 %v2170_v38  ;;  %6429 = vmatprep.subr.bf16.mxu0 %v7138_v32 }
 0x1c2   : > { %v1395_v48 = vpop.f32.mrf.mxu0  ;;  %6062 = vmatmul.mubr.bf16.gmra.mxu0 %v2171_v46  ;;  %5965 = vmatprep.mubr.msk.bf16.mxu1 %vm6795_vm0, %v7138_v32 }
 0x1c3   : > { %v7420_v50 = vadd.f32 %v1395_v48, %v1027_v47  ;;  %6065 = vmatprep.mubr.msk.bf16.mxu0 %vm6795_vm0, %v7138_v32  ;;  %v5751_v51 = vpop.f32.mrf.mxu1  ;;  %v2145_v47 = vld [vmem:[#allocation2 + $0xaf] sm:$0xff] }
 0x1c4   : > { %v5851_v52 = vpop.f32.mrf.mxu0 }
 0x1c5   : > { %v1030_v54 = vpop.f32.mrf.mxu1  ;;  %v2144_v52 = vld [vmem:[#allocation2 + $0xa7] sm:$0xff] }
 0x1c6   : > { %v1398_v55 = vpop.f32.mrf.mxu0 }
 0x1c7   : > { %v7430_v57 = vadd.f32 %v1398_v55, %v1030_v54  ;;  %v5752_v60 = vpop.f32.mrf.mxu1  ;;  %v2176_v55 = vpack.c.bf16 %v2145_v47, %v2144_v52 }
 0x1c8   : > { %v5852_v61 = vpop.f32.mrf.mxu0 }
 0x1c9   : > { %v1035_v63 = vpop.f32.mrf.mxu1  ;;  %5966 = vmatmul.mubr.bf16.gmra.mxu1 %v2171_v46 }
 0x1ca   : > { %v1403_v0 = vpop.f32.mrf.mxu0  ;;  %6066 = vmatmul.mubr.bf16.gmra.mxu0 %v2172_v62  ;;  %5969 = vmatprep.mubr.msk.bf16.mxu1 %vm6795_vm0, %v7138_v32 }
 0x1cb   : > { %v7433_v2 = vadd.f32 %v1403_v0, %v1035_v63  ;;  %6069 = vmatprep.mubr.msk.bf16.mxu0 %vm6795_vm0, %v7138_v32  ;;  %v5755_v3 = vpop.f32.mrf.mxu1  ;;  %v2147_v63 = vld [vmem:[#allocation2 + $0xbf] sm:$0xff] }
 0x1cc   : > { %v5855_v4 = vpop.f32.mrf.mxu0  ;;  %v2177_v9 = vpack.c.bf16 %v2147_v63, %v2146_v58 }
 0x1cd   : > { %v1038_v5 = vpop.f32.mrf.mxu1 }
 0x1ce   : > { %v1406_v6 = vpop.f32.mrf.mxu0 }
 0x1cf   : > { %v7439_v8 = vadd.f32 %v1406_v6, %v1038_v5  ;;  %v5756_v10 = vpop.f32.mrf.mxu1 }
 0x1d0   : > { %v5856_v12 = vpop.f32.mrf.mxu0 }
 0x1d1   : > { %v1043_v14 = vpop.f32.mrf.mxu1  ;;  %5970 = vmatmul.mubr.bf16.gmra.mxu1 %v2172_v62 }
 0x1d2   : > { %v1411_v15 = vpop.f32.mrf.mxu0  ;;  %6070 = vmatmul.mubr.bf16.gmra.mxu0 %v2173_v13  ;;  %5973 = vmatprep.mubr.msk.bf16.mxu1 %vm6795_vm0, %v7138_v32 }
 0x1d3   : > { %v7441_v16 = vadd.f32 %v1411_v15, %v1043_v14  ;;  %6073 = vmatprep.mubr.msk.bf16.mxu0 %vm6795_vm0, %v7445_v17  ;;  %v5759_v18 = vpop.f32.mrf.mxu1 }
 0x1d4   : > { %v5859_v19 = vpop.f32.mrf.mxu0  ;;  %v2149_v18 = vld [vmem:[#allocation2 + $0xcf] sm:$0xff] }
 0x1d5   : > { %v1046_v21 = vpop.f32.mrf.mxu1 }
 0x1d6   : > { %v1414_v22 = vpop.f32.mrf.mxu0 }
 0x1d7   : > { %v7449_v23 = vadd.f32 %v1414_v22, %v1046_v21  ;;  %v5760_v25 = vpop.f32.mrf.mxu1  ;;  %v2148_v22 = vld [vmem:[#allocation2 + $0xc7] sm:$0xff] }
 0x1d8   : > { %v5860_v26 = vpop.f32.mrf.mxu0 }
 0x1d9   : > { %v1051_v28 = vpop.f32.mrf.mxu1  ;;  %5974 = vmatmul.mubr.bf16.gmra.mxu1 %v2173_v13  ;;  %v2178_v26 = vpack.c.bf16 %v2149_v18, %v2148_v22 }
 0x1da   : > { %v1419_v29 = vpop.f32.mrf.mxu0  ;;  %6074 = vmatmul.mubr.bf16.gmra.mxu0 %v2174_v27  ;;  %5977 = vmatprep.mubr.msk.bf16.mxu1 %vm6795_vm0, %v7445_v17 }
 0x1db   : > { %v7451_v32 = vadd.f32 %v1419_v29, %v1051_v28  ;;  %6077 = vmatprep.mubr.msk.bf16.mxu0 %vm6795_vm0, %v7445_v17  ;;  %v5763_v30 = vpop.f32.mrf.mxu1 }
 0x1dc   : > { %v5863_v33 = vpop.f32.mrf.mxu0 }
 0x1dd   : > { %v1054_v35 = vpop.f32.mrf.mxu1 }
 0x1de   : > { %v1422_v1 = vpop.f32.mrf.mxu0 }
 0x1df   : > { %v7457_v36 = vadd.f32 %v1422_v1, %v1054_v35  ;;  %v5764_v38 = vpop.f32.mrf.mxu1 }
 0x1e0   : > { %v5864_v39 = vpop.f32.mrf.mxu0  ;;  %v2150_v38 = vld [vmem:[#allocation2 + $0xd7] sm:$0xff] }
 0x1e1   : > { %v1059_v41 = vpop.f32.mrf.mxu1  ;;  %5978 = vmatmul.mubr.bf16.gmra.mxu1 %v2174_v27 }
 0x1e2   : > { %v1427_v42 = vpop.f32.mrf.mxu0  ;;  %6078 = vmatmul.mubr.bf16.gmra.mxu0 %v2175_v40  ;;  %5981 = vmatprep.mubr.msk.bf16.mxu1 %vm6795_vm0, %v7445_v17 }
 0x1e3   : > { %v7459_v43 = vadd.f32 %v1427_v42, %v1059_v41  ;;  %6081 = vmatprep.mubr.msk.bf16.mxu0 %vm6795_vm0, %v7445_v17  ;;  %v5767_v44 = vpop.f32.mrf.mxu1  ;;  %v2179_v41 = vpack.c.bf16 %v2151_v34, %v2150_v38 }
 0x1e4   : > { %v5867_v46 = vpop.f32.mrf.mxu0 }
 0x1e5   : > { %v1062_v48 = vpop.f32.mrf.mxu1 }
 0x1e6   : > { %v1430_v49 = vpop.f32.mrf.mxu0 }
 0x1e7   : > { %v7465_v51 = vadd.f32 %v1430_v49, %v1062_v48  ;;  %v5768_v53 = vpop.f32.mrf.mxu1  ;;  %v2153_v49 = vld [vmem:[#allocation2 + $0xef] sm:$0xff] }
 0x1e8   : > { %v5868_v54 = vpop.f32.mrf.mxu0 }
 0x1e9   : > { %v1067_v56 = vpop.f32.mrf.mxu1  ;;  %5982 = vmatmul.mubr.bf16.gmra.mxu1 %v2175_v40 }
 0x1ea   : > { %v1435_v59 = vpop.f32.mrf.mxu0  ;;  %6082 = vmatmul.mubr.bf16.gmra.mxu0 %v2176_v55  ;;  %5985 = vmatprep.mubr.msk.bf16.mxu1 %vm6795_vm0, %v7445_v17 }
 0x1eb   : > { %v7467_v60 = vadd.f32 %v1435_v59, %v1067_v56  ;;  %6085 = vmatprep.mubr.msk.bf16.mxu0 %vm6795_vm0, %v7445_v17  ;;  %v5771_v61 = vpop.f32.mrf.mxu1 }
 0x1ec   : > { %v5871_v62 = vpop.f32.mrf.mxu0 }
 0x1ed   : > { %v1070_v0 = vpop.f32.mrf.mxu1 }
 0x1ee   : > { %v1438_v3 = vpop.f32.mrf.mxu0 }
 0x1ef   : > { %v7473_v4 = vadd.f32 %v1438_v3, %v1070_v0  ;;  %v5772_v5 = vpop.f32.mrf.mxu1 }
 0x1f0   : > { %v5872_v6 = vpop.f32.mrf.mxu0  ;;  %v2155_v5 = vld [vmem:[#allocation2 + $0xff] sm:$0xff] }
 0x1f1   : > { %v1075_v10 = vpop.f32.mrf.mxu1  ;;  %5986 = vmatmul.mubr.bf16.gmra.mxu1 %v2176_v55  ;;  %v2152_v55 = vld [vmem:[#allocation2 + $0xe7] sm:$0xff] }
 0x1f2   : > { %v1443_v12 = vpop.f32.mrf.mxu0  ;;  %6086 = vmatmul.mubr.bf16.gmra.mxu0 %v2177_v9  ;;  %5989 = vmatprep.mubr.msk.bf16.mxu1 %vm6795_vm0, %v7445_v17  ;;  %v2180_v61 = vpack.c.bf16 %v2153_v49, %v2152_v55 }
 0x1f3   : > { %v7475_v13 = vadd.f32 %v1443_v12, %v1075_v10  ;;  %6089 = vmatprep.mubr.msk.bf16.mxu0 %vm6795_vm0, %v7445_v17  ;;  %v5775_v14 = vpop.f32.mrf.mxu1  ;;  %v2154_v12 = vld [vmem:[#allocation2 + $0xf7] sm:$0xff] }
 0x1f4   : > { %v5875_v15 = vpop.f32.mrf.mxu0  ;;  %v2181_v18 = vpack.c.bf16 %v2155_v5, %v2154_v12  ;;  %v2160_v12 = vld [vmem:[#allocation2 + $0x127] sm:$0xff] }
 0x1f5   : > { %v1078_v19 = vpop.f32.mrf.mxu1 }
 0x1f6   : > { %v1446_v20 = vpop.f32.mrf.mxu0 }
 0x1f7   : > { %v7481_v21 = vadd.f32 %v1446_v20, %v1078_v19  ;;  %v5776_v24 = vpop.f32.mrf.mxu1 }
 0x1f8   : > { %v5876_v25 = vpop.f32.mrf.mxu0 }
 0x1f9   : > { %v1083_v27 = vpop.f32.mrf.mxu1  ;;  %5990 = vmatmul.mubr.bf16.gmra.mxu1 %v2177_v9 }
 0x1fa   : > { %v1451_v28 = vpop.f32.mrf.mxu0  ;;  %6090 = vmatmul.mubr.bf16.gmra.mxu0 %v2178_v26  ;;  %5993 = vmatprep.mubr.msk.bf16.mxu1 %vm6795_vm0, %v7445_v17 }
 0x1fb   : > { %v7483_v29 = vadd.f32 %v1451_v28, %v1083_v27  ;;  %6093 = vmatprep.mubr.msk.bf16.mxu0 %vm6795_vm0, %v7445_v17  ;;  %v5779_v30 = vpop.f32.mrf.mxu1 }
 0x1fc   : > { %v5879_v33 = vpop.f32.mrf.mxu0 }
 0x1fd   : > { %v1086_v35 = vpop.f32.mrf.mxu1  ;;  %v2156_v33 = vld [vmem:[#allocation2 + $0x107] sm:$0xff] }
 0x1fe   : > { %v1454_v1 = vpop.f32.mrf.mxu0 }
 0x1ff   : > { %v7489_v37 = vadd.f32 %v1454_v1, %v1086_v35  ;;  %v5780_v39 = vpop.f32.mrf.mxu1 }
 0x200   : > { %v5880_v40 = vpop.f32.mrf.mxu0 }
 0x201   : > { %v1091_v42 = vpop.f32.mrf.mxu1  ;;  %5994 = vmatmul.mubr.bf16.gmra.mxu1 %v2178_v26  ;;  %v2157_v26 = vld [vmem:[#allocation2 + $0x10f] sm:$0xff] }
 0x202   : > { %v1459_v44 = vpop.f32.mrf.mxu0  ;;  %6094 = vmatmul.mubr.bf16.gmra.mxu0 %v2179_v41  ;;  %5997 = vmatprep.mubr.msk.bf16.mxu1 %vm6795_vm0, %v7445_v17  ;;  %v2182_v1 = vpack.c.bf16 %v2157_v26, %v2156_v33 }
 0x203   : > { %v7491_v46 = vadd.f32 %v1459_v44, %v1091_v42  ;;  %6097 = vmatprep.mubr.msk.bf16.mxu0 %vm6795_vm0, %v7445_v17  ;;  %v5783_v47 = vpop.f32.mrf.mxu1  ;;  %v2159_v44 = vld [vmem:[#allocation2 + $0x11f] sm:$0xff] }
 0x204   : > { %v5883_v48 = vpop.f32.mrf.mxu0 }
 0x205   : > { %v1094_v52 = vpop.f32.mrf.mxu1 }
 0x206   : > { %v1462_v53 = vpop.f32.mrf.mxu0 }
 0x207   : > { %v7497_v54 = vadd.f32 %v1462_v53, %v1094_v52  ;;  %v5784_v56 = vpop.f32.mrf.mxu1  ;;  %v2158_v52 = vld [vmem:[#allocation2 + $0x117] sm:$0xff] }
 0x208   : > { %v5884_v59 = vpop.f32.mrf.mxu0  ;;  %v2183_v56 = vpack.c.bf16 %v2159_v44, %v2158_v52  ;;  %v2165_v52 = vld [vmem:[#allocation2 + $0x14f] sm:$0xff] }
 0x209   : > { %v1099_v62 = vpop.f32.mrf.mxu1  ;;  %5998 = vmatmul.mubr.bf16.gmra.mxu1 %v2179_v41 }
 0x20a   : > { %v1467_v63 = vpop.f32.mrf.mxu0  ;;  %6098 = vmatmul.mubr.bf16.gmra.mxu0 %v2180_v61  ;;  %6001 = vmatprep.mubr.msk.bf16.mxu1 %vm6795_vm0, %v7445_v17 }
 0x20b   : > { %v7499_v0 = vadd.f32 %v1467_v63, %v1099_v62  ;;  %6101 = vmatprep.mubr.msk.bf16.mxu0 %vm6795_vm0, %v7445_v17  ;;  %v5787_v3 = vpop.f32.mrf.mxu1 }
 0x20c   : > { %v5887_v58 = vpop.f32.mrf.mxu0 }
 0x20d   : > { %v1102_v6 = vpop.f32.mrf.mxu1  ;;  %v2161_v58 = vld [vmem:[#allocation2 + $0x12f] sm:$0xff] }
 0x20e   : > { %v1470_v9 = vpop.f32.mrf.mxu0 }
 0x20f   : > { %v7505_v10 = vadd.f32 %v1470_v9, %v1102_v6  ;;  %v5788_v14 = vpop.f32.mrf.mxu1 }
 0x210   : > { %v5888_v15 = vpop.f32.mrf.mxu0 }
 0x211   : > { %v1107_v19 = vpop.f32.mrf.mxu1  ;;  %6002 = vmatmul.mubr.bf16.gmra.mxu1 %v2180_v61 }
 0x212   : > { %v1475_v20 = vpop.f32.mrf.mxu0  ;;  %6102 = vmatmul.mubr.bf16.gmra.mxu0 %v2181_v18  ;;  %6005 = vmatprep.mubr.msk.bf16.mxu1 %vm6795_vm0, %v7445_v17 }
 0x213   : > { %v7507_v22 = vadd.f32 %v1475_v20, %v1107_v19  ;;  %6105 = vmatprep.mubr.msk.bf16.mxu0 %vm6795_vm0, %v7445_v17  ;;  %v5791_v24 = vpop.f32.mrf.mxu1 }
 0x214   : > { %v5891_v25 = vpop.f32.mrf.mxu0 }
 0x215   : > { %v1110_v27 = vpop.f32.mrf.mxu1 }
 0x216   : > { %v1478_v28 = vpop.f32.mrf.mxu0 }
 0x217   : > { %v7513_v30 = vadd.f32 %v1478_v28, %v1110_v27  ;;  %v5792_v34 = vpop.f32.mrf.mxu1  ;;  %v2163_v27 = vld [vmem:[#allocation2 + $0x13f] sm:$0xff] }
 0x218   : > { %v5892_v35 = vpop.f32.mrf.mxu0 }
 0x219   : > { %v1115_v38 = vpop.f32.mrf.mxu1  ;;  %6006 = vmatmul.mubr.bf16.gmra.mxu1 %v2181_v18  ;;  %v2184_v18 = vpack.c.bf16 %v2161_v58, %v2160_v12  ;;  %v2162_v35 = vld [vmem:[#allocation2 + $0x137] sm:$0xff] }
 0x21a   : > { %v1483_v39 = vpop.f32.mrf.mxu0  ;;  %6106 = vmatmul.mubr.bf16.gmra.mxu0 %v2182_v1  ;;  %6009 = vmatprep.mubr.msk.bf16.mxu1 %vm6795_vm0, %v7445_v17 }
 0x21b   : > { %v7515_v40 = vadd.f32 %v1483_v39, %v1115_v38  ;;  %6109 = vmatprep.mubr.msk.bf16.mxu0 %vm6795_vm0, %v7445_v17  ;;  %v5795_v41 = vpop.f32.mrf.mxu1  ;;  %v2185_v39 = vpack.c.bf16 %v2163_v27, %v2162_v35 }
 0x21c   : > { %v5895_v42 = vpop.f32.mrf.mxu0 }
 0x21d   : > { %v1118_v47 = vpop.f32.mrf.mxu1 }
 0x21e   : > { %v1486_v48 = vpop.f32.mrf.mxu0 }
 0x21f   : > { %v7521_v49 = vadd.f32 %v1486_v48, %v1118_v47  ;;  %v5796_v53 = vpop.f32.mrf.mxu1 }
 0x220   : > { %v5896_v55 = vpop.f32.mrf.mxu0 }
 0x221   : > { %v1123_v59 = vpop.f32.mrf.mxu1  ;;  %6010 = vmatmul.mubr.bf16.gmra.mxu1 %v2182_v1 }
 0x222   : > { %v1491_v61 = vpop.f32.mrf.mxu0  ;;  %6110 = vmatmul.mubr.bf16.gmra.mxu0 %v2183_v56  ;;  %6013 = vmatprep.mubr.msk.bf16.mxu1 %vm6795_vm0, %v7445_v17 }
 0x223   : > { %v7523_v62 = vadd.f32 %v1491_v61, %v1123_v59  ;;  %6113 = vmatprep.mubr.msk.bf16.mxu0 %vm6795_vm0, %v7445_v17  ;;  %v5799_v63 = vpop.f32.mrf.mxu1  ;;  %v2164_v59 = vld [vmem:[#allocation2 + $0x147] sm:$0xff] }
 0x224   : > { %v5899_v3 = vpop.f32.mrf.mxu0  ;;  %v1737_v27 = vpack.c.bf16 %v2164_v59, %v2164_v59 }
 0x225   : > { %v1126_v5 = vpop.f32.mrf.mxu1  ;;  %v2186_v3 = vpack.c.bf16 %v2165_v52, %v2164_v59  ;;  %v6716_v59 = vld [vmem:[%s8554_s3 + $0x1b8] sm:$0xff]  }
 0x226   : > { %v1494_v6 = vpop.f32.mrf.mxu0 }
 0x227   : > { %v7529_v9 = vadd.f32 %v1494_v6, %v1126_v5  ;;  %v5800_v14 = vpop.f32.mrf.mxu1 }
 0x228   : > { %v5900_v15 = vpop.f32.mrf.mxu0 }
 0x229   : > { %v1131_v19 = vpop.f32.mrf.mxu1  ;;  %6014 = vmatmul.mubr.bf16.gmra.mxu1 %v2183_v56  ;;  %v2166_v15 = vld [vmem:[#allocation2 + $0x157] sm:$0xff] }
 0x22a   : > { %v1499_v20 = vpop.f32.mrf.mxu0  ;;  %6114 = vmatmul.mubr.bf16.gmra.mxu0 %v2184_v18  ;;  %6017 = vmatprep.mubr.msk.bf16.mxu1 %vm6795_vm0, %v7445_v17 }
 0x22b   : > { %v7531_v24 = vadd.f32 %v1499_v20, %v1131_v19  ;;  %6117 = vmatprep.mubr.msk.bf16.mxu0 %vm6795_vm0, %v7445_v17  ;;  %v5803_v25 = vpop.f32.mrf.mxu1 }
 0x22c   : > { %v5903_v26 = vpop.f32.mrf.mxu0 }
 0x22d   : > { %v1134_v28 = vpop.f32.mrf.mxu1 }
 0x22e   : > { %v1502_v33 = vpop.f32.mrf.mxu0 }
 0x22f   : > { %v7537_v34 = vadd.f32 %v1502_v33, %v1134_v28  ;;  %v5804_v1 = vpop.f32.mrf.mxu1  ;;  %v2187_v28 = vpack.c.bf16 %v2166_v15, %v2166_v15  ;;  %v6717_v15 = vld [vmem:[%s8554_s3 + $0x1b0] sm:$0xff]  }
 0x230   : > { %v5904_v38 = vpop.f32.mrf.mxu0 }
 0x231   : > { %v1139_v41 = vpop.f32.mrf.mxu1  ;;  %6018 = vmatmul.mubr.bf16.gmra.mxu1 %v2184_v18 }
 0x232   : > { %v1507_v42 = vpop.f32.mrf.mxu0  ;;  %6118 = vmatmul.mubr.bf16.gmra.mxu0 %v2185_v39  ;;  %6021 = vmatprep.mubr.msk.bf16.mxu1 %vm6795_vm0, %v7445_v17 }
 0x233   : > { %v7539_v44 = vadd.f32 %v1507_v42, %v1139_v41  ;;  %6121 = vmatprep.mubr.msk.bf16.mxu0 %vm6795_vm0, %v7445_v17  ;;  %v5807_v47 = vpop.f32.mrf.mxu1  ;;  %v2577_v41 = vld [vmem:[#allocation2 + $0x20] sm:$0xff] }
 0x234   : > { %v5907_v48 = vpop.f32.mrf.mxu0  ;;  %v3027_v42 = vld [vmem:[#allocation2 + $0x21] sm:$0xff] }
 0x235   : > { %v1142_v53 = vpop.f32.mrf.mxu1 }
 0x236   : > { %v1510_v55 = vpop.f32.mrf.mxu0 }
 0x237   : > { %v7545_v56 = vadd.f32 %v1510_v55, %v1142_v53  ;;  %v5808_v61 = vpop.f32.mrf.mxu1  ;;  %v2576_v53 = vld [vmem:[#allocation2 + $0x18] sm:$0xff] }
 0x238   : > { %v5908_v63 = vpop.f32.mrf.mxu0  ;;  %v3026_v55 = vld [vmem:[#allocation2 + $0x19] sm:$0xff] }
 0x239   : > { %v1147_v58 = vpop.f32.mrf.mxu1  ;;  %6022 = vmatmul.mubr.bf16.gmra.mxu1 %v2185_v39 }
 0x23a   : > { %v1515_v5 = vpop.f32.mrf.mxu0  ;;  %6122 = vmatmul.mubr.bf16.gmra.mxu0 %v2186_v3  ;;  %6025 = vmatprep.mubr.msk.bf16.mxu1 %vm6795_vm0, %v7445_v17  ;;  %v2617_v3 = vpack.c.bf16 %v2577_v41, %v2576_v53 }
 0x23b   : > { %v7547_v6 = vadd.f32 %v1515_v5, %v1147_v58  ;;  %6125 = vmatprep.mubr.msk.bf16.mxu0 %vm6795_vm0, %v7445_v17  ;;  %v5811_v12 = vpop.f32.mrf.mxu1  ;;  %v3067_v58 = vpack.c.bf16 %v3027_v42, %v3026_v55 }
 0x23c   : > { %v5911_v14 = vpop.f32.mrf.mxu0 }
 0x23d   : > { %v1150_v18 = vpop.f32.mrf.mxu1 }
 0x23e   : > { %v1518_v19 = vpop.f32.mrf.mxu0 }
 0x23f   : > { %v7553_v20 = vadd.f32 %v1518_v19, %v1150_v18  ;;  %v5812_v25 = vpop.f32.mrf.mxu1 }
 0x240   : > { %v5912_v26 = vpop.f32.mrf.mxu0  ;;  %v2579_v25 = vld [vmem:[#allocation2 + $0x30] sm:$0xff] }
 0x241   : > { %v1155_v33 = vpop.f32.mrf.mxu1  ;;  %6026 = vmatmul.mubr.bf16.gmra.mxu1 %v1737_v27  ;;  %v3029_v26 = vld [vmem:[#allocation2 + $0x31] sm:$0xff] }
 0x242   : > { %v1523_v35 = vpop.f32.mrf.mxu0  ;;  %6126 = vmatmul.mubr.bf16.gmra.mxu0 %v2187_v28  ;;  %6145 = vmatprep.mubr.msk.bf16.mxu1 %vm6795_vm0, %v7445_v17 }
 0x243   : > { %v7555_v1 = vadd.f32 %v1523_v35, %v1155_v33  ;;  %6245 = vmatprep.mubr.msk.bf16.mxu0 %vm6795_vm0, %v7445_v17  ;;  %v5815_v38 = vpop.f32.mrf.mxu1  ;;  %v2578_v35 = vld [vmem:[#allocation2 + $0x28] sm:$0xff] }
 0x244   : > { %v5915_v39 = vpop.f32.mrf.mxu0  ;;  %v3028_v38 = vld [vmem:[#allocation2 + $0x29] sm:$0xff]  ;;  %v2618_v42 = vpack.c.bf16 %v2579_v25, %v2578_v35  ;;  %v2580_v25 = vld [vmem:[#allocation2 + $0x38] sm:$0xff] }
 0x245   : > { %v1158_v47 = vpop.f32.mrf.mxu1 }
 0x246   : > { %v1526_v48 = vpop.f32.mrf.mxu0 }
 0x247   : > { %v7561_v52 = vadd.f32 %v1526_v48, %v1158_v47  ;;  %v5816_v61 = vpop.f32.mrf.mxu1  ;;  %v7578_v47 = vpack.c.bf16 %v3029_v26, %v3028_v38  ;;  %v6718_v48 = vld [vmem:[%s8554_s3 + $0x1a8] sm:$0xff]   ;;  %v3030_v26 = vld [vmem:[#allocation2 + $0x39] sm:$0xff] }
 0x248   : > { %v5916_v63 = vpop.f32.mrf.mxu0  ;;  %v6723_v61 = vld [vmem:[%s8554_s3 + $0x1f8] sm:$0xff]  }
 0x249   : > { %v1163_v5 = vpop.f32.mrf.mxu1  ;;  %6146 = vmatmul.mubr.bf16.vlgmr.msra.gmra.mxu1 %v2617_v3 }
 0x24a   : > { %v1531_v12 = vpop.f32.mrf.mxu0  ;;  %6246 = vmatmul.mubr.bf16.vlgmr.msra.gmra.mxu0 %v3067_v58  ;;  %6330 = vmatpush3.bf16.msra.mxu1 %v6716_v59  ;;  %v6719_v58 = vld [vmem:[%s8554_s3 + $0x1a0] sm:$0xff]  }
 0x24b   : > { %v7566_v14 = vadd.f32 %v1531_v12, %v1163_v5  ;;  %6149 = vmatprep.mubr.msk.bf16.mxu1 %vm6795_vm0, %v7445_v17  ;;  %v5819_v18 = vpop.f32.mrf.mxu1  ;;  %6249 = vmatprep.mubr.msk.bf16.mxu0 %vm6795_vm0, %v7445_v17  ;;  %v2581_v5 = vld [vmem:[#allocation2 + $0x40] sm:$0xff] }
 0x24c   : > { %v5919_v19 = vpop.f32.mrf.mxu0  ;;  %6331 = vmatprep.subr.bf16.mxu1 %v7445_v17  ;;  %v3031_v12 = vld [vmem:[#allocation2 + $0x41] sm:$0xff]  ;;  %6430 = vmatpush3.bf16.msra.mxu0 %v6723_v61  ;;  %v2619_v38 = vpack.c.bf16 %v2581_v5, %v2580_v25  ;;  %v3033_v5 = vld [vmem:[#allocation2 + $0x51] sm:$0xff]  ;;  %v3032_v25 = vld [vmem:[#allocation2 + $0x49] sm:$0xff] }
 0x24d   : > { %v1166_v27 = vpop.f32.mrf.mxu1  ;;  %6431 = vmatprep.subr.bf16.mxu0 %v7445_v17 }
 0x24e   : > { %v1534_v28 = vpop.f32.mrf.mxu0  ;;  %6332 = vmatpush3.bf16.msra.mxu1 %v6717_v15 }
 0x24f   : > { %v7576_v33 = vadd.f32 %v1534_v28, %v1166_v27  ;;  %v5820_v39 = vpop.f32.mrf.mxu1  ;;  %6333 = vmatprep.subr.bf16.mxu1 %v7445_v17  ;;  %v6724_v27 = vld [vmem:[%s8554_s3 + $0x1f0] sm:$0xff]  }
 0x250   : > { %v5920_v41 = vpop.f32.mrf.mxu0  ;;  %v7604_v39 = vpack.c.bf16 %v3031_v12, %v3030_v26  ;;  %6432 = vmatpush3.bf16.msra.mxu0 %v6724_v27  ;;  %v6727_v26 = vld [vmem:[%s8554_s3 + $0x1e0] sm:$0xff]  }
 0x251   : > { %v1171_v53 = vpop.f32.mrf.mxu1  ;;  %6150 = vmatmul.mubr.bf16.gmra.mxu1 %v2618_v42  ;;  %v6720_v41 = vld [vmem:[%s8554_s3 + $0x198] sm:$0xff]   ;;  %6433 = vmatprep.subr.bf16.mxu0 %v7445_v17 }
 0x252   : > { %v1539_v55 = vpop.f32.mrf.mxu0  ;;  %6250 = vmatmul.mubr.bf16.gmra.mxu0 %v7578_v47  ;;  %6153 = vmatprep.mubr.msk.bf16.mxu1 %vm6795_vm0, %v7445_v17 }
 0x253   : > { %v7585_v59 = vadd.f32 %v1539_v55, %v1171_v53  ;;  %6253 = vmatprep.mubr.msk.bf16.mxu0 %vm6795_vm0, %v7445_v17  ;;  %v5823_v63 = vpop.f32.mrf.mxu1  ;;  %6334 = vmatpush3.bf16.msra.mxu1 %v6718_v48  ;;  %v6725_v55 = vld [vmem:[%s8554_s3 + $0x1e8] sm:$0xff]  }
 0x254   : > { %v5923_v3 = vpop.f32.mrf.mxu0  ;;  %6335 = vmatprep.subr.bf16.mxu1 %v7445_v17  ;;  %6434 = vmatpush3.bf16.msra.mxu0 %v6725_v55 }
 0x255   : > { %v1174_v15 = vpop.f32.mrf.mxu1  ;;  %v6721_v3 = vld [vmem:[%s8554_s3 + $0x190] sm:$0xff]   ;;  %6435 = vmatprep.subr.bf16.mxu0 %v7445_v17 }
 0x256   : > { %v1542_v18 = vpop.f32.mrf.mxu0 }
 0x257   : > { %v7599_v19 = vadd.f32 %v1542_v18, %v1174_v15  ;;  %v5824_v28 = vpop.f32.mrf.mxu1  ;;  %6336 = vmatpush3.bf16.msra.mxu1 %v6719_v58  ;;  %v2583_v58 = vld [vmem:[#allocation2 + $0x50] sm:$0xff]  ;;  %v2582_v18 = vld [vmem:[#allocation2 + $0x48] sm:$0xff] }
 0x258   : > { %v5924_v35 = vpop.f32.mrf.mxu0  ;;  %6337 = vmatprep.subr.bf16.mxu1 %v7445_v17  ;;  %6436 = vmatpush3.bf16.msra.mxu0 %v6727_v26 }
 0x259   : > { %v1179_v42 = vpop.f32.mrf.mxu1  ;;  %6154 = vmatmul.mubr.bf16.gmra.mxu1 %v2619_v38  ;;  %v2620_v35 = vpack.c.bf16 %v2583_v58, %v2582_v18  ;;  %v7629_v38 = vpack.c.bf16 %v3033_v5, %v3032_v25  ;;  %6437 = vmatprep.subr.bf16.mxu0 %v7445_v17  ;;  %v1595_v58 = vadd.f32 %v7339_v11, %v7199_v45 }
 0x25a   : > { %v1547_v48 = vpop.f32.mrf.mxu0  ;;  %6254 = vmatmul.mubr.bf16.gmra.mxu0 %v7604_v39  ;;  %6157 = vmatprep.mubr.msk.bf16.mxu1 %vm6795_vm0, %v7445_v17 }
 0x25b   : > { %v7611_v53 = vadd.f32 %v1547_v48, %v1179_v42  ;;  %6257 = vmatprep.mubr.msk.bf16.mxu0 %vm6795_vm0, %v7445_v17  ;;  %v5827_v61 = vpop.f32.mrf.mxu1  ;;  %6338 = vmatpush3.bf16.msra.mxu1 %v6720_v41  ;;  %v6722_v41 = vld [vmem:[%s8554_s3 + $0x188] sm:$0xff]   ;;  %v1594_v42 = vadd.f32 %v7337_v7, %v7193_v31 }
 0x25c   : > { %v5927_v63 = vpop.f32.mrf.mxu0  ;;  %6339 = vmatprep.subr.bf16.mxu1 %v7445_v17 }
 0x25d   : > { %v1182_v12 = vpop.f32.mrf.mxu1  ;;  %v6728_v63 = vld [vmem:[%s8554_s3 + $0x1d8] sm:$0xff]  }
 0x25e   : > { %v1550_v15 = vpop.f32.mrf.mxu0  ;;  %v2585_v12 = vld [vmem:[#allocation2 + $0x60] sm:$0xff]  ;;  %6438 = vmatpush3.bf16.msra.mxu0 %v6728_v63 }
 0x25f   : > { %v5828_v27 = vpop.f32.mrf.mxu1  ;;  %6340 = vmatpush3.bf16.msra.mxu1 %v6721_v3  ;;  %v6726_v3 = vld [vmem:[%s8554_s3 + $0x180] sm:$0xff]   ;;  %6439 = vmatprep.subr.bf16.mxu0 %v7445_v17 }
 0x260   : > { %v5928_v28 = vpop.f32.mrf.mxu0  ;;  %6341 = vmatprep.subr.bf16.mxu1 %v7445_v17  ;;  %v3035_v15 = vld [vmem:[#allocation2 + $0x61] sm:$0xff]  ;;  %v2584_v27 = vld [vmem:[#allocation2 + $0x58] sm:$0xff] }
 0x261   : > { %v1837_v48 = vpop.f32.mrf.mxu1  ;;  %6158 = vmatmul.mubr.bf16.gmra.mxu1 %v2620_v35  ;;  %v3034_v28 = vld [vmem:[#allocation2 + $0x59] sm:$0xff]  ;;  %v6729_v35 = vld [vmem:[%s8554_s3 + $0x1d0] sm:$0xff]   ;;  %v2621_v11 = vpack.c.bf16 %v2585_v12, %v2584_v27 }
 0x262   : > { %v2287_v55 = vpop.f32.mrf.mxu0  ;;  %6258 = vmatmul.mubr.bf16.gmra.mxu0 %v7629_v38  ;;  %v2044_v61 = vadd.f32 %v1837_v48, %v1594_v42  ;;  %6161 = vmatprep.mubr.msk.bf16.mxu1 %vm6795_vm0, %v7445_v17  ;;  %v7658_v42 = vpack.c.bf16 %v3035_v15, %v3034_v28  ;;  %v2587_v12 = vld [vmem:[#allocation2 + $0x70] sm:$0xff]  ;;  %v6731_v28 = vld [vmem:[%s8554_s3 + $0x1c0] sm:$0xff]  }
 0x263   : > { %6261 = vmatprep.mubr.msk.bf16.mxu0 %vm6795_vm0, %v7445_v17  ;;  %v5947_v31 = vpop.f32.mrf.mxu1  ;;  %6342 = vmatpush3.bf16.msra.mxu1 %v6722_v41  ;;  %v3037_v15 = vld [vmem:[#allocation2 + $0x71] sm:$0xff]  ;;  %v3036_v27 = vld [vmem:[#allocation2 + $0x69] sm:$0xff] }
 0x264   : > { %v6047_v7 = vpop.f32.mrf.mxu0  ;;  %v7651_v5 = vadd.f32 %v2287_v55, %v2044_v61  ;;  %6343 = vmatprep.subr.bf16.mxu1 %v7445_v17  ;;  %6440 = vmatpush3.bf16.msra.mxu0 %v6729_v35  ;;  %v6730_v31 = vld [vmem:[%s8554_s3 + $0x1c8] sm:$0xff]  }
 0x265   : > { %v1840_v18 = vpop.f32.mrf.mxu1  ;;  %6441 = vmatprep.subr.bf16.mxu0 %v7445_v17 }
 0x266   : > { %v2290_v25 = vpop.f32.mrf.mxu0  ;;  %v2045_v26 = vadd.f32 %v1840_v18, %v1595_v58 }
 0x267   : > { %v5948_v41 = vpop.f32.mrf.mxu1  ;;  %6344 = vmatpush3.bf16.msra.mxu1 %v6726_v3 }
 0x268   : > { %v6048_v45 = vpop.f32.mrf.mxu0  ;;  %v7660_v48 = vadd.f32 %v2290_v25, %v2045_v26  ;;  %6529 = vmatprep.subr.bf16.mxu1 %v7445_v17  ;;  %6442 = vmatpush3.bf16.msra.mxu0 %v6730_v31  ;;  %v2586_v26 = vld [vmem:[#allocation2 + $0x68] sm:$0xff] }
 0x269   : > { %v1845_v55 = vpop.f32.mrf.mxu1  ;;  %6162 = vmatmul.mubr.bf16.gmra.mxu1 %v2621_v11  ;;  %6443 = vmatprep.subr.bf16.mxu0 %v7445_v17  ;;  %v2622_v45 = vpack.c.bf16 %v2587_v12, %v2586_v26  ;;  %v7680_v11 = vpack.c.bf16 %v3037_v15, %v3036_v27  ;;  %v2589_v12 = vld [vmem:[#allocation2 + $0x80] sm:$0xff]  ;;  %v2588_v26 = vld [vmem:[#allocation2 + $0x78] sm:$0xff] }
 0x26a   : > { %v2295_v61 = vpop.f32.mrf.mxu0  ;;  %6262 = vmatmul.mubr.bf16.gmra.mxu0 %v7658_v42  ;;  %v2046_v63 = vadd.f32 %v1845_v55, %v7420_v50  ;;  %6165 = vmatprep.mubr.msk.bf16.mxu1 %vm6795_vm0, %v7445_v17  ;;  %v3039_v15 = vld [vmem:[#allocation2 + $0x81] sm:$0xff]  ;;  %v3038_v27 = vld [vmem:[#allocation2 + $0x79] sm:$0xff] }
 0x26b   : > { %6265 = vmatprep.mubr.msk.bf16.mxu0 %vm6795_vm0, %v7445_v17  ;;  %v5951_v7 = vpop.f32.mrf.mxu1 }
 0x26c   : > { %v6051_v3 = vpop.f32.mrf.mxu0  ;;  %v7673_v58 = vadd.f32 %v2295_v61, %v2046_v63  ;;  %6444 = vmatpush3.bf16.msra.mxu0 %v6731_v28 }
 0x26d   : > { %v1848_v50 = vpop.f32.mrf.mxu1 }
 0x26e   : > { %v2298_v18 = vpop.f32.mrf.mxu0  ;;  %v2047_v25 = vadd.f32 %v1848_v50, %v7430_v57 }
 0x26f   : > { %v5952_v35 = vpop.f32.mrf.mxu1 }
 0x270   : > { %v6052_v41 = vpop.f32.mrf.mxu0  ;;  %v7682_v55 = vadd.f32 %v2298_v18, %v2047_v25  ;;  %v2623_v35 = vpack.c.bf16 %v2589_v12, %v2588_v26  ;;  %v2591_v12 = vld [vmem:[#allocation2 + $0x90] sm:$0xff]  ;;  %v2590_v26 = vld [vmem:[#allocation2 + $0x88] sm:$0xff] }
 0x271   : > { %v1853_v61 = vpop.f32.mrf.mxu1  ;;  %6166 = vmatmul.mubr.bf16.gmra.mxu1 %v2622_v45  ;;  %v7693_v41 = vpack.c.bf16 %v3039_v15, %v3038_v27  ;;  %v3041_v15 = vld [vmem:[#allocation2 + $0x91] sm:$0xff]  ;;  %v3040_v27 = vld [vmem:[#allocation2 + $0x89] sm:$0xff] }
 0x272   : > { %v2303_v63 = vpop.f32.mrf.mxu0  ;;  %6266 = vmatmul.mubr.bf16.gmra.mxu0 %v7680_v11  ;;  %v2048_v57 = vadd.f32 %v1853_v61, %v7433_v2  ;;  %6169 = vmatprep.mubr.msk.bf16.mxu1 %vm6795_vm0, %v7445_v17 }
 0x273   : > { %6269 = vmatprep.mubr.msk.bf16.mxu0 %vm6795_vm0, %v7445_v17  ;;  %v5955_v31 = vpop.f32.mrf.mxu1 }
 0x274   : > { %v6055_v7 = vpop.f32.mrf.mxu0  ;;  %v7690_v3 = vadd.f32 %v2303_v63, %v2048_v57 }
 0x275   : > { %v1856_v50 = vpop.f32.mrf.mxu1 }
 0x276   : > { %v2306_v18 = vpop.f32.mrf.mxu0  ;;  %v2049_v25 = vadd.f32 %v1856_v50, %v7439_v8 }
 0x277   : > { %v5956_v28 = vpop.f32.mrf.mxu1 }
 0x278   : > { %v6056_v2 = vpop.f32.mrf.mxu0  ;;  %v7695_v45 = vadd.f32 %v2306_v18, %v2049_v25 }
 0x279   : > { %v1861_v61 = vpop.f32.mrf.mxu1  ;;  %6170 = vmatmul.mubr.bf16.gmra.mxu1 %v2623_v35  ;;  %v2624_v2 = vpack.c.bf16 %v2591_v12, %v2590_v26  ;;  %v7706_v35 = vpack.c.bf16 %v3041_v15, %v3040_v27  ;;  %v2593_v12 = vld [vmem:[#allocation2 + $0xa0] sm:$0xff]  ;;  %v2592_v26 = vld [vmem:[#allocation2 + $0x98] sm:$0xff] }
 0x27a   : > { %8558 = vst [vmem:[#allocation4_spill] sm:$0xff] %v7695_v45  ;;  %v2311_v31 = vpop.f32.mrf.mxu0  ;;  %6270 = vmatmul.mubr.bf16.gmra.mxu0 %v7693_v41  ;;  %v2050_v63 = vadd.f32 %v1861_v61, %v7441_v16  ;;  %6173 = vmatprep.mubr.msk.bf16.mxu1 %vm6795_vm0, %v7445_v17  ;;  %v3043_v15 = vld [vmem:[#allocation2 + $0xa1] sm:$0xff]  ;;  %v3042_v27 = vld [vmem:[#allocation2 + $0x99] sm:$0xff] }
 0x27b   : > { %6273 = vmatprep.mubr.msk.bf16.mxu0 %vm6795_vm0, %v7445_v17  ;;  %v5959_v8 = vpop.f32.mrf.mxu1 }
 0x27c   : > { %v6059_v57 = vpop.f32.mrf.mxu0  ;;  %v7703_v7 = vadd.f32 %v2311_v31, %v2050_v63 }
 0x27d   : > { %v1864_v50 = vpop.f32.mrf.mxu1 }
 0x27e   : > { %v2314_v18 = vpop.f32.mrf.mxu0  ;;  %v2051_v25 = vadd.f32 %v1864_v50, %v7449_v23 }
 0x27f   : > { %v5960_v28 = vpop.f32.mrf.mxu1 }
 0x280   : > { %v6060_v16 = vpop.f32.mrf.mxu0  ;;  %v7708_v61 = vadd.f32 %v2314_v18, %v2051_v25 }
 0x281   : > { %v1869_v45 = vpop.f32.mrf.mxu1  ;;  %6174 = vmatmul.mubr.bf16.gmra.mxu1 %v2624_v2  ;;  %v7719_v16 = vpack.c.bf16 %v3043_v15, %v3042_v27  ;;  %v3045_v15 = vld [vmem:[#allocation2 + $0xb1] sm:$0xff]  ;;  %v3044_v27 = vld [vmem:[#allocation2 + $0xa9] sm:$0xff] }
 0x282   : > { %8559 = vst [vmem:[#allocation5_spill] sm:$0xff] %v7708_v61  ;;  %v2319_v8 = vpop.f32.mrf.mxu0  ;;  %6274 = vmatmul.mubr.bf16.gmra.mxu0 %v7706_v35  ;;  %v2052_v31 = vadd.f32 %v1869_v45, %v7451_v32  ;;  %6177 = vmatprep.mubr.msk.bf16.mxu1 %vm6795_vm0, %v7445_v17  ;;  %v2625_v45 = vpack.c.bf16 %v2593_v12, %v2592_v26  ;;  %v2595_v12 = vld [vmem:[#allocation2 + $0xb0] sm:$0xff]  ;;  %v2594_v26 = vld [vmem:[#allocation2 + $0xa8] sm:$0xff] }
 0x283   : > { %6277 = vmatprep.mubr.msk.bf16.mxu0 %vm6795_vm0, %v7445_v17  ;;  %v5963_v23 = vpop.f32.mrf.mxu1 }
 0x284   : > { %v6063_v63 = vpop.f32.mrf.mxu0  ;;  %v7716_v57 = vadd.f32 %v2319_v8, %v2052_v31 }
 0x285   : > { %v1872_v50 = vpop.f32.mrf.mxu1 }
 0x286   : > { %v2322_v18 = vpop.f32.mrf.mxu0  ;;  %v2053_v25 = vadd.f32 %v1872_v50, %v7457_v36 }
 0x287   : > { %v5964_v28 = vpop.f32.mrf.mxu1 }
 0x288   : > { %v6064_v32 = vpop.f32.mrf.mxu0  ;;  %v7721_v2 = vadd.f32 %v2322_v18, %v2053_v25 }
 0x289   : > { %v1877_v61 = vpop.f32.mrf.mxu1  ;;  %6178 = vmatmul.mubr.bf16.gmra.mxu1 %v2625_v45  ;;  %v7732_v32 = vpack.c.bf16 %v3045_v15, %v3044_v27  ;;  %v3047_v15 = vld [vmem:[#allocation2 + $0xc1] sm:$0xff]  ;;  %v3046_v27 = vld [vmem:[#allocation2 + $0xb9] sm:$0xff] }
 0x28a   : > { %8560 = vst [vmem:[#allocation6_spill] sm:$0xff] %v7721_v2  ;;  %v2327_v23 = vpop.f32.mrf.mxu0  ;;  %6278 = vmatmul.mubr.bf16.gmra.mxu0 %v7719_v16  ;;  %v2054_v8 = vadd.f32 %v1877_v61, %v7459_v43  ;;  %6181 = vmatprep.mubr.msk.bf16.mxu1 %vm6795_vm0, %v7445_v17  ;;  %v2626_v61 = vpack.c.bf16 %v2595_v12, %v2594_v26  ;;  %v2597_v12 = vld [vmem:[#allocation2 + $0xc0] sm:$0xff]  ;;  %v2596_v26 = vld [vmem:[#allocation2 + $0xb8] sm:$0xff] }
 0x28b   : > { %6281 = vmatprep.mubr.msk.bf16.mxu0 %vm6795_vm0, %v7445_v17  ;;  %v5967_v36 = vpop.f32.mrf.mxu1 }
 0x28c   : > { %v6067_v31 = vpop.f32.mrf.mxu0  ;;  %v7729_v63 = vadd.f32 %v2327_v23, %v2054_v8 }
 0x28d   : > { %v1880_v50 = vpop.f32.mrf.mxu1 }
 0x28e   : > { %v2330_v18 = vpop.f32.mrf.mxu0  ;;  %v2055_v25 = vadd.f32 %v1880_v50, %v7465_v51 }
 0x28f   : > { %v5968_v28 = vpop.f32.mrf.mxu1 }
 0x290   : > { %v6068_v43 = vpop.f32.mrf.mxu0  ;;  %v7734_v45 = vadd.f32 %v2330_v18, %v2055_v25 }
 0x291   : > { %v1885_v2 = vpop.f32.mrf.mxu1  ;;  %6182 = vmatmul.mubr.bf16.gmra.mxu1 %v2626_v61  ;;  %v7745_v43 = vpack.c.bf16 %v3047_v15, %v3046_v27  ;;  %v2599_v15 = vld [vmem:[#allocation2 + $0xd0] sm:$0xff]  ;;  %v2598_v27 = vld [vmem:[#allocation2 + $0xc8] sm:$0xff] }
 0x292   : > { %v2335_v36 = vpop.f32.mrf.mxu0  ;;  %6282 = vmatmul.mubr.bf16.gmra.mxu0 %v7732_v32  ;;  %v2056_v23 = vadd.f32 %v1885_v2, %v7467_v60  ;;  %6185 = vmatprep.mubr.msk.bf16.mxu1 %vm6795_vm0, %v7445_v17  ;;  %v2627_v2 = vpack.c.bf16 %v2597_v12, %v2596_v26 }
 0x293   : > { %6285 = vmatprep.mubr.msk.bf16.mxu0 %vm6795_vm0, %v7445_v17  ;;  %v5971_v51 = vpop.f32.mrf.mxu1 }
 0x294   : > { %v6071_v8 = vpop.f32.mrf.mxu0  ;;  %v7742_v31 = vadd.f32 %v2335_v36, %v2056_v23  ;;  %v7751_v23 = vld [vmem:[#allocation2] sm:$0xff] }
 0x295   : > { %v1888_v50 = vpop.f32.mrf.mxu1 }
 0x296   : > { %8561 = vst [vmem:[#allocation7_spill] sm:$0xff] %v7742_v31  ;;  %v2338_v18 = vpop.f32.mrf.mxu0  ;;  %v2057_v25 = vadd.f32 %v1888_v50, %v7473_v4  ;;  %v3049_v50 = vld [vmem:[#allocation2 + $0xd1] sm:$0xff] }
 0x297   : > { %v5972_v28 = vpop.f32.mrf.mxu1 }
 0x298   : > { %v6072_v60 = vpop.f32.mrf.mxu0  ;;  %v7747_v61 = vadd.f32 %v2338_v18, %v2057_v25 }
 0x299   : > { %v1893_v17 = vpop.f32.mrf.mxu1  ;;  %6186 = vmatmul.mubr.bf16.gmra.mxu1 %v2627_v2  ;;  %v2628_v2 = vpack.c.bf16 %v2599_v15, %v2598_v27  ;;  %v2601_v15 = vld [vmem:[#allocation2 + $0xe0] sm:$0xff]  ;;  %v2600_v27 = vld [vmem:[#allocation2 + $0xd8] sm:$0xff] }
 0x29a   : > { %8562 = vst [vmem:[#allocation8_spill] sm:$0xff] %v7747_v61  ;;  %v2343_v51 = vpop.f32.mrf.mxu0  ;;  %6286 = vmatmul.mubr.bf16.gmra.mxu0 %v7745_v43  ;;  %v2058_v36 = vadd.f32 %v1893_v17, %v7475_v13  ;;  %6189 = vmatprep.mubr.msk.bf16.mxu1 %vm6795_vm0, %v7751_v23  ;;  %v3048_v13 = vld [vmem:[#allocation2 + $0xc9] sm:$0xff] }
 0x29b   : > { %6289 = vmatprep.mubr.msk.bf16.mxu0 %vm6795_vm0, %v7751_v23  ;;  %v5975_v4 = vpop.f32.mrf.mxu1  ;;  %v7760_v17 = vpack.c.bf16 %v3049_v50, %v3048_v13  ;;  %v3051_v50 = vld [vmem:[#allocation2 + $0xe1] sm:$0xff]  ;;  %v3050_v13 = vld [vmem:[#allocation2 + $0xd9] sm:$0xff] }
 0x29c   : > { %v6075_v8 = vpop.f32.mrf.mxu0  ;;  %v7757_v12 = vadd.f32 %v2343_v51, %v2058_v36 }
 0x29d   : > { %v1896_v18 = vpop.f32.mrf.mxu1 }
 0x29e   : > { %v2346_v25 = vpop.f32.mrf.mxu0  ;;  %v2059_v26 = vadd.f32 %v1896_v18, %v7481_v21 }
 0x29f   : > { %v5976_v28 = vpop.f32.mrf.mxu1 }
 0x2a0   : > { %v6076_v60 = vpop.f32.mrf.mxu0  ;;  %v7762_v61 = vadd.f32 %v2346_v25, %v2059_v26 }
 0x2a1   : > { %v1901_v31 = vpop.f32.mrf.mxu1  ;;  %6190 = vmatmul.mubr.bf16.gmra.mxu1 %v2628_v2  ;;  %v7773_v60 = vpack.c.bf16 %v3051_v50, %v3050_v13  ;;  %v3053_v50 = vld [vmem:[#allocation2 + $0xf1] sm:$0xff]  ;;  %v3052_v13 = vld [vmem:[#allocation2 + $0xe9] sm:$0xff] }
 0x2a2   : > { %8563 = vst [vmem:[#allocation9_spill] sm:$0xff] %v7762_v61  ;;  %v2351_v4 = vpop.f32.mrf.mxu0  ;;  %6290 = vmatmul.mubr.bf16.gmra.mxu0 %v7760_v17  ;;  %v2060_v51 = vadd.f32 %v1901_v31, %v7483_v29  ;;  %6193 = vmatprep.mubr.msk.bf16.mxu1 %vm6795_vm0, %v7751_v23  ;;  %v2629_v31 = vpack.c.bf16 %v2601_v15, %v2600_v27  ;;  %v2603_v15 = vld [vmem:[#allocation2 + $0xf0] sm:$0xff]  ;;  %v2602_v27 = vld [vmem:[#allocation2 + $0xe8] sm:$0xff] }
 0x2a3   : > { %6293 = vmatprep.mubr.msk.bf16.mxu0 %vm6795_vm0, %v7751_v23  ;;  %v5979_v21 = vpop.f32.mrf.mxu1 }
 0x2a4   : > { %v6079_v36 = vpop.f32.mrf.mxu0  ;;  %v7770_v8 = vadd.f32 %v2351_v4, %v2060_v51 }
 0x2a5   : > { %v1904_v18 = vpop.f32.mrf.mxu1 }
 0x2a6   : > { %v2354_v25 = vpop.f32.mrf.mxu0  ;;  %v2061_v26 = vadd.f32 %v1904_v18, %v7489_v37 }
 0x2a7   : > { %v5980_v28 = vpop.f32.mrf.mxu1 }
 0x2a8   : > { %v6080_v29 = vpop.f32.mrf.mxu0  ;;  %v7775_v2 = vadd.f32 %v2354_v25, %v2061_v26 }
 0x2a9   : > { %v1909_v61 = vpop.f32.mrf.mxu1  ;;  %6194 = vmatmul.mubr.bf16.gmra.mxu1 %v2629_v31  ;;  %v7786_v29 = vpack.c.bf16 %v3053_v50, %v3052_v13  ;;  %v3055_v50 = vld [vmem:[#allocation2 + $0x101] sm:$0xff]  ;;  %v3054_v13 = vld [vmem:[#allocation2 + $0xf9] sm:$0xff] }
 0x2aa   : > { %8564 = vst [vmem:[#allocation10_spill] sm:$0xff] %v7775_v2  ;;  %v2359_v21 = vpop.f32.mrf.mxu0  ;;  %6294 = vmatmul.mubr.bf16.gmra.mxu0 %v7773_v60  ;;  %v2062_v4 = vadd.f32 %v1909_v61, %v7491_v46  ;;  %6197 = vmatprep.mubr.msk.bf16.mxu1 %vm6795_vm0, %v7751_v23  ;;  %v2630_v61 = vpack.c.bf16 %v2603_v15, %v2602_v27  ;;  %v2605_v15 = vld [vmem:[#allocation2 + $0x100] sm:$0xff]  ;;  %v2604_v27 = vld [vmem:[#allocation2 + $0xf8] sm:$0xff] }
 0x2ab   : > { %6297 = vmatprep.mubr.msk.bf16.mxu0 %vm6795_vm0, %v7751_v23  ;;  %v5983_v37 = vpop.f32.mrf.mxu1 }
 0x2ac   : > { %v6083_v51 = vpop.f32.mrf.mxu0  ;;  %v7783_v36 = vadd.f32 %v2359_v21, %v2062_v4 }
 0x2ad   : > { %v1912_v18 = vpop.f32.mrf.mxu1 }
 0x2ae   : > { %v2362_v25 = vpop.f32.mrf.mxu0  ;;  %v2063_v26 = vadd.f32 %v1912_v18, %v7497_v54 }
 0x2af   : > { %v5984_v28 = vpop.f32.mrf.mxu1 }
 0x2b0   : > { %v6084_v46 = vpop.f32.mrf.mxu0  ;;  %v7788_v31 = vadd.f32 %v2362_v25, %v2063_v26 }
 0x2b1   : > { %v1917_v2 = vpop.f32.mrf.mxu1  ;;  %6198 = vmatmul.mubr.bf16.gmra.mxu1 %v2630_v61  ;;  %v7799_v46 = vpack.c.bf16 %v3055_v50, %v3054_v13  ;;  %v3057_v50 = vld [vmem:[#allocation2 + $0x111] sm:$0xff]  ;;  %v3056_v13 = vld [vmem:[#allocation2 + $0x109] sm:$0xff] }
 0x2b2   : > { %8565 = vst [vmem:[#allocation11_spill] sm:$0xff] %v7788_v31  ;;  %v2367_v37 = vpop.f32.mrf.mxu0  ;;  %6298 = vmatmul.mubr.bf16.gmra.mxu0 %v7786_v29  ;;  %v2064_v21 = vadd.f32 %v1917_v2, %v7499_v0  ;;  %6201 = vmatprep.mubr.msk.bf16.mxu1 %vm6795_vm0, %v7751_v23  ;;  %v2631_v2 = vpack.c.bf16 %v2605_v15, %v2604_v27  ;;  %v2607_v15 = vld [vmem:[#allocation2 + $0x110] sm:$0xff]  ;;  %v2606_v27 = vld [vmem:[#allocation2 + $0x108] sm:$0xff] }
 0x2b3   : > { %6301 = vmatprep.mubr.msk.bf16.mxu0 %vm6795_vm0, %v7751_v23  ;;  %v5987_v54 = vpop.f32.mrf.mxu1 }
 0x2b4   : > { %v6087_v4 = vpop.f32.mrf.mxu0  ;;  %v7796_v51 = vadd.f32 %v2367_v37, %v2064_v21 }
 0x2b5   : > { %v1920_v18 = vpop.f32.mrf.mxu1 }
 0x2b6   : > { %v2370_v25 = vpop.f32.mrf.mxu0  ;;  %v2065_v26 = vadd.f32 %v1920_v18, %v7505_v10 }
 0x2b7   : > { %v5988_v28 = vpop.f32.mrf.mxu1 }
 0x2b8   : > { %v6088_v0 = vpop.f32.mrf.mxu0  ;;  %v7801_v61 = vadd.f32 %v2370_v25, %v2065_v26 }
 0x2b9   : > { %v1925_v31 = vpop.f32.mrf.mxu1  ;;  %6202 = vmatmul.mubr.bf16.gmra.mxu1 %v2631_v2  ;;  %v7812_v0 = vpack.c.bf16 %v3057_v50, %v3056_v13  ;;  %v3059_v50 = vld [vmem:[#allocation2 + $0x121] sm:$0xff]  ;;  %v3058_v13 = vld [vmem:[#allocation2 + $0x119] sm:$0xff] }
 0x2ba   : > { %8566 = vst [vmem:[#allocation12_spill] sm:$0xff] %v7801_v61  ;;  %v2375_v54 = vpop.f32.mrf.mxu0  ;;  %6302 = vmatmul.mubr.bf16.gmra.mxu0 %v7799_v46  ;;  %v2066_v37 = vadd.f32 %v1925_v31, %v7507_v22  ;;  %6205 = vmatprep.mubr.msk.bf16.mxu1 %vm6795_vm0, %v7751_v23  ;;  %v2632_v31 = vpack.c.bf16 %v2607_v15, %v2606_v27  ;;  %v2609_v15 = vld [vmem:[#allocation2 + $0x120] sm:$0xff]  ;;  %v2608_v27 = vld [vmem:[#allocation2 + $0x118] sm:$0xff] }
 0x2bb   : > { %6305 = vmatprep.mubr.msk.bf16.mxu0 %vm6795_vm0, %v7751_v23  ;;  %v5991_v10 = vpop.f32.mrf.mxu1 }
 0x2bc   : > { %v6091_v21 = vpop.f32.mrf.mxu0  ;;  %v7809_v4 = vadd.f32 %v2375_v54, %v2066_v37 }
 0x2bd   : > { %v1928_v18 = vpop.f32.mrf.mxu1 }
 0x2be   : > { %v2378_v25 = vpop.f32.mrf.mxu0  ;;  %v2067_v26 = vadd.f32 %v1928_v18, %v7513_v30 }
 0x2bf   : > { %v5992_v28 = vpop.f32.mrf.mxu1 }
 0x2c0   : > { %v6092_v22 = vpop.f32.mrf.mxu0  ;;  %v7814_v2 = vadd.f32 %v2378_v25, %v2067_v26 }
 0x2c1   : > { %v1933_v61 = vpop.f32.mrf.mxu1  ;;  %6206 = vmatmul.mubr.bf16.gmra.mxu1 %v2632_v31  ;;  %v7825_v22 = vpack.c.bf16 %v3059_v50, %v3058_v13  ;;  %v3061_v50 = vld [vmem:[#allocation2 + $0x131] sm:$0xff]  ;;  %v3060_v13 = vld [vmem:[#allocation2 + $0x129] sm:$0xff] }
 0x2c2   : > { %8567 = vst [vmem:[#allocation13_spill] sm:$0xff] %v7814_v2  ;;  %v2383_v10 = vpop.f32.mrf.mxu0  ;;  %6306 = vmatmul.mubr.bf16.gmra.mxu0 %v7812_v0  ;;  %v2068_v54 = vadd.f32 %v1933_v61, %v7515_v40  ;;  %6209 = vmatprep.mubr.msk.bf16.mxu1 %vm6795_vm0, %v7751_v23  ;;  %v2633_v61 = vpack.c.bf16 %v2609_v15, %v2608_v27  ;;  %v2611_v15 = vld [vmem:[#allocation2 + $0x130] sm:$0xff]  ;;  %v2610_v27 = vld [vmem:[#allocation2 + $0x128] sm:$0xff] }
 0x2c3   : > { %6309 = vmatprep.mubr.msk.bf16.mxu0 %vm6795_vm0, %v7751_v23  ;;  %v5995_v30 = vpop.f32.mrf.mxu1 }
 0x2c4   : > { %v6095_v37 = vpop.f32.mrf.mxu0  ;;  %v7822_v21 = vadd.f32 %v2383_v10, %v2068_v54 }
 0x2c5   : > { %v1936_v18 = vpop.f32.mrf.mxu1 }
 0x2c6   : > { %v2386_v25 = vpop.f32.mrf.mxu0  ;;  %v2069_v26 = vadd.f32 %v1936_v18, %v7521_v49 }
 0x2c7   : > { %v5996_v28 = vpop.f32.mrf.mxu1 }
 0x2c8   : > { %v6096_v40 = vpop.f32.mrf.mxu0  ;;  %v7827_v31 = vadd.f32 %v2386_v25, %v2069_v26 }
 0x2c9   : > { %v1941_v2 = vpop.f32.mrf.mxu1  ;;  %6210 = vmatmul.mubr.bf16.gmra.mxu1 %v2633_v61  ;;  %v7838_v40 = vpack.c.bf16 %v3061_v50, %v3060_v13  ;;  %v3063_v50 = vld [vmem:[#allocation2 + $0x141] sm:$0xff]  ;;  %v3062_v13 = vld [vmem:[#allocation2 + $0x139] sm:$0xff] }
 0x2ca   : > { %8568 = vst [vmem:[#allocation14_spill] sm:$0xff] %v7827_v31  ;;  %v2391_v30 = vpop.f32.mrf.mxu0  ;;  %6310 = vmatmul.mubr.bf16.gmra.mxu0 %v7825_v22  ;;  %v2070_v10 = vadd.f32 %v1941_v2, %v7523_v62  ;;  %6213 = vmatprep.mubr.msk.bf16.mxu1 %vm6795_vm0, %v7751_v23  ;;  %v2634_v2 = vpack.c.bf16 %v2611_v15, %v2610_v27  ;;  %v2613_v15 = vld [vmem:[#allocation2 + $0x140] sm:$0xff]  ;;  %v2612_v27 = vld [vmem:[#allocation2 + $0x138] sm:$0xff] }
 0x2cb   : > { %6313 = vmatprep.mubr.msk.bf16.mxu0 %vm6795_vm0, %v7751_v23  ;;  %v5999_v49 = vpop.f32.mrf.mxu1 }
 0x2cc   : > { %v6099_v54 = vpop.f32.mrf.mxu0  ;;  %v7835_v37 = vadd.f32 %v2391_v30, %v2070_v10 }
 0x2cd   : > { %v1944_v18 = vpop.f32.mrf.mxu1 }
 0x2ce   : > { %v2394_v25 = vpop.f32.mrf.mxu0  ;;  %v2071_v26 = vadd.f32 %v1944_v18, %v7529_v9 }
 0x2cf   : > { %v6000_v28 = vpop.f32.mrf.mxu1 }
 0x2d0   : > { %v6100_v62 = vpop.f32.mrf.mxu0  ;;  %v7840_v61 = vadd.f32 %v2394_v25, %v2071_v26 }
 0x2d1   : > { %v1949_v31 = vpop.f32.mrf.mxu1  ;;  %6214 = vmatmul.mubr.bf16.gmra.mxu1 %v2634_v2  ;;  %v7851_v62 = vpack.c.bf16 %v3063_v50, %v3062_v13  ;;  %v2615_v50 = vld [vmem:[#allocation2 + $0x150] sm:$0xff] }
 0x2d2   : > { %8569 = vst [vmem:[#allocation15_spill] sm:$0xff] %v7840_v61  ;;  %v2399_v49 = vpop.f32.mrf.mxu0  ;;  %6314 = vmatmul.mubr.bf16.gmra.mxu0 %v7838_v40  ;;  %v2072_v30 = vadd.f32 %v1949_v31, %v7531_v24  ;;  %6217 = vmatprep.mubr.msk.bf16.mxu1 %vm6795_vm0, %v7751_v23  ;;  %v2635_v31 = vpack.c.bf16 %v2613_v15, %v2612_v27  ;;  %v2614_v15 = vld [vmem:[#allocation2 + $0x148] sm:$0xff] }
 0x2d3   : > { %6317 = vmatprep.mubr.msk.bf16.mxu0 %vm6795_vm0, %v7751_v23  ;;  %v6003_v9 = vpop.f32.mrf.mxu1  ;;  %v3064_v13 = vld [vmem:[#allocation2 + $0x149] sm:$0xff] }
 0x2d4   : > { %v6103_v10 = vpop.f32.mrf.mxu0  ;;  %v7848_v54 = vadd.f32 %v2399_v49, %v2072_v30 }
 0x2d5   : > { %v1952_v18 = vpop.f32.mrf.mxu1 }
 0x2d6   : > { %v2402_v25 = vpop.f32.mrf.mxu0  ;;  %v2073_v26 = vadd.f32 %v1952_v18, %v7537_v34  ;;  %v3065_v18 = vld [vmem:[#allocation2 + $0x151] sm:$0xff] }
 0x2d7   : > { %v6004_v28 = vpop.f32.mrf.mxu1 }
 0x2d8   : > { %v6104_v24 = vpop.f32.mrf.mxu0  ;;  %v7853_v2 = vadd.f32 %v2402_v25, %v2073_v26 }
 0x2d9   : > { %v1957_v61 = vpop.f32.mrf.mxu1  ;;  %6218 = vmatmul.mubr.bf16.gmra.mxu1 %v2635_v31  ;;  %v7864_v24 = vpack.c.bf16 %v3065_v18, %v3064_v13 }
 0x2da   : > { %8570 = vst [vmem:[#allocation16_spill] sm:$0xff] %v7853_v2  ;;  %v2407_v9 = vpop.f32.mrf.mxu0  ;;  %6318 = vmatmul.mubr.bf16.gmra.mxu0 %v7851_v62  ;;  %v2074_v49 = vadd.f32 %v1957_v61, %v7539_v44  ;;  %6221 = vmatprep.mubr.msk.bf16.mxu1 %vm6795_vm0, %v7751_v23  ;;  %v2636_v61 = vpack.c.bf16 %v2615_v50, %v2614_v15  ;;  %v2616_v15 = vld [vmem:[#allocation2 + $0x158] sm:$0xff] }
 0x2db   : > { %6321 = vmatprep.mubr.msk.bf16.mxu0 %vm6795_vm0, %v7751_v23  ;;  %v6007_v34 = vpop.f32.mrf.mxu1  ;;  %v7876_v50 = vld [vmem:[#allocation2 + $0x159] sm:$0xff] }
 0x2dc   : > { %v6107_v30 = vpop.f32.mrf.mxu0  ;;  %v7861_v10 = vadd.f32 %v2407_v9, %v2074_v49 }
 0x2dd   : > { %v1960_v25 = vpop.f32.mrf.mxu1 }
 0x2de   : > { %v2410_v26 = vpop.f32.mrf.mxu0  ;;  %v2075_v27 = vadd.f32 %v1960_v25, %v7545_v56 }
 0x2df   : > { %v6008_v28 = vpop.f32.mrf.mxu1 }
 0x2e0   : > { %v6108_v44 = vpop.f32.mrf.mxu0  ;;  %v7866_v31 = vadd.f32 %v2410_v26, %v2075_v27 }
 0x2e1   : > { %v1965_v2 = vpop.f32.mrf.mxu1  ;;  %6222 = vmatmul.mubr.bf16.gmra.mxu1 %v2636_v61 }
 0x2e2   : > { %v2415_v34 = vpop.f32.mrf.mxu0  ;;  %6322 = vmatmul.mubr.bf16.gmra.mxu0 %v7864_v24  ;;  %v2076_v9 = vadd.f32 %v1965_v2, %v7547_v6  ;;  %6225 = vmatprep.mubr.msk.bf16.mxu1 %vm6795_vm0, %v7751_v23  ;;  %v2637_v6 = vpack.c.bf16 %v2616_v15, %v2616_v15  ;;  %v3087_v2 = vpack.c.bf16 %v7876_v50, %v7876_v50 }
 0x2e3   : > { %6325 = vmatprep.mubr.msk.bf16.mxu0 %vm6795_vm0, %v7751_v23  ;;  %v6011_v56 = vpop.f32.mrf.mxu1 }
 0x2e4   : > { %v6111_v49 = vpop.f32.mrf.mxu0  ;;  %v7874_v30 = vadd.f32 %v2415_v34, %v2076_v9 }
 0x2e5   : > { %v1968_v18 = vpop.f32.mrf.mxu1  ;;  %v3927_v49 = vld [vmem:[#allocation2 + $0x32] sm:$0xff] }
 0x2e6   : > { %v2418_v25 = vpop.f32.mrf.mxu0  ;;  %v2077_v26 = vadd.f32 %v1968_v18, %v7553_v20 }
 0x2e7   : > { %v6012_v27 = vpop.f32.mrf.mxu1 }
 0x2e8   : > { %v6112_v13 = vpop.f32.mrf.mxu0  ;;  %v7881_v28 = vadd.f32 %v2418_v25, %v2077_v26  ;;  %v3926_v26 = vld [vmem:[#allocation2 + $0x2a] sm:$0xff] }
 0x2e9   : > { %v1973_v44 = vpop.f32.mrf.mxu1  ;;  %6226 = vmatmul.mubr.bf16.gmra.mxu1 %v2637_v6  ;;  %v3967_v6 = vpack.c.bf16 %v3927_v49, %v3926_v26 }
 0x2ea   : > { %v2423_v61 = vpop.f32.mrf.mxu0  ;;  %6326 = vmatmul.mubr.bf16.gmra.mxu0 %v3087_v2  ;;  %v2078_v34 = vadd.f32 %v1973_v44, %v7555_v1  ;;  %6345 = vmatprep.mubr.msk.bf16.mxu1 %vm6795_vm0, %v7751_v23  ;;  %v6732_v1 = vld [vmem:[%s8554_s3 + $0x238] sm:$0xff]  }
 0x2eb   : > { %6445 = vmatprep.mubr.msk.bf16.mxu0 %vm6795_vm0, %v7751_v23  ;;  %v6015_v20 = vpop.f32.mrf.mxu1 }
 0x2ec   : > { %v6115_v9 = vpop.f32.mrf.mxu0  ;;  %v7888_v56 = vadd.f32 %v2423_v61, %v2078_v34 }
 0x2ed   : > { %v1976_v15 = vpop.f32.mrf.mxu1 }
 0x2ee   : > { %v2426_v18 = vpop.f32.mrf.mxu0  ;;  %v2079_v25 = vadd.f32 %v1976_v15, %v7561_v52  ;;  %v6733_v52 = vld [vmem:[%s8554_s3 + $0x230] sm:$0xff]  }
 0x2ef   : > { %v6016_v27 = vpop.f32.mrf.mxu1 }
 0x2f0   : > { %v6116_v13 = vpop.f32.mrf.mxu0  ;;  %v7894_v2 = vadd.f32 %v2426_v18, %v2079_v25  ;;  %v3928_v25 = vld [vmem:[#allocation2 + $0x3a] sm:$0xff] }
 0x2f1   : > { %v1981_v44 = vpop.f32.mrf.mxu1  ;;  %6346 = vmatmul.mubr.bf16.vlgmr.msra.gmra.mxu1 %v7578_v47  ;;  %v3929_v47 = vld [vmem:[#allocation2 + $0x42] sm:$0xff] }
 0x2f2   : > { %v2431_v20 = vpop.f32.mrf.mxu0  ;;  %6446 = vmatmul.mubr.bf16.vlgmr.msra.gmra.mxu0 %v3967_v6  ;;  %v2080_v61 = vadd.f32 %v1981_v44, %v7566_v14  ;;  %6530 = vmatpush3.bf16.msra.mxu1 %v6732_v1  ;;  %v3968_v27 = vpack.c.bf16 %v3929_v47, %v3928_v25  ;;  %v6734_v13 = vld [vmem:[%s8554_s3 + $0x228] sm:$0xff]   ;;  %v3931_v47 = vld [vmem:[#allocation2 + $0x52] sm:$0xff] }
 0x2f3   : > { %6349 = vmatprep.mubr.msk.bf16.mxu1 %vm6795_vm0, %v7751_v23  ;;  %v6019_v34 = vpop.f32.mrf.mxu1  ;;  %6449 = vmatprep.mubr.msk.bf16.mxu0 %vm6795_vm0, %v7751_v23 }
 0x2f4   : > { %v6119_v9 = vpop.f32.mrf.mxu0  ;;  %6531 = vmatprep.subr.bf16.mxu1 %v7751_v23  ;;  %v7906_v49 = vadd.f32 %v2431_v20, %v2080_v61  ;;  %v6735_v34 = vld [vmem:[%s8554_s3 + $0x220] sm:$0xff]  }
 0x2f5   : > { %v1984_v15 = vpop.f32.mrf.mxu1 }
 0x2f6   : > { %v2434_v14 = vpop.f32.mrf.mxu0  ;;  %v2081_v18 = vadd.f32 %v1984_v15, %v7576_v33  ;;  %6532 = vmatpush3.bf16.msra.mxu1 %v6733_v52 }
 0x2f7   : > { %v6020_v26 = vpop.f32.mrf.mxu1  ;;  %6533 = vmatprep.subr.bf16.mxu1 %v7751_v23 }
 0x2f8   : > { %v6120_v1 = vpop.f32.mrf.mxu0  ;;  %v7913_v6 = vadd.f32 %v2434_v14, %v2081_v18  ;;  %v3930_v14 = vld [vmem:[#allocation2 + $0x4a] sm:$0xff] }
 0x2f9   : > { %v1989_v44 = vpop.f32.mrf.mxu1  ;;  %6350 = vmatmul.mubr.bf16.gmra.mxu1 %v7604_v39  ;;  %v3969_v26 = vpack.c.bf16 %v3931_v47, %v3930_v14  ;;  %v6736_v1 = vld [vmem:[%s8554_s3 + $0x218] sm:$0xff]   ;;  %v6738_v14 = vld [vmem:[%s8554_s3 + $0x208] sm:$0xff]  }
 0x2fa   : > { %v2439_v20 = vpop.f32.mrf.mxu0  ;;  %6450 = vmatmul.mubr.bf16.gmra.mxu0 %v3968_v27  ;;  %v2082_v33 = vadd.f32 %v1989_v44, %v7585_v59  ;;  %6353 = vmatprep.mubr.msk.bf16.mxu1 %vm6795_vm0, %v7751_v23  ;;  %v3932_v47 = vld [vmem:[#allocation2 + $0x5a] sm:$0xff] }
 0x2fb   : > { %6453 = vmatprep.mubr.msk.bf16.mxu0 %vm6795_vm0, %v7751_v23  ;;  %v6023_v61 = vpop.f32.mrf.mxu1  ;;  %6534 = vmatpush3.bf16.msra.mxu1 %v6734_v13 }
 0x2fc   : > { %v6123_v52 = vpop.f32.mrf.mxu0  ;;  %v7924_v9 = vadd.f32 %v2439_v20, %v2082_v33  ;;  %6535 = vmatprep.subr.bf16.mxu1 %v7751_v23  ;;  %v6737_v61 = vld [vmem:[%s8554_s3 + $0x210] sm:$0xff]  }
 0x2fd   : > { %v1992_v39 = vpop.f32.mrf.mxu1 }
 0x2fe   : > { %v2442_v59 = vpop.f32.mrf.mxu0  ;;  %v2083_v15 = vadd.f32 %v1992_v39, %v7599_v19 }
 0x2ff   : > { %v6024_v18 = vpop.f32.mrf.mxu1  ;;  %6536 = vmatpush3.bf16.msra.mxu1 %v6735_v34  ;;  %v3933_v34 = vld [vmem:[#allocation2 + $0x62] sm:$0xff] }
 0x300   : > { %v6124_v25 = vpop.f32.mrf.mxu0  ;;  %v7931_v27 = vadd.f32 %v2442_v59, %v2083_v15  ;;  %6537 = vmatprep.subr.bf16.mxu1 %v7751_v23  ;;  %v3970_v15 = vpack.c.bf16 %v3933_v34, %v3932_v47 }
 0x301   : > { %v1997_v13 = vpop.f32.mrf.mxu1  ;;  %6354 = vmatmul.mubr.bf16.gmra.mxu1 %v7629_v38 }
 0x302   : > { %v2447_v44 = vpop.f32.mrf.mxu0  ;;  %6454 = vmatmul.mubr.bf16.gmra.mxu0 %v3969_v26  ;;  %v2084_v19 = vadd.f32 %v1997_v13, %v7611_v53  ;;  %6357 = vmatprep.mubr.msk.bf16.mxu1 %vm6795_vm0, %v7751_v23 }
 0x303   : > { %6457 = vmatprep.mubr.msk.bf16.mxu0 %vm6795_vm0, %v7751_v23  ;;  %v6027_v20 = vpop.f32.mrf.mxu1  ;;  %6538 = vmatpush3.bf16.msra.mxu1 %v6736_v1 }
 0x304   : > { %v6127_v33 = vpop.f32.mrf.mxu0  ;;  %v7943_v52 = vadd.f32 %v2447_v44, %v2084_v19  ;;  %6539 = vmatprep.subr.bf16.mxu1 %v7751_v23  ;;  %v6739_v44 = vld [vmem:[%s8554_s3 + $0x200] sm:$0xff]   ;;  %v3935_v20 = vld [vmem:[#allocation2 + $0x72] sm:$0xff] }
 0x305   : > { %v2000_v38 = vpop.f32.mrf.mxu1 }
 0x306   : > { %v2450_v53 = vpop.f32.mrf.mxu0 }
 0x307   : > { %v6028_v39 = vpop.f32.mrf.mxu1  ;;  %6540 = vmatpush3.bf16.msra.mxu1 %v6737_v61  ;;  %v3934_v61 = vld [vmem:[#allocation2 + $0x6a] sm:$0xff] }
 0x308   : > { %v6128_v59 = vpop.f32.mrf.mxu0  ;;  %6541 = vmatprep.subr.bf16.mxu1 %v7751_v23  ;;  %v3971_v53 = vpack.c.bf16 %v3935_v20, %v3934_v61 }
 0x309   : > { %v2737_v18 = vpop.f32.mrf.mxu1  ;;  %6358 = vmatmul.mubr.bf16.gmra.mxu1 %v7658_v42 }
 0x30a   : > { %v3187_v25 = vpop.f32.mrf.mxu0  ;;  %6458 = vmatmul.mubr.bf16.gmra.mxu0 %v3970_v15  ;;  %v2944_v26 = vadd.f32 %v2737_v18, %v7651_v5  ;;  %6361 = vmatprep.mubr.msk.bf16.mxu1 %vm6795_vm0, %v7751_v23 }
 0x30b   : > { %6461 = vmatprep.mubr.msk.bf16.mxu0 %vm6795_vm0, %v7751_v23  ;;  %v6147_v1 = vpop.f32.mrf.mxu1  ;;  %6542 = vmatpush3.bf16.msra.mxu1 %v6738_v14 }
 0x30c   : > { %v6247_v13 = vpop.f32.mrf.mxu0  ;;  %v7959_v19 = vadd.f32 %v3187_v25, %v2944_v26  ;;  %6543 = vmatprep.subr.bf16.mxu1 %v7751_v23  ;;  %v3937_v25 = vld [vmem:[#allocation2 + $0x82] sm:$0xff] }
 0x30d   : > { %v2740_v42 = vpop.f32.mrf.mxu1 }
 0x30e   : > { %v3190_v5 = vpop.f32.mrf.mxu0  ;;  %v2945_v33 = vadd.f32 %v2740_v42, %v7660_v48 }
 0x30f   : > { %v6148_v34 = vpop.f32.mrf.mxu1  ;;  %6544 = vmatpush3.bf16.msra.mxu1 %v6739_v44  ;;  %v3936_v44 = vld [vmem:[#allocation2 + $0x7a] sm:$0xff] }
 0x310   : > { %v6248_v38 = vpop.f32.mrf.mxu0  ;;  %v7963_v47 = vadd.f32 %v3190_v5, %v2945_v33  ;;  %v3972_v42 = vpack.c.bf16 %v3937_v25, %v3936_v44 }
 0x311   : > { %v2745_v39 = vpop.f32.mrf.mxu1  ;;  %6362 = vmatmul.mubr.bf16.gmra.mxu1 %v7680_v11 }
 0x312   : > { %v3195_v59 = vpop.f32.mrf.mxu0  ;;  %6462 = vmatmul.mubr.bf16.gmra.mxu0 %v3971_v53  ;;  %v2946_v15 = vadd.f32 %v2745_v39, %v7673_v58  ;;  %6365 = vmatprep.mubr.msk.bf16.mxu1 %vm6795_vm0, %v7751_v23  ;;  %v3939_v53 = vld [vmem:[#allocation2 + $0x92] sm:$0xff] }
 0x313   : > { %6465 = vmatprep.mubr.msk.bf16.mxu0 %vm6795_vm0, %v7751_v23  ;;  %v6151_v48 = vpop.f32.mrf.mxu1 }
 0x314   : > { %v6251_v14 = vpop.f32.mrf.mxu0  ;;  %v7971_v18 = vadd.f32 %v3195_v59, %v2946_v15  ;;  %v8571_v15 = vld [vmem:[#allocation4_spill] sm:$0xff] }
 0x315   : > { %v2748_v26 = vpop.f32.mrf.mxu1  ;;  %v3938_v14 = vld [vmem:[#allocation2 + $0x8a] sm:$0xff] }
 0x316   : > { %v3198_v1 = vpop.f32.mrf.mxu0  ;;  %v2947_v13 = vadd.f32 %v2748_v26, %v7682_v55  ;;  %v3973_v26 = vpack.c.bf16 %v3939_v53, %v3938_v14  ;;  %v3940_v53 = vld [vmem:[#allocation2 + $0x9a] sm:$0xff] }
 0x317   : > { %v6152_v11 = vpop.f32.mrf.mxu1 }
 0x318   : > { %v6252_v20 = vpop.f32.mrf.mxu0  ;;  %v7974_v58 = vadd.f32 %v3198_v1, %v2947_v13 }
 0x319   : > { %v2753_v5 = vpop.f32.mrf.mxu1  ;;  %6366 = vmatmul.mubr.bf16.gmra.mxu1 %v7693_v41 }
 0x31a   : > { %v3203_v33 = vpop.f32.mrf.mxu0  ;;  %6466 = vmatmul.mubr.bf16.gmra.mxu0 %v3972_v42  ;;  %v2948_v61 = vadd.f32 %v2753_v5, %v7690_v3  ;;  %6369 = vmatprep.mubr.msk.bf16.mxu1 %vm6795_vm0, %v7751_v23  ;;  %v3941_v5 = vld [vmem:[#allocation2 + $0xa2] sm:$0xff] }
 0x31b   : > { %6469 = vmatprep.mubr.msk.bf16.mxu0 %vm6795_vm0, %v7751_v23  ;;  %v6155_v55 = vpop.f32.mrf.mxu1 }
 0x31c   : > { %v6255_v34 = vpop.f32.mrf.mxu0  ;;  %v7982_v38 = vadd.f32 %v3203_v33, %v2948_v61  ;;  %v8572_v55 = vld [vmem:[#allocation5_spill] sm:$0xff] }
 0x31d   : > { %v2756_v39 = vpop.f32.mrf.mxu1 }
 0x31e   : > { %v3206_v59 = vpop.f32.mrf.mxu0  ;;  %v2949_v48 = vadd.f32 %v2756_v39, %v8571_v15 }
 0x31f   : > { %v6156_v41 = vpop.f32.mrf.mxu1 }
 0x320   : > { %v6256_v25 = vpop.f32.mrf.mxu0  ;;  %v7985_v3 = vadd.f32 %v3206_v59, %v2949_v48  ;;  %v3974_v59 = vpack.c.bf16 %v3941_v5, %v3940_v53  ;;  %v3942_v5 = vld [vmem:[#allocation2 + $0xaa] sm:$0xff] }
 0x321   : > { %v2761_v1 = vpop.f32.mrf.mxu1  ;;  %6370 = vmatmul.mubr.bf16.gmra.mxu1 %v7706_v35 }
 0x322   : > { %v3211_v13 = vpop.f32.mrf.mxu0  ;;  %6470 = vmatmul.mubr.bf16.gmra.mxu0 %v3973_v26  ;;  %v2950_v44 = vadd.f32 %v2761_v1, %v7703_v7  ;;  %6373 = vmatprep.mubr.msk.bf16.mxu1 %vm6795_vm0, %v7751_v23  ;;  %v3943_v1 = vld [vmem:[#allocation2 + $0xb2] sm:$0xff] }
 0x323   : > { %6473 = vmatprep.mubr.msk.bf16.mxu0 %vm6795_vm0, %v7751_v23  ;;  %v6159_v11 = vpop.f32.mrf.mxu1 }
 0x324   : > { %v6259_v20 = vpop.f32.mrf.mxu0  ;;  %v7993_v42 = vadd.f32 %v3211_v13, %v2950_v44  ;;  %v8573_v11 = vld [vmem:[#allocation6_spill] sm:$0xff] }
 0x325   : > { %v2764_v33 = vpop.f32.mrf.mxu1 }
 0x326   : > { %v3214_v61 = vpop.f32.mrf.mxu0  ;;  %v2951_v34 = vadd.f32 %v2764_v33, %v8572_v55 }
 0x327   : > { %v6160_v35 = vpop.f32.mrf.mxu1 }
 0x328   : > { %v6260_v39 = vpop.f32.mrf.mxu0  ;;  %v7996_v7 = vadd.f32 %v3214_v61, %v2951_v34  ;;  %v3975_v61 = vpack.c.bf16 %v3943_v1, %v3942_v5 }
 0x329   : > { %v2769_v15 = vpop.f32.mrf.mxu1  ;;  %6374 = vmatmul.mubr.bf16.gmra.mxu1 %v7719_v16 }
 0x32a   : > { %v3219_v48 = vpop.f32.mrf.mxu0  ;;  %6474 = vmatmul.mubr.bf16.gmra.mxu0 %v3974_v59  ;;  %v2952_v14 = vadd.f32 %v2769_v15, %v7716_v57  ;;  %6377 = vmatprep.mubr.msk.bf16.mxu1 %vm6795_vm0, %v7751_v23  ;;  %v3945_v15 = vld [vmem:[#allocation2 + $0xc2] sm:$0xff] }
 0x32b   : > { %6477 = vmatprep.mubr.msk.bf16.mxu0 %vm6795_vm0, %v7751_v23  ;;  %v6163_v41 = vpop.f32.mrf.mxu1 }
 0x32c   : > { %v6263_v25 = vpop.f32.mrf.mxu0  ;;  %v8004_v26 = vadd.f32 %v3219_v48, %v2952_v14 }
 0x32d   : > { %v2772_v13 = vpop.f32.mrf.mxu1  ;;  %v3944_v25 = vld [vmem:[#allocation2 + $0xba] sm:$0xff] }
 0x32e   : > { %v3222_v44 = vpop.f32.mrf.mxu0  ;;  %v2953_v20 = vadd.f32 %v2772_v13, %v8573_v11  ;;  %v3976_v13 = vpack.c.bf16 %v3945_v15, %v3944_v25 }
 0x32f   : > { %v6164_v16 = vpop.f32.mrf.mxu1 }
 0x330   : > { %v6264_v33 = vpop.f32.mrf.mxu0  ;;  %v8007_v57 = vadd.f32 %v3222_v44, %v2953_v20  ;;  %v8574_v20 = vld [vmem:[#allocation7_spill] sm:$0xff] }
 0x331   : > { %v2777_v55 = vpop.f32.mrf.mxu1  ;;  %6378 = vmatmul.mubr.bf16.gmra.mxu1 %v7732_v32 }
 0x332   : > { %v3227_v34 = vpop.f32.mrf.mxu0  ;;  %6478 = vmatmul.mubr.bf16.gmra.mxu0 %v3975_v61  ;;  %v2954_v53 = vadd.f32 %v2777_v55, %v7729_v63  ;;  %6381 = vmatprep.mubr.msk.bf16.mxu1 %vm6795_vm0, %v7751_v23  ;;  %v3947_v61 = vld [vmem:[#allocation2 + $0xd2] sm:$0xff] }
 0x333   : > { %6481 = vmatprep.mubr.msk.bf16.mxu0 %vm6795_vm0, %v7751_v23  ;;  %v6167_v35 = vpop.f32.mrf.mxu1 }
 0x334   : > { %v6267_v39 = vpop.f32.mrf.mxu0  ;;  %v8015_v59 = vadd.f32 %v3227_v34, %v2954_v53  ;;  %v8575_v53 = vld [vmem:[#allocation8_spill] sm:$0xff] }
 0x335   : > { %v2780_v48 = vpop.f32.mrf.mxu1  ;;  %v3946_v39 = vld [vmem:[#allocation2 + $0xca] sm:$0xff] }
 0x336   : > { %v3230_v14 = vpop.f32.mrf.mxu0  ;;  %v2955_v41 = vadd.f32 %v2780_v48, %v7734_v45  ;;  %v3977_v48 = vpack.c.bf16 %v3947_v61, %v3946_v39  ;;  %v3948_v61 = vld [vmem:[#allocation2 + $0xda] sm:$0xff] }
 0x337   : > { %v6168_v32 = vpop.f32.mrf.mxu1 }
 0x338   : > { %v6268_v1 = vpop.f32.mrf.mxu0  ;;  %v8018_v63 = vadd.f32 %v3230_v14, %v2955_v41 }
 0x339   : > { %v2785_v44 = vpop.f32.mrf.mxu1  ;;  %6382 = vmatmul.mubr.bf16.gmra.mxu1 %v7745_v43 }
 0x33a   : > { %v3235_v11 = vpop.f32.mrf.mxu0  ;;  %6482 = vmatmul.mubr.bf16.gmra.mxu0 %v3976_v13  ;;  %v2956_v5 = vadd.f32 %v2785_v44, %v8574_v20  ;;  %6385 = vmatprep.mubr.msk.bf16.mxu1 %vm6795_vm0, %v7751_v23 }
 0x33b   : > { %6485 = vmatprep.mubr.msk.bf16.mxu0 %vm6795_vm0, %v7751_v23  ;;  %v6171_v45 = vpop.f32.mrf.mxu1 }
 0x33c   : > { %v6271_v16 = vpop.f32.mrf.mxu0  ;;  %v8026_v33 = vadd.f32 %v3235_v11, %v2956_v5  ;;  %v3949_v11 = vld [vmem:[#allocation2 + $0xe2] sm:$0xff] }
 0x33d   : > { %v2788_v55 = vpop.f32.mrf.mxu1  ;;  %v8576_v45 = vld [vmem:[#allocation9_spill] sm:$0xff] }
 0x33e   : > { %v3238_v34 = vpop.f32.mrf.mxu0  ;;  %v2957_v35 = vadd.f32 %v2788_v55, %v8575_v53 }
 0x33f   : > { %v6172_v43 = vpop.f32.mrf.mxu1 }
 0x340   : > { %v6272_v15 = vpop.f32.mrf.mxu0  ;;  %v8029_v14 = vadd.f32 %v3238_v34, %v2957_v35  ;;  %v3978_v34 = vpack.c.bf16 %v3949_v11, %v3948_v61  ;;  %v3950_v11 = vld [vmem:[#allocation2 + $0xea] sm:$0xff] }
 0x341   : > { %v2793_v41 = vpop.f32.mrf.mxu1  ;;  %6386 = vmatmul.mubr.bf16.gmra.mxu1 %v7760_v17 }
 0x342   : > { %v3243_v25 = vpop.f32.mrf.mxu0  ;;  %6486 = vmatmul.mubr.bf16.gmra.mxu0 %v3977_v48  ;;  %v2958_v32 = vadd.f32 %v2793_v41, %v7757_v12  ;;  %6389 = vmatprep.mubr.msk.bf16.mxu1 %vm6795_vm0, %v7751_v23  ;;  %v3951_v41 = vld [vmem:[#allocation2 + $0xf2] sm:$0xff] }
 0x343   : > { %6489 = vmatprep.mubr.msk.bf16.mxu0 %vm6795_vm0, %v7751_v23  ;;  %v6175_v1 = vpop.f32.mrf.mxu1 }
 0x344   : > { %v6275_v13 = vpop.f32.mrf.mxu0  ;;  %v8037_v44 = vadd.f32 %v3243_v25, %v2958_v32  ;;  %v8577_v1 = vld [vmem:[#allocation10_spill] sm:$0xff] }
 0x345   : > { %v2796_v20 = vpop.f32.mrf.mxu1 }
 0x346   : > { %v3246_v5 = vpop.f32.mrf.mxu0  ;;  %v2959_v16 = vadd.f32 %v2796_v20, %v8576_v45 }
 0x347   : > { %v6176_v17 = vpop.f32.mrf.mxu1 }
 0x348   : > { %v6276_v55 = vpop.f32.mrf.mxu0  ;;  %v8040_v12 = vadd.f32 %v3246_v5, %v2959_v16  ;;  %v3979_v5 = vpack.c.bf16 %v3951_v41, %v3950_v11  ;;  %v3952_v41 = vld [vmem:[#allocation2 + $0xfa] sm:$0xff] }
 0x349   : > { %v2801_v53 = vpop.f32.mrf.mxu1  ;;  %6390 = vmatmul.mubr.bf16.gmra.mxu1 %v7773_v60 }
 0x34a   : > { %v3251_v35 = vpop.f32.mrf.mxu0  ;;  %6490 = vmatmul.mubr.bf16.gmra.mxu0 %v3978_v34  ;;  %v2960_v39 = vadd.f32 %v2801_v53, %v7770_v8  ;;  %6393 = vmatprep.mubr.msk.bf16.mxu1 %vm6795_vm0, %v7751_v23  ;;  %v3953_v53 = vld [vmem:[#allocation2 + $0x102] sm:$0xff] }
 0x34b   : > { %6493 = vmatprep.mubr.msk.bf16.mxu0 %vm6795_vm0, %v7751_v23  ;;  %v6179_v43 = vpop.f32.mrf.mxu1 }
 0x34c   : > { %v6279_v15 = vpop.f32.mrf.mxu0  ;;  %v8048_v48 = vadd.f32 %v3251_v35, %v2960_v39  ;;  %v8578_v43 = vld [vmem:[#allocation11_spill] sm:$0xff] }
 0x34d   : > { %v2804_v25 = vpop.f32.mrf.mxu1 }
 0x34e   : > { %v3254_v32 = vpop.f32.mrf.mxu0  ;;  %v2961_v13 = vadd.f32 %v2804_v25, %v8577_v1 }
 0x34f   : > { %v6180_v60 = vpop.f32.mrf.mxu1 }
 0x350   : > { %v6280_v20 = vpop.f32.mrf.mxu0  ;;  %v8051_v8 = vadd.f32 %v3254_v32, %v2961_v13  ;;  %v3980_v32 = vpack.c.bf16 %v3953_v53, %v3952_v41  ;;  %v3954_v53 = vld [vmem:[#allocation2 + $0x10a] sm:$0xff]  ;;  %v8077_v41 = vld [vmem:[#allocation2] sm:$0xff] }
 0x351   : > { %v2809_v45 = vpop.f32.mrf.mxu1  ;;  %6394 = vmatmul.mubr.bf16.gmra.mxu1 %v7786_v29 }
 0x352   : > { %v3259_v16 = vpop.f32.mrf.mxu0  ;;  %6494 = vmatmul.mubr.bf16.gmra.mxu0 %v3979_v5  ;;  %v2962_v61 = vadd.f32 %v2809_v45, %v7783_v36  ;;  %6397 = vmatprep.mubr.msk.bf16.mxu1 %vm6795_vm0, %v7751_v23  ;;  %v3955_v45 = vld [vmem:[#allocation2 + $0x112] sm:$0xff] }
 0x353   : > { %6497 = vmatprep.mubr.msk.bf16.mxu0 %vm6795_vm0, %v7751_v23  ;;  %v6183_v17 = vpop.f32.mrf.mxu1 }
 0x354   : > { %v6283_v55 = vpop.f32.mrf.mxu0  ;;  %v8059_v34 = vadd.f32 %v3259_v16, %v2962_v61  ;;  %v8579_v17 = vld [vmem:[#allocation12_spill] sm:$0xff] }
 0x355   : > { %v2812_v35 = vpop.f32.mrf.mxu1 }
 0x356   : > { %v3262_v39 = vpop.f32.mrf.mxu0  ;;  %v2963_v15 = vadd.f32 %v2812_v35, %v8578_v43 }
 0x357   : > { %v6184_v29 = vpop.f32.mrf.mxu1 }
 0x358   : > { %v6284_v25 = vpop.f32.mrf.mxu0  ;;  %v8062_v36 = vadd.f32 %v3262_v39, %v2963_v15  ;;  %v3981_v39 = vpack.c.bf16 %v3955_v45, %v3954_v53 }
 0x359   : > { %v2817_v1 = vpop.f32.mrf.mxu1  ;;  %6398 = vmatmul.mubr.bf16.gmra.mxu1 %v7799_v46 }
 0x35a   : > { %v3267_v13 = vpop.f32.mrf.mxu0  ;;  %6498 = vmatmul.mubr.bf16.gmra.mxu0 %v3980_v32  ;;  %v2964_v11 = vadd.f32 %v2817_v1, %v7796_v51  ;;  %6401 = vmatprep.mubr.msk.bf16.mxu1 %vm6795_vm0, %v7751_v23  ;;  %v3957_v1 = vld [vmem:[#allocation2 + $0x122] sm:$0xff] }
 0x35b   : > { %6501 = vmatprep.mubr.msk.bf16.mxu0 %vm6795_vm0, %v7751_v23  ;;  %v6187_v60 = vpop.f32.mrf.mxu1 }
 0x35c   : > { %v6287_v20 = vpop.f32.mrf.mxu0  ;;  %v8070_v5 = vadd.f32 %v3267_v13, %v2964_v11  ;;  %v8580_v60 = vld [vmem:[#allocation13_spill] sm:$0xff] }
 0x35d   : > { %v2820_v16 = vpop.f32.mrf.mxu1  ;;  %v3956_v20 = vld [vmem:[#allocation2 + $0x11a] sm:$0xff] }
 0x35e   : > { %v3270_v61 = vpop.f32.mrf.mxu0  ;;  %v2965_v55 = vadd.f32 %v2820_v16, %v8579_v17  ;;  %v3982_v16 = vpack.c.bf16 %v3957_v1, %v3956_v20  ;;  %v3958_v1 = vld [vmem:[#allocation2 + $0x12a] sm:$0xff] }
 0x35f   : > { %v6188_v46 = vpop.f32.mrf.mxu1 }
 0x360   : > { %v6288_v35 = vpop.f32.mrf.mxu0  ;;  %v8073_v51 = vadd.f32 %v3270_v61, %v2965_v55 }
 0x361   : > { %v2825_v43 = vpop.f32.mrf.mxu1  ;;  %6402 = vmatmul.mubr.bf16.gmra.mxu1 %v7812_v0 }
 0x362   : > { %v3275_v15 = vpop.f32.mrf.mxu0  ;;  %6502 = vmatmul.mubr.bf16.gmra.mxu0 %v3981_v39  ;;  %v2966_v23 = vadd.f32 %v2825_v43, %v7809_v4  ;;  %6405 = vmatprep.mubr.msk.bf16.mxu1 %vm6795_vm0, %v8077_v41  ;;  %v3959_v43 = vld [vmem:[#allocation2 + $0x132] sm:$0xff] }
 0x363   : > { %6505 = vmatprep.mubr.msk.bf16.mxu0 %vm6795_vm0, %v8077_v41  ;;  %v6191_v29 = vpop.f32.mrf.mxu1 }
 0x364   : > { %v6291_v25 = vpop.f32.mrf.mxu0  ;;  %v8083_v32 = vadd.f32 %v3275_v15, %v2966_v23  ;;  %v8581_v29 = vld [vmem:[#allocation14_spill] sm:$0xff] }
 0x365   : > { %v2828_v13 = vpop.f32.mrf.mxu1 }
 0x366   : > { %v3278_v11 = vpop.f32.mrf.mxu0  ;;  %v2967_v0 = vadd.f32 %v2828_v13, %v8580_v60 }
 0x367   : > { %v6192_v45 = vpop.f32.mrf.mxu1 }
 0x368   : > { %v6292_v4 = vpop.f32.mrf.mxu0  ;;  %v8086_v61 = vadd.f32 %v3278_v11, %v2967_v0  ;;  %v3983_v11 = vpack.c.bf16 %v3959_v43, %v3958_v1  ;;  %v3960_v43 = vld [vmem:[#allocation2 + $0x13a] sm:$0xff] }
 0x369   : > { %v2833_v17 = vpop.f32.mrf.mxu1  ;;  %6406 = vmatmul.mubr.bf16.gmra.mxu1 %v7825_v22 }
 0x36a   : > { %v3283_v55 = vpop.f32.mrf.mxu0  ;;  %6506 = vmatmul.mubr.bf16.gmra.mxu0 %v3982_v16  ;;  %v2968_v53 = vadd.f32 %v2833_v17, %v7822_v21  ;;  %6409 = vmatprep.mubr.msk.bf16.mxu1 %vm6795_vm0, %v8077_v41  ;;  %v3961_v17 = vld [vmem:[#allocation2 + $0x142] sm:$0xff] }
 0x36b   : > { %6509 = vmatprep.mubr.msk.bf16.mxu0 %vm6795_vm0, %v8077_v41  ;;  %v6195_v46 = vpop.f32.mrf.mxu1 }
 0x36c   : > { %v6295_v35 = vpop.f32.mrf.mxu0  ;;  %v8094_v39 = vadd.f32 %v3283_v55, %v2968_v53  ;;  %v8582_v46 = vld [vmem:[#allocation15_spill] sm:$0xff] }
 0x36d   : > { %v2836_v15 = vpop.f32.mrf.mxu1 }
 0x36e   : > { %v3286_v23 = vpop.f32.mrf.mxu0  ;;  %v2969_v25 = vadd.f32 %v2836_v15, %v8581_v29 }
 0x36f   : > { %v6196_v22 = vpop.f32.mrf.mxu1 }
 0x370   : > { %v6296_v13 = vpop.f32.mrf.mxu0  ;;  %v8097_v21 = vadd.f32 %v3286_v23, %v2969_v25  ;;  %v3984_v23 = vpack.c.bf16 %v3961_v17, %v3960_v43  ;;  %v3962_v17 = vld [vmem:[#allocation2 + $0x14a] sm:$0xff] }
 0x371   : > { %v2841_v60 = vpop.f32.mrf.mxu1  ;;  %6410 = vmatmul.mubr.bf16.gmra.mxu1 %v7838_v40 }
 0x372   : > { %v3291_v0 = vpop.f32.mrf.mxu0  ;;  %6510 = vmatmul.mubr.bf16.gmra.mxu0 %v3983_v11  ;;  %v2970_v20 = vadd.f32 %v2841_v60, %v7835_v37  ;;  %6413 = vmatprep.mubr.msk.bf16.mxu1 %vm6795_vm0, %v8077_v41  ;;  %v3963_v60 = vld [vmem:[#allocation2 + $0x152] sm:$0xff] }
 0x373   : > { %6513 = vmatprep.mubr.msk.bf16.mxu0 %vm6795_vm0, %v8077_v41  ;;  %v6199_v45 = vpop.f32.mrf.mxu1 }
 0x374   : > { %v6299_v4 = vpop.f32.mrf.mxu0  ;;  %v8105_v16 = vadd.f32 %v3291_v0, %v2970_v20  ;;  %v8583_v45 = vld [vmem:[#allocation16_spill] sm:$0xff] }
 0x375   : > { %v2844_v55 = vpop.f32.mrf.mxu1 }
 0x376   : > { %v3294_v53 = vpop.f32.mrf.mxu0  ;;  %v2971_v35 = vadd.f32 %v2844_v55, %v8582_v46 }
 0x377   : > { %v6200_v40 = vpop.f32.mrf.mxu1 }
 0x378   : > { %v6300_v15 = vpop.f32.mrf.mxu0  ;;  %v8108_v37 = vadd.f32 %v3294_v53, %v2971_v35  ;;  %v3985_v53 = vpack.c.bf16 %v3963_v60, %v3962_v17 }
 0x379   : > { %v2849_v29 = vpop.f32.mrf.mxu1  ;;  %6414 = vmatmul.mubr.bf16.gmra.mxu1 %v7851_v62 }
 0x37a   : > { %v3299_v25 = vpop.f32.mrf.mxu0  ;;  %6514 = vmatmul.mubr.bf16.gmra.mxu0 %v3984_v23  ;;  %v2972_v1 = vadd.f32 %v2849_v29, %v7848_v54  ;;  %6417 = vmatprep.mubr.msk.bf16.mxu1 %vm6795_vm0, %v8077_v41  ;;  %v3515_v29 = vld [vmem:[#allocation2 + $0x161] sm:$0xff] }
 0x37b   : > { %6517 = vmatprep.mubr.msk.bf16.mxu0 %vm6795_vm0, %v8077_v41  ;;  %v6203_v22 = vpop.f32.mrf.mxu1 }
 0x37c   : > { %v6303_v13 = vpop.f32.mrf.mxu0  ;;  %v8116_v11 = vadd.f32 %v3299_v25, %v2972_v1  ;;  %v3964_v25 = vld [vmem:[#allocation2 + $0x15a] sm:$0xff]  ;;  %v3965_v1 = vld [vmem:[#allocation2 + $0x162] sm:$0xff] }
 0x37d   : > { %v2852_v0 = vpop.f32.mrf.mxu1 }
 0x37e   : > { %v3302_v20 = vpop.f32.mrf.mxu0  ;;  %v2973_v4 = vadd.f32 %v2852_v0, %v8583_v45 }
 0x37f   : > { %v6204_v62 = vpop.f32.mrf.mxu1 }
 0x380   : > { %v6304_v55 = vpop.f32.mrf.mxu0  ;;  %v8119_v54 = vadd.f32 %v3302_v20, %v2973_v4  ;;  %v3986_v20 = vpack.c.bf16 %v3965_v1, %v3964_v25 }
 0x381   : > { %v2857_v46 = vpop.f32.mrf.mxu1  ;;  %6418 = vmatmul.mubr.bf16.gmra.mxu1 %v7864_v24  ;;  %v3516_v55 = vld [vmem:[#allocation2 + $0x169] sm:$0xff] }
 0x382   : > { %v3307_v35 = vpop.f32.mrf.mxu0  ;;  %6518 = vmatmul.mubr.bf16.gmra.mxu0 %v3985_v53  ;;  %v2974_v43 = vadd.f32 %v2857_v46, %v7861_v10  ;;  %6421 = vmatprep.mubr.msk.bf16.mxu1 %vm6795_vm0, %v8077_v41  ;;  %v3536_v10 = vpack.c.bf16 %v3515_v29, %v7876_v50 }
 0x383   : > { %6521 = vmatprep.mubr.msk.bf16.mxu0 %vm6795_vm0, %v8077_v41  ;;  %v6207_v40 = vpop.f32.mrf.mxu1 }
 0x384   : > { %v6307_v15 = vpop.f32.mrf.mxu0  ;;  %v8127_v23 = vadd.f32 %v3307_v35, %v2974_v43  ;;  %v3537_v40 = vpack.c.bf16 %v3516_v55, %v3516_v55 }
 0x385   : > { %v2860_v22 = vpop.f32.mrf.mxu1 }
 0x386   : > { %v3310_v13 = vpop.f32.mrf.mxu0  ;;  %v2975_v24 = vadd.f32 %v2860_v22, %v7866_v31  ;;  %v3966_v31 = vld [vmem:[#allocation2 + $0x16a] sm:$0xff] }
 0x387   : > { %v6208_v60 = vpop.f32.mrf.mxu1  ;;  %v3987_v15 = vpack.c.bf16 %v3966_v31, %v3966_v31 }
 0x388   : > { %v6308_v0 = vpop.f32.mrf.mxu0  ;;  %v8131_v45 = vadd.f32 %v3310_v13, %v2975_v24 }
 0x389   : > { %v2865_v4 = vpop.f32.mrf.mxu1  ;;  %6422 = vmatmul.mubr.bf16.gmra.mxu1 %v3536_v10 }
 0x38a   : > { %v3315_v17 = vpop.f32.mrf.mxu0  ;;  %6522 = vmatmul.mubr.bf16.gmra.mxu0 %v3986_v20  ;;  %v2976_v62 = vadd.f32 %v2865_v4, %v7874_v30  ;;  %6425 = vmatprep.mubr.msk.bf16.mxu1 %vm6795_vm0, %v8077_v41  ;;  %v4377_v20 = vld [vmem:[#allocation2 + $0x33] sm:$0xff] }
 0x38b   : > { %6525 = vmatprep.mubr.msk.bf16.mxu0 %vm6795_vm0, %v8077_v41  ;;  %v6211_v53 = vpop.f32.mrf.mxu1 }
 0x38c   : > { %v6311_v46 = vpop.f32.mrf.mxu0  ;;  %v8138_v50 = vadd.f32 %v3315_v17, %v2976_v62  ;;  %v4376_v62 = vld [vmem:[#allocation2 + $0x2b] sm:$0xff] }
 0x38d   : > { %v2868_v35 = vpop.f32.mrf.mxu1  ;;  %v4417_v53 = vpack.c.bf16 %v4377_v20, %v4376_v62 }
 0x38e   : > { %v3318_v43 = vpop.f32.mrf.mxu0  ;;  %v2977_v29 = vadd.f32 %v2868_v35, %v7881_v28 }
 0x38f   : > { %v6212_v25 = vpop.f32.mrf.mxu1 }
 0x390   : > { %v6312_v30 = vpop.f32.mrf.mxu0  ;;  %v8141_v1 = vadd.f32 %v3318_v43, %v2977_v29  ;;  %v4379_v25 = vld [vmem:[#allocation2 + $0x43] sm:$0xff] }
 0x391   : > { %v2873_v22 = vpop.f32.mrf.mxu1  ;;  %6426 = vmatmul.mubr.bf16.gmra.mxu1 %v3537_v40 }
 0x392   : > { %v3323_v13 = vpop.f32.mrf.mxu0  ;;  %6526 = vmatmul.mubr.bf16.gmra.mxu0 %v3987_v15  ;;  %v2978_v24 = vadd.f32 %v2873_v22, %v7888_v56  ;;  %6545 = vmatprep.mubr.msk.bf16.mxu1 %vm6795_vm0, %v8077_v41 }
 0x393   : > { %v6215_v60 = vpop.f32.mrf.mxu1 }
 0x394   : > { %v6315_v0 = vpop.f32.mrf.mxu0  ;;  %v8146_v10 = vadd.f32 %v3323_v13, %v2978_v24  ;;  %v4378_v13 = vld [vmem:[#allocation2 + $0x3b] sm:$0xff] }
 0x395   : > { %v2876_v4 = vpop.f32.mrf.mxu1  ;;  %v4418_v0 = vpack.c.bf16 %v4379_v25, %v4378_v13 }
 0x396   : > { %v3326_v28 = vpop.f32.mrf.mxu0  ;;  %v2979_v17 = vadd.f32 %v2876_v4, %v7894_v2 }
 0x397   : > { %v6216_v55 = vpop.f32.mrf.mxu1 }
 0x398   : > { %v6316_v31 = vpop.f32.mrf.mxu0  ;;  %v8149_v46 = vadd.f32 %v3326_v28, %v2979_v17 }
 0x399   : > { %v2881_v35 = vpop.f32.mrf.mxu1  ;;  %6546 = vmatmul.mubr.bf16.vlgmr.msra.gmra.mxu1 %v4417_v53  ;;  %v4381_v31 = vld [vmem:[#allocation2 + $0x53] sm:$0xff] }
 0x39a   : > { %v3331_v56 = vpop.f32.mrf.mxu0  ;;  %v2980_v43 = vadd.f32 %v2881_v35, %v7906_v49  ;;  %6549 = vmatprep.mubr.msk.bf16.mxu1 %vm6795_vm0, %v8077_v41 }
 0x39b   : > { %v6219_v40 = vpop.f32.mrf.mxu1 }
 0x39c   : > { %v6319_v15 = vpop.f32.mrf.mxu0  ;;  %v8154_v29 = vadd.f32 %v3331_v56, %v2980_v43  ;;  %v4380_v56 = vld [vmem:[#allocation2 + $0x4b] sm:$0xff] }
 0x39d   : > { %v2884_v2 = vpop.f32.mrf.mxu1  ;;  %v4419_v15 = vpack.c.bf16 %v4381_v31, %v4380_v56  ;;  %v4385_v56 = vld [vmem:[#allocation2 + $0x73] sm:$0xff] }
 0x39e   : > { %v3334_v30 = vpop.f32.mrf.mxu0  ;;  %v2981_v22 = vadd.f32 %v2884_v2, %v7913_v6 }
 0x39f   : > { %v6220_v24 = vpop.f32.mrf.mxu1 }
 0x3a0   : > { %v6320_v60 = vpop.f32.mrf.mxu0  ;;  %v8157_v20 = vadd.f32 %v3334_v30, %v2981_v22 }
 0x3a1   : > { %v2889_v4 = vpop.f32.mrf.mxu1  ;;  %6550 = vmatmul.mubr.bf16.gmra.mxu1 %v4418_v0  ;;  %v4383_v60 = vld [vmem:[#allocation2 + $0x63] sm:$0xff] }
 0x3a2   : > { %v3339_v49 = vpop.f32.mrf.mxu0  ;;  %v2982_v28 = vadd.f32 %v2889_v4, %v7924_v9  ;;  %6553 = vmatprep.mubr.msk.bf16.mxu1 %vm6795_vm0, %v8077_v41  ;;  %v4382_v4 = vld [vmem:[#allocation2 + $0x5b] sm:$0xff] }
 0x3a3   : > { %v6223_v17 = vpop.f32.mrf.mxu1 }
 0x3a4   : > { %v6323_v62 = vpop.f32.mrf.mxu0  ;;  %v8162_v55 = vadd.f32 %v3339_v49, %v2982_v28  ;;  %v4420_v17 = vpack.c.bf16 %v4383_v60, %v4382_v4 }
 0x3a5   : > { %v2892_v6 = vpop.f32.mrf.mxu1 }
 0x3a6   : > { %v3342_v53 = vpop.f32.mrf.mxu0  ;;  %v2983_v35 = vadd.f32 %v2892_v6, %v7931_v27 }
 0x3a7   : > { %v6224_v43 = vpop.f32.mrf.mxu1 }
 0x3a8   : > { %v6324_v40 = vpop.f32.mrf.mxu0  ;;  %v8165_v25 = vadd.f32 %v3342_v53, %v2983_v35 }
 0x3a9   : > { %v2897_v2 = vpop.f32.mrf.mxu1  ;;  %6554 = vmatmul.mubr.bf16.gmra.mxu1 %v4419_v15 }
 0x3aa   : > { %v3347_v9 = vpop.f32.mrf.mxu0  ;;  %v2984_v30 = vadd.f32 %v2897_v2, %v7943_v52  ;;  %6557 = vmatprep.mubr.msk.bf16.mxu1 %vm6795_vm0, %v8077_v41  ;;  %v4384_v2 = vld [vmem:[#allocation2 + $0x6b] sm:$0xff] }
 0x3ab   : > { %v6227_v22 = vpop.f32.mrf.mxu1 }
 0x3ac   : > { %v6327_v13 = vpop.f32.mrf.mxu0  ;;  %v8170_v24 = vadd.f32 %v3347_v9, %v2984_v30  ;;  %v4421_v22 = vpack.c.bf16 %v4385_v56, %v4384_v2 }
 0x3ad   : > { %v2900_v27 = vpop.f32.mrf.mxu1 }
 0x3ae   : > { %v3350_v0 = vpop.f32.mrf.mxu0 }
 0x3af   : > { %v6228_v49 = vpop.f32.mrf.mxu1 }
 0x3b0   : > { %v6328_v28 = vpop.f32.mrf.mxu0 }
 0x3b1   : > { %v3637_v62 = vpop.f32.mrf.mxu1  ;;  %6558 = vmatmul.mubr.bf16.gmra.mxu1 %v4420_v17  ;;  %v4387_v28 = vld [vmem:[#allocation2 + $0x83] sm:$0xff] }
 0x3b2   : > { %v4087_v31 = vpop.f32.mrf.mxu0  ;;  %v3844_v6 = vadd.f32 %v3637_v62, %v7959_v19  ;;  %6561 = vmatprep.mubr.msk.bf16.mxu1 %vm6795_vm0, %v8077_v41 }
 0x3b3   : > { %v6347_v52 = vpop.f32.mrf.mxu1 }
 0x3b4   : > { %v6447_v53 = vpop.f32.mrf.mxu0  ;;  %v8175_v35 = vadd.f32 %v4087_v31, %v3844_v6  ;;  %v4386_v31 = vld [vmem:[#allocation2 + $0x7b] sm:$0xff] }
 0x3b5   : > { %v3640_v43 = vpop.f32.mrf.mxu1  ;;  %v4422_v53 = vpack.c.bf16 %v4387_v28, %v4386_v31 }
 0x3b6   : > { %v4090_v40 = vpop.f32.mrf.mxu0  ;;  %v3845_v15 = vadd.f32 %v3640_v43, %v7963_v47 }
 0x3b7   : > { %v6348_v9 = vpop.f32.mrf.mxu1 }
 0x3b8   : > { %v6448_v30 = vpop.f32.mrf.mxu0  ;;  %v8178_v13 = vadd.f32 %v4090_v40, %v3845_v15 }
 0x3b9   : > { %v3645_v60 = vpop.f32.mrf.mxu1  ;;  %6562 = vmatmul.mubr.bf16.gmra.mxu1 %v4421_v22  ;;  %v4389_v30 = vld [vmem:[#allocation2 + $0x93] sm:$0xff] }
 0x3ba   : > { %v4095_v19 = vpop.f32.mrf.mxu0  ;;  %v3846_v27 = vadd.f32 %v3645_v60, %v7971_v18  ;;  %6565 = vmatprep.mubr.msk.bf16.mxu1 %vm6795_vm0, %v8077_v41 }
 0x3bb   : > { %v6351_v0 = vpop.f32.mrf.mxu1 }
 0x3bc   : > { %v6451_v4 = vpop.f32.mrf.mxu0  ;;  %v8183_v49 = vadd.f32 %v4095_v19, %v3846_v27  ;;  %v4388_v19 = vld [vmem:[#allocation2 + $0x8b] sm:$0xff] }
 0x3bd   : > { %v3648_v47 = vpop.f32.mrf.mxu1  ;;  %v4423_v4 = vpack.c.bf16 %v4389_v30, %v4388_v19 }
 0x3be   : > { %v4098_v17 = vpop.f32.mrf.mxu0  ;;  %v3847_v62 = vadd.f32 %v3648_v47, %v7974_v58 }
 0x3bf   : > { %v6352_v6 = vpop.f32.mrf.mxu1 }
 0x3c0   : > { %v6452_v52 = vpop.f32.mrf.mxu0  ;;  %v8186_v56 = vadd.f32 %v4098_v17, %v3847_v62 }
 0x3c1   : > { %v3653_v43 = vpop.f32.mrf.mxu1  ;;  %6566 = vmatmul.mubr.bf16.gmra.mxu1 %v4422_v53  ;;  %v4391_v52 = vld [vmem:[#allocation2 + $0xa3] sm:$0xff] }
 0x3c2   : > { %v4103_v18 = vpop.f32.mrf.mxu0  ;;  %v3848_v40 = vadd.f32 %v3653_v43, %v7982_v38  ;;  %6569 = vmatprep.mubr.msk.bf16.mxu1 %vm6795_vm0, %v8077_v41 }
 0x3c3   : > { %v6355_v15 = vpop.f32.mrf.mxu1 }
 0x3c4   : > { %v6455_v2 = vpop.f32.mrf.mxu0  ;;  %v8191_v9 = vadd.f32 %v4103_v18, %v3848_v40  ;;  %v4390_v18 = vld [vmem:[#allocation2 + $0x9b] sm:$0xff] }
 0x3c5   : > { %v3656_v58 = vpop.f32.mrf.mxu1  ;;  %v4424_v2 = vpack.c.bf16 %v4391_v52, %v4390_v18 }
 0x3c6   : > { %v4106_v22 = vpop.f32.mrf.mxu0  ;;  %v3849_v60 = vadd.f32 %v3656_v58, %v7985_v3 }
 0x3c7   : > { %v6356_v27 = vpop.f32.mrf.mxu1 }
 0x3c8   : > { %v6456_v0 = vpop.f32.mrf.mxu0  ;;  %v8194_v28 = vadd.f32 %v4106_v22, %v3849_v60 }
 0x3c9   : > { %v3661_v47 = vpop.f32.mrf.mxu1  ;;  %6570 = vmatmul.mubr.bf16.gmra.mxu1 %v4423_v4  ;;  %v4393_v0 = vld [vmem:[#allocation2 + $0xb3] sm:$0xff] }
 0x3ca   : > { %v4111_v38 = vpop.f32.mrf.mxu0  ;;  %v3850_v17 = vadd.f32 %v3661_v47, %v7993_v42  ;;  %6573 = vmatprep.mubr.msk.bf16.mxu1 %vm6795_vm0, %v8077_v41 }
 0x3cb   : > { %v6359_v62 = vpop.f32.mrf.mxu1 }
 0x3cc   : > { %v6459_v31 = vpop.f32.mrf.mxu0  ;;  %v8199_v6 = vadd.f32 %v4111_v38, %v3850_v17  ;;  %v4392_v38 = vld [vmem:[#allocation2 + $0xab] sm:$0xff] }
 0x3cd   : > { %v3664_v3 = vpop.f32.mrf.mxu1  ;;  %v4425_v31 = vpack.c.bf16 %v4393_v0, %v4392_v38 }
 0x3ce   : > { %v4114_v53 = vpop.f32.mrf.mxu0  ;;  %v3851_v43 = vadd.f32 %v3664_v3, %v7996_v7 }
 0x3cf   : > { %v6360_v40 = vpop.f32.mrf.mxu1 }
 0x3d0   : > { %v6460_v15 = vpop.f32.mrf.mxu0  ;;  %v8202_v30 = vadd.f32 %v4114_v53, %v3851_v43 }
 0x3d1   : > { %v3669_v58 = vpop.f32.mrf.mxu1  ;;  %6574 = vmatmul.mubr.bf16.gmra.mxu1 %v4424_v2  ;;  %v4395_v15 = vld [vmem:[#allocation2 + $0xc3] sm:$0xff] }
 0x3d2   : > { %v4119_v42 = vpop.f32.mrf.mxu0  ;;  %v3852_v22 = vadd.f32 %v3669_v58, %v8004_v26  ;;  %6577 = vmatprep.mubr.msk.bf16.mxu1 %vm6795_vm0, %v8077_v41 }
 0x3d3   : > { %v6363_v60 = vpop.f32.mrf.mxu1 }
 0x3d4   : > { %v6463_v19 = vpop.f32.mrf.mxu0  ;;  %v8207_v27 = vadd.f32 %v4119_v42, %v3852_v22  ;;  %v4394_v42 = vld [vmem:[#allocation2 + $0xbb] sm:$0xff] }
 0x3d5   : > { %v3672_v7 = vpop.f32.mrf.mxu1  ;;  %v4426_v19 = vpack.c.bf16 %v4395_v15, %v4394_v42 }
 0x3d6   : > { %v4122_v4 = vpop.f32.mrf.mxu0  ;;  %v3853_v47 = vadd.f32 %v3672_v7, %v8007_v57 }
 0x3d7   : > { %v6364_v17 = vpop.f32.mrf.mxu1 }
 0x3d8   : > { %v6464_v62 = vpop.f32.mrf.mxu0  ;;  %v8210_v52 = vadd.f32 %v4122_v4, %v3853_v47 }
 0x3d9   : > { %v3677_v3 = vpop.f32.mrf.mxu1  ;;  %6578 = vmatmul.mubr.bf16.gmra.mxu1 %v4425_v31  ;;  %v4397_v62 = vld [vmem:[#allocation2 + $0xd3] sm:$0xff] }
 0x3da   : > { %v4127_v26 = vpop.f32.mrf.mxu0  ;;  %v3854_v53 = vadd.f32 %v3677_v3, %v8015_v59  ;;  %6581 = vmatprep.mubr.msk.bf16.mxu1 %vm6795_vm0, %v8077_v41 }
 0x3db   : > { %v6367_v43 = vpop.f32.mrf.mxu1 }
 0x3dc   : > { %v6467_v18 = vpop.f32.mrf.mxu0  ;;  %v8215_v40 = vadd.f32 %v4127_v26, %v3854_v53  ;;  %v4396_v26 = vld [vmem:[#allocation2 + $0xcb] sm:$0xff] }
 0x3dd   : > { %v3680_v57 = vpop.f32.mrf.mxu1  ;;  %v4427_v18 = vpack.c.bf16 %v4397_v62, %v4396_v26 }
 0x3de   : > { %v4130_v2 = vpop.f32.mrf.mxu0  ;;  %v3855_v58 = vadd.f32 %v3680_v57, %v8018_v63 }
 0x3df   : > { %v6368_v22 = vpop.f32.mrf.mxu1 }
 0x3e0   : > { %v6468_v60 = vpop.f32.mrf.mxu0  ;;  %v8218_v0 = vadd.f32 %v4130_v2, %v3855_v58 }
 0x3e1   : > { %v3685_v7 = vpop.f32.mrf.mxu1  ;;  %6582 = vmatmul.mubr.bf16.gmra.mxu1 %v4426_v19  ;;  %v4399_v60 = vld [vmem:[#allocation2 + $0xe3] sm:$0xff] }
 0x3e2   : > { %v4135_v59 = vpop.f32.mrf.mxu0  ;;  %v3856_v4 = vadd.f32 %v3685_v7, %v8026_v33  ;;  %6585 = vmatprep.mubr.msk.bf16.mxu1 %vm6795_vm0, %v8077_v41 }
 0x3e3   : > { %v6371_v47 = vpop.f32.mrf.mxu1 }
 0x3e4   : > { %v6471_v38 = vpop.f32.mrf.mxu0  ;;  %v8223_v17 = vadd.f32 %v4135_v59, %v3856_v4  ;;  %v4398_v59 = vld [vmem:[#allocation2 + $0xdb] sm:$0xff] }
 0x3e5   : > { %v3688_v63 = vpop.f32.mrf.mxu1  ;;  %v4428_v38 = vpack.c.bf16 %v4399_v60, %v4398_v59 }
 0x3e6   : > { %v4138_v31 = vpop.f32.mrf.mxu0  ;;  %v3857_v3 = vadd.f32 %v3688_v63, %v8029_v14 }
 0x3e7   : > { %v6372_v53 = vpop.f32.mrf.mxu1 }
 0x3e8   : > { %v6472_v43 = vpop.f32.mrf.mxu0  ;;  %v8226_v15 = vadd.f32 %v4138_v31, %v3857_v3 }
 0x3e9   : > { %v3693_v57 = vpop.f32.mrf.mxu1  ;;  %6586 = vmatmul.mubr.bf16.gmra.mxu1 %v4427_v18  ;;  %v4401_v43 = vld [vmem:[#allocation2 + $0xf3] sm:$0xff] }
 0x3ea   : > { %v4143_v33 = vpop.f32.mrf.mxu0  ;;  %v3858_v2 = vadd.f32 %v3693_v57, %v8037_v44  ;;  %6589 = vmatprep.mubr.msk.bf16.mxu1 %vm6795_vm0, %v8077_v41 }
 0x3eb   : > { %v6375_v58 = vpop.f32.mrf.mxu1 }
 0x3ec   : > { %v6475_v42 = vpop.f32.mrf.mxu0  ;;  %v8231_v22 = vadd.f32 %v4143_v33, %v3858_v2  ;;  %v4400_v33 = vld [vmem:[#allocation2 + $0xeb] sm:$0xff] }
 0x3ed   : > { %v3696_v14 = vpop.f32.mrf.mxu1  ;;  %v4429_v42 = vpack.c.bf16 %v4401_v43, %v4400_v33 }
 0x3ee   : > { %v4146_v19 = vpop.f32.mrf.mxu0  ;;  %v3859_v7 = vadd.f32 %v3696_v14, %v8040_v12 }
 0x3ef   : > { %v6376_v4 = vpop.f32.mrf.mxu1 }
 0x3f0   : > { %v6476_v47 = vpop.f32.mrf.mxu0  ;;  %v8234_v62 = vadd.f32 %v4146_v19, %v3859_v7 }
 0x3f1   : > { %v3701_v63 = vpop.f32.mrf.mxu1  ;;  %6590 = vmatmul.mubr.bf16.gmra.mxu1 %v4428_v38  ;;  %v4403_v47 = vld [vmem:[#allocation2 + $0x103] sm:$0xff] }
 0x3f2   : > { %v4151_v44 = vpop.f32.mrf.mxu0  ;;  %v3860_v31 = vadd.f32 %v3701_v63, %v8048_v48  ;;  %6593 = vmatprep.mubr.msk.bf16.mxu1 %vm6795_vm0, %v8077_v41 }
 0x3f3   : > { %v6379_v3 = vpop.f32.mrf.mxu1 }
 0x3f4   : > { %v6479_v26 = vpop.f32.mrf.mxu0  ;;  %v8239_v53 = vadd.f32 %v4151_v44, %v3860_v31  ;;  %v4402_v44 = vld [vmem:[#allocation2 + $0xfb] sm:$0xff] }
 0x3f5   : > { %v3704_v12 = vpop.f32.mrf.mxu1  ;;  %v4430_v26 = vpack.c.bf16 %v4403_v47, %v4402_v44 }
 0x3f6   : > { %v4154_v18 = vpop.f32.mrf.mxu0  ;;  %v3861_v57 = vadd.f32 %v3704_v12, %v8051_v8 }
 0x3f7   : > { %v6380_v2 = vpop.f32.mrf.mxu1 }
 0x3f8   : > { %v6480_v58 = vpop.f32.mrf.mxu0  ;;  %v8242_v60 = vadd.f32 %v4154_v18, %v3861_v57 }
 0x3f9   : > { %v3709_v14 = vpop.f32.mrf.mxu1  ;;  %6594 = vmatmul.mubr.bf16.gmra.mxu1 %v4429_v42  ;;  %v4405_v58 = vld [vmem:[#allocation2 + $0x113] sm:$0xff] }
 0x3fa   : > { %v4159_v48 = vpop.f32.mrf.mxu0  ;;  %v3862_v19 = vadd.f32 %v3709_v14, %v8059_v34  ;;  %6597 = vmatprep.mubr.msk.bf16.mxu1 %vm6795_vm0, %v8077_v41 }
 0x3fb   : > { %v6383_v7 = vpop.f32.mrf.mxu1 }
 0x3fc   : > { %v6483_v59 = vpop.f32.mrf.mxu0  ;;  %v8247_v4 = vadd.f32 %v4159_v48, %v3862_v19  ;;  %v4404_v48 = vld [vmem:[#allocation2 + $0x10b] sm:$0xff] }
 0x3fd   : > { %v3712_v8 = vpop.f32.mrf.mxu1  ;;  %v4431_v59 = vpack.c.bf16 %v4405_v58, %v4404_v48 }
 0x3fe   : > { %v4162_v38 = vpop.f32.mrf.mxu0  ;;  %v3863_v63 = vadd.f32 %v3712_v8, %v8062_v36 }
 0x3ff   : > { %v6384_v31 = vpop.f32.mrf.mxu1 }
 0x400   : > { %v6484_v3 = vpop.f32.mrf.mxu0  ;;  %v8250_v43 = vadd.f32 %v4162_v38, %v3863_v63 }
 0x401   : > { %v3717_v12 = vpop.f32.mrf.mxu1  ;;  %6598 = vmatmul.mubr.bf16.gmra.mxu1 %v4430_v26  ;;  %v4407_v3 = vld [vmem:[#allocation2 + $0x123] sm:$0xff] }
 0x402   : > { %v4167_v34 = vpop.f32.mrf.mxu0  ;;  %v3864_v18 = vadd.f32 %v3717_v12, %v8070_v5  ;;  %6601 = vmatprep.mubr.msk.bf16.mxu1 %vm6795_vm0, %v8077_v41 }
 0x403   : > { %v6387_v57 = vpop.f32.mrf.mxu1 }
 0x404   : > { %v6487_v33 = vpop.f32.mrf.mxu0  ;;  %v8255_v2 = vadd.f32 %v4167_v34, %v3864_v18  ;;  %v4406_v34 = vld [vmem:[#allocation2 + $0x11b] sm:$0xff] }
 0x405   : > { %v3720_v36 = vpop.f32.mrf.mxu1  ;;  %v4432_v33 = vpack.c.bf16 %v4407_v3, %v4406_v34 }
 0x406   : > { %v4170_v42 = vpop.f32.mrf.mxu0  ;;  %v3865_v14 = vadd.f32 %v3720_v36, %v8073_v51 }
 0x407   : > { %v6388_v19 = vpop.f32.mrf.mxu1 }
 0x408   : > { %v6488_v7 = vpop.f32.mrf.mxu0  ;;  %v8258_v47 = vadd.f32 %v4170_v42, %v3865_v14 }
 0x409   : > { %v3725_v8 = vpop.f32.mrf.mxu1  ;;  %6602 = vmatmul.mubr.bf16.gmra.mxu1 %v4431_v59  ;;  %v4409_v7 = vld [vmem:[#allocation2 + $0x133] sm:$0xff] }
 0x40a   : > { %v4175_v5 = vpop.f32.mrf.mxu0  ;;  %v3866_v38 = vadd.f32 %v3725_v8, %v8083_v32  ;;  %6605 = vmatprep.mubr.msk.bf16.mxu1 %vm6795_vm0, %v8077_v41 }
 0x40b   : > { %v6391_v63 = vpop.f32.mrf.mxu1 }
 0x40c   : > { %v6491_v44 = vpop.f32.mrf.mxu0  ;;  %v8263_v31 = vadd.f32 %v4175_v5, %v3866_v38  ;;  %v4408_v5 = vld [vmem:[#allocation2 + $0x12b] sm:$0xff] }
 0x40d   : > { %v3728_v51 = vpop.f32.mrf.mxu1  ;;  %v4433_v44 = vpack.c.bf16 %v4409_v7, %v4408_v5 }
 0x40e   : > { %v4178_v26 = vpop.f32.mrf.mxu0  ;;  %v3867_v12 = vadd.f32 %v3728_v51, %v8086_v61 }
 0x40f   : > { %v6392_v18 = vpop.f32.mrf.mxu1 }
 0x410   : > { %v6492_v57 = vpop.f32.mrf.mxu0  ;;  %v8266_v58 = vadd.f32 %v4178_v26, %v3867_v12 }
 0x411   : > { %v3733_v36 = vpop.f32.mrf.mxu1  ;;  %6606 = vmatmul.mubr.bf16.gmra.mxu1 %v4432_v33  ;;  %v4411_v57 = vld [vmem:[#allocation2 + $0x143] sm:$0xff] }
 0x412   : > { %v4183_v32 = vpop.f32.mrf.mxu0  ;;  %v3868_v42 = vadd.f32 %v3733_v36, %v8094_v39  ;;  %6609 = vmatprep.mubr.msk.bf16.mxu1 %vm6795_vm0, %v8077_v41 }
 0x413   : > { %v6395_v14 = vpop.f32.mrf.mxu1 }
 0x414   : > { %v6495_v48 = vpop.f32.mrf.mxu0  ;;  %v8271_v19 = vadd.f32 %v4183_v32, %v3868_v42  ;;  %v4410_v32 = vld [vmem:[#allocation2 + $0x13b] sm:$0xff] }
 0x415   : > { %v3736_v61 = vpop.f32.mrf.mxu1  ;;  %v4434_v48 = vpack.c.bf16 %v4411_v57, %v4410_v32 }
 0x416   : > { %v4186_v59 = vpop.f32.mrf.mxu0  ;;  %v3869_v8 = vadd.f32 %v3736_v61, %v8097_v21 }
 0x417   : > { %v6396_v38 = vpop.f32.mrf.mxu1 }
 0x418   : > { %v6496_v63 = vpop.f32.mrf.mxu0  ;;  %v8274_v3 = vadd.f32 %v4186_v59, %v3869_v8 }
 0x419   : > { %v3741_v51 = vpop.f32.mrf.mxu1  ;;  %6610 = vmatmul.mubr.bf16.gmra.mxu1 %v4433_v44  ;;  %v4413_v63 = vld [vmem:[#allocation2 + $0x153] sm:$0xff] }
 0x41a   : > { %v4191_v39 = vpop.f32.mrf.mxu0  ;;  %v3870_v26 = vadd.f32 %v3741_v51, %v8105_v16  ;;  %6613 = vmatprep.mubr.msk.bf16.mxu1 %vm6795_vm0, %v8077_v41 }
 0x41b   : > { %v6399_v12 = vpop.f32.mrf.mxu1 }
 0x41c   : > { %v6499_v34 = vpop.f32.mrf.mxu0  ;;  %v8279_v18 = vadd.f32 %v4191_v39, %v3870_v26  ;;  %v4412_v39 = vld [vmem:[#allocation2 + $0x14b] sm:$0xff] }
 0x41d   : > { %v3744_v21 = vpop.f32.mrf.mxu1  ;;  %v4435_v34 = vpack.c.bf16 %v4413_v63, %v4412_v39 }
 0x41e   : > { %v4194_v33 = vpop.f32.mrf.mxu0  ;;  %v3871_v36 = vadd.f32 %v3744_v21, %v8108_v37 }
 0x41f   : > { %v6400_v42 = vpop.f32.mrf.mxu1 }
 0x420   : > { %v6500_v14 = vpop.f32.mrf.mxu0  ;;  %v8282_v7 = vadd.f32 %v4194_v33, %v3871_v36 }
 0x421   : > { %v3749_v61 = vpop.f32.mrf.mxu1  ;;  %6614 = vmatmul.mubr.bf16.gmra.mxu1 %v4434_v48  ;;  %v4414_v14 = vld [vmem:[#allocation2 + $0x15b] sm:$0xff] }
 0x422   : > { %v4199_v16 = vpop.f32.mrf.mxu0  ;;  %v3872_v59 = vadd.f32 %v3749_v61, %v8116_v11  ;;  %6617 = vmatprep.mubr.msk.bf16.mxu1 %vm6795_vm0, %v8077_v41 }
 0x423   : > { %v6403_v8 = vpop.f32.mrf.mxu1 }
 0x424   : > { %v6503_v5 = vpop.f32.mrf.mxu0  ;;  %v8287_v38 = vadd.f32 %v4199_v16, %v3872_v59 }
 0x425   : > { %v3752_v37 = vpop.f32.mrf.mxu1 }
 0x426   : > { %v4202_v44 = vpop.f32.mrf.mxu0  ;;  %v3873_v51 = vadd.f32 %v3752_v37, %v8119_v54  ;;  %v4415_v54 = vld [vmem:[#allocation2 + $0x163] sm:$0xff] }
 0x427   : > { %v6404_v26 = vpop.f32.mrf.mxu1  ;;  %v4436_v5 = vpack.c.bf16 %v4415_v54, %v4414_v14 }
 0x428   : > { %v6504_v12 = vpop.f32.mrf.mxu0  ;;  %v8290_v57 = vadd.f32 %v4202_v44, %v3873_v51  ;;  %v4416_v51 = vld [vmem:[#allocation2 + $0x16b] sm:$0xff] }
 0x429   : > { %v3757_v21 = vpop.f32.mrf.mxu1  ;;  %6618 = vmatmul.mubr.bf16.gmra.mxu1 %v4435_v34 }
 0x42a   : > { %v4207_v11 = vpop.f32.mrf.mxu0  ;;  %v3874_v33 = vadd.f32 %v3757_v21, %v8127_v23  ;;  %6621 = vmatprep.mubr.msk.bf16.mxu1 %vm6795_vm0, %v8077_v41  ;;  %v4437_v21 = vpack.c.bf16 %v4416_v51, %v4416_v51 }
 0x42b   : > { %v6407_v36 = vpop.f32.mrf.mxu1 }
 0x42c   : > { %v6507_v32 = vpop.f32.mrf.mxu0  ;;  %v8295_v42 = vadd.f32 %v4207_v11, %v3874_v33 }
 0x42d   : > { %v3760_v48 = vpop.f32.mrf.mxu1 }
 0x42e   : > { %v4210_v61 = vpop.f32.mrf.mxu0  ;;  %v3875_v16 = vadd.f32 %v3760_v48, %v8131_v45 }
 0x42f   : > { %v6408_v59 = vpop.f32.mrf.mxu1 }
 0x430   : > { %v6508_v8 = vpop.f32.mrf.mxu0  ;;  %v8298_v63 = vadd.f32 %v4210_v61, %v3875_v16 }
 0x431   : > { %v3765_v37 = vpop.f32.mrf.mxu1  ;;  %6622 = vmatmul.mubr.bf16.gmra.mxu1 %v4436_v5 }
 0x432   : > { %v4215_v23 = vpop.f32.mrf.mxu0  ;;  %v3876_v44 = vadd.f32 %v3765_v37, %v8138_v50  ;;  %6625 = vmatprep.mubr.msk.bf16.mxu1 %vm6795_vm0, %v8077_v41 }
 0x433   : > { %v6411_v39 = vpop.f32.mrf.mxu1 }
 0x434   : > { %v6511_v26 = vpop.f32.mrf.mxu0  ;;  %v8303_v12 = vadd.f32 %v4215_v23, %v3876_v44 }
 0x435   : > { %v3768_v34 = vpop.f32.mrf.mxu1 }
 0x436   : > { %v4218_v45 = vpop.f32.mrf.mxu0  ;;  %v3877_v11 = vadd.f32 %v3768_v34, %v8141_v1 }
 0x437   : > { %v6412_v33 = vpop.f32.mrf.mxu1 }
 0x438   : > { %v6512_v36 = vpop.f32.mrf.mxu0  ;;  %v8306_v32 = vadd.f32 %v4218_v45, %v3877_v11 }
 0x439   : > { %v3773_v14 = vpop.f32.mrf.mxu1  ;;  %6626 = vmatmul.mubr.bf16.gmra.mxu1 %v4437_v21 }
 0x43a   : > { %v4223_v54 = vpop.f32.mrf.mxu0  ;;  %v3878_v50 = vadd.f32 %v3773_v14, %v8146_v10 }
 0x43b   : > { %v6415_v41 = vpop.f32.mrf.mxu1 }
 0x43c   : > { %v6515_v48 = vpop.f32.mrf.mxu0  ;;  %v8309_v61 = vadd.f32 %v4223_v54, %v3878_v50 }
 0x43d   : > { %v3776_v16 = vpop.f32.mrf.mxu1 }
 0x43e   : > { %v4226_v59 = vpop.f32.mrf.mxu0  ;;  %v3879_v8 = vadd.f32 %v3776_v16, %v8149_v46 }
 0x43f   : > { %v6416_v5 = vpop.f32.mrf.mxu1 }
 0x440   : > { %v6516_v37 = vpop.f32.mrf.mxu0  ;;  %v8312_v1 = vadd.f32 %v4226_v59, %v3879_v8 }
 0x441   : > { %v3781_v23 = vpop.f32.mrf.mxu1 }
 0x442   : > { %v4231_v44 = vpop.f32.mrf.mxu0  ;;  %v3880_v51 = vadd.f32 %v3781_v23, %v8154_v29 }
 0x443   : > { %v6419_v39 = vpop.f32.mrf.mxu1 }
 0x444   : > { %v6519_v26 = vpop.f32.mrf.mxu0  ;;  %v8315_v34 = vadd.f32 %v4231_v44, %v3880_v51 }
 0x445   : > { %v3784_v10 = vpop.f32.mrf.mxu1 }
 0x446   : > { %v4234_v45 = vpop.f32.mrf.mxu0  ;;  %v3881_v21 = vadd.f32 %v3784_v10, %v8157_v20 }
 0x447   : > { %v6420_v11 = vpop.f32.mrf.mxu1 }
 0x448   : > { %v6520_v33 = vpop.f32.mrf.mxu0  ;;  %v8318_v36 = vadd.f32 %v4234_v45, %v3881_v21 }
 0x449   : > { %v3789_v46 = vpop.f32.mrf.mxu1 }
 0x44a   : > { %v4239_v14 = vpop.f32.mrf.mxu0  ;;  %v3882_v54 = vadd.f32 %v3789_v46, %v8162_v55 }
 0x44b   : > { %v6423_v50 = vpop.f32.mrf.mxu1 }
 0x44c   : > { %v6523_v41 = vpop.f32.mrf.mxu0  ;;  %v8321_v48 = vadd.f32 %v4239_v14, %v3882_v54 }
 0x44d   : > { %v3792_v29 = vpop.f32.mrf.mxu1 }
 0x44e   : > { %v4242_v16 = vpop.f32.mrf.mxu0  ;;  %v3883_v59 = vadd.f32 %v3792_v29, %v8165_v25  ;;  %v8332_v25 = vld [vmem:[%s8555_s4] ss:$0 sm:$0xff] }
 0x44f   : > { %v6424_v8 = vpop.f32.mrf.mxu1 }
 0x450   : > { %v6524_v5 = vpop.f32.mrf.mxu0  ;;  %v8324_v37 = vadd.f32 %v4242_v16, %v3883_v59 }
 0x451   : > { %v3797_v20 = vpop.f32.mrf.mxu1 }
 0x452   : > { %v4247_v23 = vpop.f32.mrf.mxu0  ;;  %v3884_v44 = vadd.f32 %v3797_v20, %v8170_v24  ;;  %v6744_v20 = vld [vmem:[%s8556_s5] sm:$0xff] }
 0x453   : > { %v6427_v51 = vpop.f32.mrf.mxu1 }
 0x454   : > { %v6527_v39 = vpop.f32.mrf.mxu0  ;;  %v8327_v26 = vadd.f32 %v4247_v23, %v3884_v44  ;;  %v6745_v23 = vld [vmem:[%s8556_s5 + $0x8] sm:$0xff] }
 0x455   : > { %v3800_v55 = vpop.f32.mrf.mxu1 }
 0x456   : > { %v4250_v10 = vpop.f32.mrf.mxu0 }
 0x457   : > { %v6428_v45 = vpop.f32.mrf.mxu1 }
 0x458   : > { %v6528_v21 = vpop.f32.mrf.mxu0 }
 0x459   : > { %v4537_v11 = vpop.f32.mrf.mxu1 }
 0x45a   : > { %v4744_v33 = vadd.f32 %v4537_v11, %v8175_v35 }
 0x45b   : > { %v6547_v46 = vpop.f32.mrf.mxu1 }
 0x45c   : > { %v4874_v14 = vadd.f32 %v8332_v25, %v4744_v33 }
 0x45d   : > { %v4540_v24 = vpop.f32.mrf.mxu1 }
 0x45e   : > { %v4745_v54 = vadd.f32 %v4540_v24, %v8178_v13  ;;  %v4915_v41 = vmax.f32 %v4874_v14, 0.0 }
 0x45f   : > { %v6548_v50 = vpop.f32.mrf.mxu1 }
 0x460   : > { %v4875_v29 = vadd.f32 %v8332_v25, %v4745_v54  ;;  %v4956_v35 = vmul.f32 %v6744_v20, %v4915_v41  ;;  %v6747_v50 = vld [vmem:[%s8556_s5 + $0x18] sm:$0xff]  ;;  %v6748_v20 = vld [vmem:[%s8556_s5 + $0x20] sm:$0xff] }
 0x461   : > { %v4545_v16 = vpop.f32.mrf.mxu1 }
 0x462   : > { %v4916_v59 = vmax.f32 %v4875_v29, 0.0  ;;  %v4746_v8 = vadd.f32 %v4545_v16, %v8183_v49  ;;  %v6746_v49 = vld [vmem:[%s8556_s5 + $0x10] sm:$0xff] }
 0x463   : > { %v6551_v5 = vpop.f32.mrf.mxu1 }
 0x464   : > { %v4957_v44 = vmul.f32 %v6745_v23, %v4916_v59  ;;  %v4876_v13 = vadd.f32 %v8332_v25, %v4746_v8 }
 0x465   : > { %v4548_v51 = vpop.f32.mrf.mxu1 }
 0x466   : > { %v4997_v39 = vadd.f32 %v4957_v44, %v4956_v35  ;;  %v4917_v55 = vmax.f32 %v4876_v13, 0.0  ;;  %v4747_v10 = vadd.f32 %v4548_v51, %v8186_v56 }
 0x467   : > { %v6552_v45 = vpop.f32.mrf.mxu1 }
 0x468   : > { %v4958_v21 = vmul.f32 %v6746_v49, %v4917_v55  ;;  %v4877_v11 = vadd.f32 %v8332_v25, %v4747_v10  ;;  %v6749_v55 = vld [vmem:[%s8556_s5 + $0x28] sm:$0xff] }
 0x469   : > { %v4553_v33 = vpop.f32.mrf.mxu1 }
 0x46a   : > { %v4998_v46 = vadd.f32 %v4997_v39, %v4958_v21  ;;  %v4918_v14 = vmax.f32 %v4877_v11, 0.0  ;;  %v4748_v24 = vadd.f32 %v4553_v33, %v8191_v9 }
 0x46b   : > { %v6555_v54 = vpop.f32.mrf.mxu1 }
 0x46c   : > { %v4959_v41 = vmul.f32 %v6747_v50, %v4918_v14  ;;  %v4878_v56 = vadd.f32 %v8332_v25, %v4748_v24 }
 0x46d   : > { %v4556_v29 = vpop.f32.mrf.mxu1 }
 0x46e   : > { %v4999_v16 = vadd.f32 %v4998_v46, %v4959_v41  ;;  %v4919_v59 = vmax.f32 %v4878_v56, 0.0  ;;  %v4749_v8 = vadd.f32 %v4556_v29, %v8194_v28  ;;  %v6750_v46 = vld [vmem:[%s8556_s5 + $0x30] sm:$0xff] }
 0x46f   : > { %v6556_v5 = vpop.f32.mrf.mxu1 }
 0x470   : > { %v4960_v35 = vmul.f32 %v6748_v20, %v4919_v59  ;;  %v4879_v9 = vadd.f32 %v8332_v25, %v4749_v8 }
 0x471   : > { %v4561_v23 = vpop.f32.mrf.mxu1 }
 0x472   : > { %v5000_v44 = vadd.f32 %v4999_v16, %v4960_v35  ;;  %v4920_v13 = vmax.f32 %v4879_v9, 0.0  ;;  %v4750_v51 = vadd.f32 %v4561_v23, %v8199_v6  ;;  %v6752_v9 = vld [vmem:[%s8556_s5 + $0x40] sm:$0xff] }
 0x473   : > { %v6559_v39 = vpop.f32.mrf.mxu1 }
 0x474   : > { %v4961_v10 = vmul.f32 %v6749_v55, %v4920_v13  ;;  %v4880_v28 = vadd.f32 %v8332_v25, %v4750_v51 }
 0x475   : > { %v4564_v45 = vpop.f32.mrf.mxu1 }
 0x476   : > { %v5001_v49 = vadd.f32 %v5000_v44, %v4961_v10  ;;  %v4921_v21 = vmax.f32 %v4880_v28, 0.0  ;;  %v4751_v11 = vadd.f32 %v4564_v45, %v8202_v30  ;;  %v6751_v30 = vld [vmem:[%s8556_s5 + $0x38] sm:$0xff]  ;;  %v6754_v45 = vld [vmem:[#allocation2] sm:$0xff] }
 0x477   : > { %v6560_v33 = vpop.f32.mrf.mxu1  ;;  %5044 = vst [vmem:[%s8387_s8] sm:$0xff] %v6754_v45 }
 0x478   : > { %v4962_v6 = vmul.f32 %v6750_v46, %v4921_v21  ;;  %v4881_v14 = vadd.f32 %v8332_v25, %v4751_v11  ;;  %v6755_v46 = vld [vmem:[%s8556_s5 + $0x50] sm:$0xff] }
 0x479   : > { %v4569_v24 = vpop.f32.mrf.mxu1 }
 0x47a   : > { %v5002_v54 = vadd.f32 %v5001_v49, %v4962_v6  ;;  %v4922_v50 = vmax.f32 %v4881_v14, 0.0  ;;  %v4752_v41 = vadd.f32 %v4569_v24, %v8207_v27 }
 0x47b   : > { %v6563_v56 = vpop.f32.mrf.mxu1 }
 0x47c   : > { %v4963_v29 = vmul.f32 %v6751_v30, %v4922_v50  ;;  %v4882_v16 = vadd.f32 %v8332_v25, %v4752_v41  ;;  %v6756_v30 = vld [vmem:[%s8556_s5 + $0x58] sm:$0xff] }
 0x47d   : > { %v4572_v59 = vpop.f32.mrf.mxu1 }
 0x47e   : > { %v5003_v8 = vadd.f32 %v5002_v54, %v4963_v29  ;;  %v4923_v5 = vmax.f32 %v4882_v16, 0.0  ;;  %v4753_v20 = vadd.f32 %v4572_v59, %v8210_v52  ;;  %v6753_v52 = vld [vmem:[%s8556_s5 + $0x48] sm:$0xff] }
 0x47f   : > { %v6564_v35 = vpop.f32.mrf.mxu1 }
 0x480   : > { %v4964_v27 = vmul.f32 %v6752_v9, %v4923_v5  ;;  %v4883_v23 = vadd.f32 %v8332_v25, %v4753_v20  ;;  %v6757_v35 = vld [vmem:[%s8556_s5 + $0x60] sm:$0xff] }
 0x481   : > { %v4577_v44 = vpop.f32.mrf.mxu1 }
 0x482   : > { %v5004_v13 = vadd.f32 %v5003_v8, %v4964_v27  ;;  %v4924_v51 = vmax.f32 %v4883_v23, 0.0  ;;  %v4754_v39 = vadd.f32 %v4577_v44, %v8215_v40 }
 0x483   : > { %v6567_v55 = vpop.f32.mrf.mxu1 }
 0x484   : > { %v4965_v10 = vmul.f32 %v6753_v52, %v4924_v51  ;;  %v4884_v28 = vadd.f32 %v8332_v25, %v4754_v39  ;;  %v6758_v39 = vld [vmem:[%s8556_s5 + $0x68] sm:$0xff] }
 0x485   : > { %v4580_v49 = vpop.f32.mrf.mxu1 }
 0x486   : > { %v5005_v21 = vadd.f32 %v5004_v13, %v4965_v10  ;;  %v4925_v40 = vmax.f32 %v4884_v28, 0.0  ;;  %v4755_v11 = vadd.f32 %v4580_v49, %v8218_v0 }
 0x487   : > { %v6568_v33 = vpop.f32.mrf.mxu1 }
 0x488   : > { %v4966_v6 = vmul.f32 %v6755_v46, %v4925_v40  ;;  %v4885_v14 = vadd.f32 %v8332_v25, %v4755_v11 }
 0x489   : > { %v4585_v24 = vpop.f32.mrf.mxu1 }
 0x48a   : > { %v5006_v54 = vadd.f32 %v5005_v21, %v4966_v6  ;;  %v4926_v50 = vmax.f32 %v4885_v14, 0.0  ;;  %v4756_v41 = vadd.f32 %v4585_v24, %v8223_v17  ;;  %v6759_v21 = vld [vmem:[%s8556_s5 + $0x70] sm:$0xff]  ;;  %v6760_v24 = vld [vmem:[%s8556_s5 + $0x78] sm:$0xff] }
 0x48b   : > { %v6571_v56 = vpop.f32.mrf.mxu1 }
 0x48c   : > { %v4967_v29 = vmul.f32 %v6756_v30, %v4926_v50  ;;  %v4886_v0 = vadd.f32 %v8332_v25, %v4756_v41 }
 0x48d   : > { %v4588_v16 = vpop.f32.mrf.mxu1 }
 0x48e   : > { %v5007_v59 = vadd.f32 %v5006_v54, %v4967_v29  ;;  %v4927_v8 = vmax.f32 %v4886_v0, 0.0  ;;  %v4757_v5 = vadd.f32 %v4588_v16, %v8226_v15  ;;  %v6761_v0 = vld [vmem:[%s8556_s5 + $0x80] sm:$0xff] }
 0x48f   : > { %v6572_v20 = vpop.f32.mrf.mxu1 }
 0x490   : > { %v4968_v9 = vmul.f32 %v6757_v35, %v4927_v8  ;;  %v4887_v17 = vadd.f32 %v8332_v25, %v4757_v5 }
 0x491   : > { %v4593_v27 = vpop.f32.mrf.mxu1 }
 0x492   : > { %v5008_v23 = vadd.f32 %v5007_v59, %v4968_v9  ;;  %v4928_v44 = vmax.f32 %v4887_v17, 0.0  ;;  %v4758_v13 = vadd.f32 %v4593_v27, %v8231_v22  ;;  %v6762_v9 = vld [vmem:[%s8556_s5 + $0x88] sm:$0xff] }
 0x493   : > { %v6575_v51 = vpop.f32.mrf.mxu1 }
 0x494   : > { %v4969_v55 = vmul.f32 %v6758_v39, %v4928_v44  ;;  %v4888_v15 = vadd.f32 %v8332_v25, %v4758_v13  ;;  %v6763_v39 = vld [vmem:[%s8556_s5 + $0x90] sm:$0xff] }
 0x495   : > { %v4596_v52 = vpop.f32.mrf.mxu1 }
 0x496   : > { %v5009_v10 = vadd.f32 %v5008_v23, %v4969_v55  ;;  %v4929_v28 = vmax.f32 %v4888_v15, 0.0  ;;  %v4759_v45 = vadd.f32 %v4596_v52, %v8234_v62 }
 0x497   : > { %v6576_v49 = vpop.f32.mrf.mxu1 }
 0x498   : > { %v4970_v40 = vmul.f32 %v6759_v21, %v4929_v28  ;;  %v4889_v22 = vadd.f32 %v8332_v25, %v4759_v45  ;;  %v6764_v49 = vld [vmem:[%s8556_s5 + $0x98] sm:$0xff] }
 0x499   : > { %v4601_v11 = vpop.f32.mrf.mxu1 }
 0x49a   : > { %v5010_v33 = vadd.f32 %v5009_v10, %v4970_v40  ;;  %v4930_v46 = vmax.f32 %v4889_v22, 0.0  ;;  %v4760_v6 = vadd.f32 %v4601_v11, %v8239_v53 }
 0x49b   : > { %v6579_v14 = vpop.f32.mrf.mxu1 }
 0x49c   : > { %v4971_v54 = vmul.f32 %v6760_v24, %v4930_v46  ;;  %v4890_v62 = vadd.f32 %v8332_v25, %v4760_v6  ;;  %v6765_v6 = vld [vmem:[%s8556_s5 + $0xa0] sm:$0xff] }
 0x49d   : > { %v4604_v50 = vpop.f32.mrf.mxu1 }
 0x49e   : > { %v5011_v41 = vadd.f32 %v5010_v33, %v4971_v54  ;;  %v4931_v56 = vmax.f32 %v4890_v62, 0.0  ;;  %v4761_v30 = vadd.f32 %v4604_v50, %v8242_v60 }
 0x49f   : > { %v6580_v29 = vpop.f32.mrf.mxu1 }
 0x4a0   : > { %v4972_v16 = vmul.f32 %v6761_v0, %v4931_v56  ;;  %v4891_v53 = vadd.f32 %v8332_v25, %v4761_v30  ;;  %v6766_v56 = vld [vmem:[%s8556_s5 + $0xa8] sm:$0xff] }
 0x4a1   : > { %v4609_v59 = vpop.f32.mrf.mxu1 }
 0x4a2   : > { %v5012_v8 = vadd.f32 %v5011_v41, %v4972_v16  ;;  %v4932_v5 = vmax.f32 %v4891_v53, 0.0  ;;  %v4762_v20 = vadd.f32 %v4609_v59, %v8247_v4 }
 0x4a3   : > { %v6583_v35 = vpop.f32.mrf.mxu1 }
 0x4a4   : > { %v4973_v17 = vmul.f32 %v6762_v9, %v4932_v5  ;;  %v4892_v60 = vadd.f32 %v8332_v25, %v4762_v20 }
 0x4a5   : > { %v4612_v27 = vpop.f32.mrf.mxu1 }
 0x4a6   : > { %v5013_v23 = vadd.f32 %v5012_v8, %v4973_v17  ;;  %v4933_v44 = vmax.f32 %v4892_v60, 0.0  ;;  %v4763_v13 = vadd.f32 %v4612_v27, %v8250_v43  ;;  %v6767_v8 = vld [vmem:[%s8556_s5 + $0xb0] sm:$0xff]  ;;  %v6768_v27 = vld [vmem:[%s8556_s5 + $0xb8] sm:$0xff] }
 0x4a7   : > { %v6584_v51 = vpop.f32.mrf.mxu1 }
 0x4a8   : > { %v4974_v55 = vmul.f32 %v6763_v39, %v4933_v44  ;;  %v4893_v4 = vadd.f32 %v8332_v25, %v4763_v13 }
 0x4a9   : > { %v4617_v15 = vpop.f32.mrf.mxu1 }
 0x4aa   : > { %v5014_v52 = vadd.f32 %v5013_v23, %v4974_v55  ;;  %v4934_v10 = vmax.f32 %v4893_v4, 0.0  ;;  %v4764_v28 = vadd.f32 %v4617_v15, %v8255_v2  ;;  %v6769_v4 = vld [vmem:[%s8556_s5 + $0xc0] sm:$0xff] }
 0x4ab   : > { %v6587_v45 = vpop.f32.mrf.mxu1 }
 0x4ac   : > { %v4975_v21 = vmul.f32 %v6764_v49, %v4934_v10  ;;  %v4894_v43 = vadd.f32 %v8332_v25, %v4764_v28 }
 0x4ad   : > { %v4620_v40 = vpop.f32.mrf.mxu1 }
 0x4ae   : > { %v5015_v22 = vadd.f32 %v5014_v52, %v4975_v21  ;;  %v4935_v11 = vmax.f32 %v4894_v43, 0.0  ;;  %v4765_v33 = vadd.f32 %v4620_v40, %v8258_v47  ;;  %v6770_v21 = vld [vmem:[%s8556_s5 + $0xc8] sm:$0xff] }
 0x4af   : > { %v6588_v46 = vpop.f32.mrf.mxu1 }
 0x4b0   : > { %v4976_v14 = vmul.f32 %v6765_v6, %v4935_v11  ;;  %v4895_v2 = vadd.f32 %v8332_v25, %v4765_v33  ;;  %v6771_v6 = vld [vmem:[%s8556_s5 + $0xd0] sm:$0xff] }
 0x4b1   : > { %v4625_v24 = vpop.f32.mrf.mxu1 }
 0x4b2   : > { %v5016_v54 = vadd.f32 %v5015_v22, %v4976_v14  ;;  %v4936_v62 = vmax.f32 %v4895_v2, 0.0  ;;  %v4766_v50 = vadd.f32 %v4625_v24, %v8263_v31 }
 0x4b3   : > { %v6591_v41 = vpop.f32.mrf.mxu1 }
 0x4b4   : > { %v4977_v30 = vmul.f32 %v6766_v56, %v4936_v62  ;;  %v4896_v47 = vadd.f32 %v8332_v25, %v4766_v50  ;;  %v6772_v41 = vld [vmem:[%s8556_s5 + $0xd8] sm:$0xff] }
 0x4b5   : > { %v4628_v29 = vpop.f32.mrf.mxu1 }
 0x4b6   : > { %v5017_v0 = vadd.f32 %v5016_v54, %v4977_v30  ;;  %v4937_v16 = vmax.f32 %v4896_v47, 0.0  ;;  %v4767_v53 = vadd.f32 %v4628_v29, %v8266_v58 }
 0x4b7   : > { %v6592_v59 = vpop.f32.mrf.mxu1 }
 0x4b8   : > { %v4978_v5 = vmul.f32 %v6767_v8, %v4937_v16  ;;  %v4897_v31 = vadd.f32 %v8332_v25, %v4767_v53  ;;  %v6773_v53 = vld [vmem:[%s8556_s5 + $0xe0] sm:$0xff] }
 0x4b9   : > { %v4633_v20 = vpop.f32.mrf.mxu1 }
 0x4ba   : > { %v5018_v35 = vadd.f32 %v5017_v0, %v4978_v5  ;;  %v4938_v9 = vmax.f32 %v4897_v31, 0.0  ;;  %v4768_v17 = vadd.f32 %v4633_v20, %v8271_v19 }
 0x4bb   : > { %v6595_v60 = vpop.f32.mrf.mxu1 }
 0x4bc   : > { %v4979_v23 = vmul.f32 %v6768_v27, %v4938_v9  ;;  %v4898_v58 = vadd.f32 %v8332_v25, %v4768_v17  ;;  %v6774_v9 = vld [vmem:[%s8556_s5 + $0xe8] sm:$0xff] }
 0x4bd   : > { %v4636_v44 = vpop.f32.mrf.mxu1 }
 0x4be   : > { %v5019_v13 = vadd.f32 %v5018_v35, %v4979_v23  ;;  %v4939_v51 = vmax.f32 %v4898_v58, 0.0  ;;  %v4769_v39 = vadd.f32 %v4636_v44, %v8274_v3 }
 0x4bf   : > { %v6596_v55 = vpop.f32.mrf.mxu1 }
 0x4c0   : > { %v4980_v15 = vmul.f32 %v6769_v4, %v4939_v51  ;;  %v4899_v19 = vadd.f32 %v8332_v25, %v4769_v39 }
 0x4c1   : > { %v4641_v52 = vpop.f32.mrf.mxu1 }
 0x4c2   : > { %v5020_v10 = vadd.f32 %v5019_v13, %v4980_v15  ;;  %v4940_v28 = vmax.f32 %v4899_v19, 0.0  ;;  %v4770_v45 = vadd.f32 %v4641_v52, %v8279_v18  ;;  %v6775_v13 = vld [vmem:[%s8556_s5 + $0xf0] sm:$0xff]  ;;  %v6776_v52 = vld [vmem:[%s8556_s5 + $0xf8] sm:$0xff] }
 0x4c3   : > { %v6599_v49 = vpop.f32.mrf.mxu1 }
 0x4c4   : > { %v4981_v43 = vmul.f32 %v6770_v21, %v4940_v28  ;;  %v4900_v3 = vadd.f32 %v8332_v25, %v4770_v45 }
 0x4c5   : > { %v4644_v40 = vpop.f32.mrf.mxu1 }
 0x4c6   : > { %v5021_v22 = vadd.f32 %v5020_v10, %v4981_v43  ;;  %v4941_v11 = vmax.f32 %v4900_v3, 0.0  ;;  %v4771_v33 = vadd.f32 %v4644_v40, %v8282_v7  ;;  %v6777_v3 = vld [vmem:[%s8556_s5 + $0x100] sm:$0xff] }
 0x4c7   : > { %v6600_v46 = vpop.f32.mrf.mxu1 }
 0x4c8   : > { %v4982_v14 = vmul.f32 %v6771_v6, %v4941_v11  ;;  %v4901_v18 = vadd.f32 %v8332_v25, %v4771_v33 }
 0x4c9   : > { %v4649_v2 = vpop.f32.mrf.mxu1 }
 0x4ca   : > { %v5022_v24 = vadd.f32 %v5021_v22, %v4982_v14  ;;  %v4942_v54 = vmax.f32 %v4901_v18, 0.0  ;;  %v4772_v62 = vadd.f32 %v4649_v2, %v8287_v38  ;;  %v6778_v14 = vld [vmem:[%s8556_s5 + $0x108] sm:$0xff] }
 0x4cb   : > { %v6603_v50 = vpop.f32.mrf.mxu1 }
 0x4cc   : > { %v4983_v56 = vmul.f32 %v6772_v41, %v4942_v54  ;;  %v4902_v7 = vadd.f32 %v8332_v25, %v4772_v62  ;;  %v6779_v41 = vld [vmem:[%s8556_s5 + $0x110] sm:$0xff] }
 0x4cd   : > { %v4652_v30 = vpop.f32.mrf.mxu1 }
 0x4ce   : > { %v5023_v47 = vadd.f32 %v5022_v24, %v4983_v56  ;;  %v4943_v29 = vmax.f32 %v4902_v7, 0.0  ;;  %v4773_v0 = vadd.f32 %v4652_v30, %v8290_v57 }
 0x4cf   : > { %v6604_v16 = vpop.f32.mrf.mxu1 }
 0x4d0   : > { %v4984_v59 = vmul.f32 %v6773_v53, %v4943_v29  ;;  %v4903_v38 = vadd.f32 %v8332_v25, %v4773_v0  ;;  %v6780_v16 = vld [vmem:[%s8556_s5 + $0x118] sm:$0xff] }
 0x4d1   : > { %v4657_v8 = vpop.f32.mrf.mxu1 }
 0x4d2   : > { %v5024_v5 = vadd.f32 %v5023_v47, %v4984_v59  ;;  %v4944_v31 = vmax.f32 %v4903_v38, 0.0  ;;  %v4774_v20 = vadd.f32 %v4657_v8, %v8295_v42 }
 0x4d3   : > { %v6607_v35 = vpop.f32.mrf.mxu1 }
 0x4d4   : > { %v4985_v17 = vmul.f32 %v6774_v9, %v4944_v31  ;;  %v4904_v57 = vadd.f32 %v8332_v25, %v4774_v20  ;;  %v6781_v20 = vld [vmem:[%s8556_s5 + $0x120] sm:$0xff] }
 0x4d5   : > { %v4660_v60 = vpop.f32.mrf.mxu1 }
 0x4d6   : > { %v5025_v27 = vadd.f32 %v5024_v5, %v4985_v17  ;;  %v4945_v23 = vmax.f32 %v4904_v57, 0.0  ;;  %v4775_v58 = vadd.f32 %v4660_v60, %v8298_v63 }
 0x4d7   : > { %v6608_v44 = vpop.f32.mrf.mxu1 }
 0x4d8   : > { %v4986_v51 = vmul.f32 %v6775_v13, %v4945_v23  ;;  %v4905_v42 = vadd.f32 %v8332_v25, %v4775_v58  ;;  %v6782_v23 = vld [vmem:[%s8556_s5 + $0x128] sm:$0xff] }
 0x4d9   : > { %v4665_v39 = vpop.f32.mrf.mxu1 }
 0x4da   : > { %v5026_v55 = vadd.f32 %v5025_v27, %v4986_v51  ;;  %v4946_v4 = vmax.f32 %v4905_v42, 0.0  ;;  %v4776_v15 = vadd.f32 %v4665_v39, %v8303_v12 }
 0x4db   : > { %v6611_v19 = vpop.f32.mrf.mxu1 }
 0x4dc   : > { %v4987_v10 = vmul.f32 %v6776_v52, %v4946_v4  ;;  %v4906_v63 = vadd.f32 %v8332_v25, %v4776_v15 }
 0x4dd   : > { %v4668_v28 = vpop.f32.mrf.mxu1 }
 0x4de   : > { %v5027_v45 = vadd.f32 %v5026_v55, %v4987_v10  ;;  %v4947_v49 = vmax.f32 %v4906_v63, 0.0  ;;  %v4777_v21 = vadd.f32 %v4668_v28, %v8306_v32  ;;  %v6783_v55 = vld [vmem:[%s8556_s5 + $0x130] sm:$0xff]  ;;  %v6784_v28 = vld [vmem:[%s8556_s5 + $0x138] sm:$0xff] }
 0x4df   : > { %v6612_v43 = vpop.f32.mrf.mxu1 }
 0x4e0   : > { %v4988_v40 = vmul.f32 %v6777_v3, %v4947_v49  ;;  %v4907_v12 = vadd.f32 %v8332_v25, %v4777_v21 }
 0x4e1   : > { %v4673_v22 = vpop.f32.mrf.mxu1 }
 0x4e2   : > { %v5028_v11 = vadd.f32 %v5027_v45, %v4988_v40  ;;  %v4948_v33 = vmax.f32 %v4907_v12, 0.0  ;;  %v4778_v46 = vadd.f32 %v4673_v22, %v8309_v61  ;;  %v6785_v40 = vld [vmem:[%s8556_s5 + $0x140] sm:$0xff] }
 0x4e3   : > { %v6615_v6 = vpop.f32.mrf.mxu1 }
 0x4e4   : > { %v4989_v18 = vmul.f32 %v6778_v14, %v4948_v33  ;;  %v4908_v32 = vadd.f32 %v8332_v25, %v4778_v46 }
 0x4e5   : > { %v4676_v2 = vpop.f32.mrf.mxu1 }
 0x4e6   : > { %v5029_v24 = vadd.f32 %v5028_v11, %v4989_v18  ;;  %v4949_v54 = vmax.f32 %v4908_v32, 0.0  ;;  %v4779_v62 = vadd.f32 %v4676_v2, %v8312_v1 }
 0x4e7   : > { %v6616_v50 = vpop.f32.mrf.mxu1 }
 0x4e8   : > { %v4990_v56 = vmul.f32 %v6779_v41, %v4949_v54  ;;  %v4909_v61 = vadd.f32 %v8332_v25, %v4779_v62 }
 0x4e9   : > { %v4681_v7 = vpop.f32.mrf.mxu1 }
 0x4ea   : > { %v5030_v30 = vadd.f32 %v5029_v24, %v4990_v56  ;;  %v4950_v47 = vmax.f32 %v4909_v61, 0.0  ;;  %v4780_v29 = vadd.f32 %v4681_v7, %v8315_v34 }
 0x4eb   : > { %v6619_v0 = vpop.f32.mrf.mxu1 }
 0x4ec   : > { %v4991_v53 = vmul.f32 %v6780_v16, %v4950_v47  ;;  %v4910_v1 = vadd.f32 %v8332_v25, %v4780_v29 }
 0x4ed   : > { %v4684_v59 = vpop.f32.mrf.mxu1 }
 0x4ee   : > { %v5031_v38 = vadd.f32 %v5030_v30, %v4991_v53  ;;  %v4951_v8 = vmax.f32 %v4910_v1, 0.0  ;;  %v4781_v5 = vadd.f32 %v4684_v59, %v8318_v36 }
 0x4ef   : > { %v6620_v31 = vpop.f32.mrf.mxu1 }
 0x4f0   : > { %v4992_v35 = vmul.f32 %v6781_v20, %v4951_v8  ;;  %v4911_v34 = vadd.f32 %v8332_v25, %v4781_v5 }
 0x4f1   : > { %v4689_v9 = vpop.f32.mrf.mxu1 }
 0x4f2   : > { %v5032_v17 = vadd.f32 %v5031_v38, %v4992_v35  ;;  %v4952_v57 = vmax.f32 %v4911_v34, 0.0  ;;  %v4782_v60 = vadd.f32 %v4689_v9, %v8321_v48 }
 0x4f3   : > { %v6623_v27 = vpop.f32.mrf.mxu1 }
 0x4f4   : > { %v4993_v58 = vmul.f32 %v6782_v23, %v4952_v57  ;;  %v4912_v36 = vadd.f32 %v8332_v25, %v4782_v60 }
 0x4f5   : > { %v4692_v44 = vpop.f32.mrf.mxu1 }
 0x4f6   : > { %v5033_v13 = vadd.f32 %v5032_v17, %v4993_v58  ;;  %v4953_v51 = vmax.f32 %v4912_v36, 0.0  ;;  %v4783_v42 = vadd.f32 %v4692_v44, %v8324_v37 }
 0x4f7   : > { %v6624_v39 = vpop.f32.mrf.mxu1 }
 0x4f8   : > { %v4994_v4 = vmul.f32 %v6783_v55, %v4953_v51  ;;  %v4913_v48 = vadd.f32 %v8332_v25, %v4783_v42 }
 0x4f9   : > { %v4697_v15 = vpop.f32.mrf.mxu1 }
 0x4fa   : > { %v5034_v19 = vadd.f32 %v5033_v13, %v4994_v4  ;;  %v4954_v52 = vmax.f32 %v4913_v48, 0.0  ;;  %v4784_v10 = vadd.f32 %v4697_v15, %v8327_v26 }
 0x4fb   : > { %v6627_v63 = vpop.f32.mrf.mxu1 }
 0x4fc   : > { %v4995_v45 = vmul.f32 %v6784_v28, %v4954_v52  ;;  %v4914_v37 = vadd.f32 %v8332_v25, %v4784_v10 }
 0x4fd   : > { %v4700_v49 = vpop.f32.mrf.mxu1 }
 0x4fe   : > { %v5035_v21 = vadd.f32 %v5034_v19, %v4995_v45  ;;  %v4955_v43 = vmax.f32 %v4914_v37, 0.0 }
 0x4ff   : > { %v6628_v3 = vpop.f32.mrf.mxu1 }
 0x500   : > { %v4996_v12 = vmul.f32 %v6785_v40, %v4955_v43 }
 0x502   : > { %v5036_v22 = vadd.f32 %v5035_v21, %v4996_v12 }
 0x504   : > { %v5037_v26 = vrot.slane %v5036_v22, 4 }
 0x506   : > { %v5038_v11 = vadd.f32 %v5037_v26, %v5036_v22 }
 0x508   : > { %v5039_v33 = vrot.slane %v5038_v11, 2 }
 0x50a   : > { %v5040_v46 = vadd.f32 %v5039_v33, %v5038_v11 }
 0x50c   : > { %v5041_v6 = vrot.slane %v5040_v46, 1 }
 0x50e   : > { %v5042_v14 = vadd.f32 %v5041_v6, %v5040_v46 }
 0x510   : > { %v5043_v18 = vmul.f32 0.00390625, %v5042_v14 }
 0x512   : > { %5045 = vst [vmem:[%s8387_s8] sm:$0x1] %v5043_v18 }
 0x513 PF: > { %s16_s21 = sadd.s32 1, %s6792_s21  }
 0x514   : > { %p13_p5 = scmp.ge.s32.totalorder %s16_s21, 4  }
 0x516   :  { %15 = sbr.rel (!%p13_p5) target bundleno = 1 (0x1), region = 82 }

</bundles_post_ra>
